<compile_context>
chip_gen: v5e
topology: v5e:2x2
jax: 0.10.0
libtpu: 0.0.40
codegen_flags: <defaults>
</compile_context>

<pallas_src>
import functools

import jax
import jax.numpy as jnp
from jax import lax
from jax.experimental import pallas as pl
from jax.experimental.pallas import tpu as pltpu


def _fuse_gate_weights(w_f_T, w_b_T, hidden, gate_pad):
    """Block-diagonal [fwd; bwd] weight with 128-lane-aligned per-gate blocks.

    w_f_T, w_b_T: (K, 4H) transposed PyTorch LSTM weights (gate order i,f,g,o).
    Returns (K_f + K_b, 4*gate_pad) with per-gate column layout
    [gate_fwd (H) | gate_bwd (H) | zero pad (gate_pad - 2H)].
    """
    H, Gp = hidden, gate_pad
    Kf, Kb = w_f_T.shape[0], w_b_T.shape[0]
    dt = w_f_T.dtype
    top = jnp.concatenate(
        [w_f_T.reshape(Kf, 4, H),
         jnp.zeros((Kf, 4, Gp - H), dt)], axis=2).reshape(Kf, 4 * Gp)
    bot = jnp.concatenate(
        [jnp.zeros((Kb, 4, H), dt),
         w_b_T.reshape(Kb, 4, H),
         jnp.zeros((Kb, 4, Gp - 2 * H), dt)], axis=2).reshape(Kb, 4 * Gp)
    return jnp.concatenate([top, bot], axis=0)


def rnn_classifier_kernel(x_ref, wih_ref, whh_ref, b_ref, wtop_ref, btop_ref,
                          out_ref, gx_ref, *, seq_len, batch, gate_pad):
    S, B, Gp = seq_len, batch, gate_pad

    # ---- hoisted input projection: one MXU matmul covers every timestep and
    # both directions (x rows are [x_t | x_{S-1-t}], wih is block-diagonal),
    # bias added ONCE here; stored as bf16 to halve scratch + per-step vld.
    gx_ref[...] = (jnp.dot(x_ref[...], wih_ref[...],
                           preferred_element_type=jnp.float32)
                   + b_ref[...]).astype(jnp.bfloat16)

    whh = whh_ref[...]                                   # (Gp, 4*Gp) bf16

    h0 = jnp.zeros((B, Gp), jnp.bfloat16)                # [h_f | h_b | 0-pad]
    c0 = jnp.zeros((B, Gp), jnp.float32)

    def step(t, carry):
        h, c = carry
        row = pl.multiple_of(t * B, B)
        g_x = gx_ref[pl.ds(row, B), :]                   # (B, 4*Gp) bf16, precomputed
        gates = g_x.astype(jnp.float32) + jnp.dot(
            h, whh, preferred_element_type=jnp.float32)
        # 128-lane-aligned gate blocks: [ i | f | g | o ], each Gp wide.
        i = jax.nn.sigmoid(gates[:, 0 * Gp:1 * Gp])
        f = jax.nn.sigmoid(gates[:, 1 * Gp:2 * Gp])
        g = jnp.tanh(gates[:, 2 * Gp:3 * Gp])
        o = jax.nn.sigmoid(gates[:, 3 * Gp:4 * Gp])
        c_new = f * c + i * g                            # pad lanes stay exactly 0
        h_new = (o * jnp.tanh(c_new)).astype(jnp.bfloat16)
        return h_new, c_new

    # Cap unroll: the carry dependence limits cross-iteration overlap anyway.
    h_final, _ = lax.fori_loop(0, S, step, (h0, c0), unroll=min(S, 8))

    # h_final == [h_fwd | h_bwd | 0]  (== torch.cat([final_state[-2], final_state[-1]], 1))
    logits = jnp.dot(h_final, wtop_ref[...],
                     preferred_element_type=jnp.float32) + btop_ref[...]
    m = jnp.max(logits, axis=1, keepdims=True)
    shifted = logits - m
    lse = jnp.log(jnp.sum(jnp.exp(shifted), axis=1, keepdims=True))
    out_ref[...] = (shifted - lse).astype(out_ref.dtype)


def rnn_text_classifier(texts, params):
    """texts: (S, B) int32.  Returns (B, n_classes) log-probabilities."""
    emb = params["embedding"]                       # (V, E)
    embedded = emb[texts].astype(jnp.float32)       # (S, B, E) -- gather glue in plain JAX
    S, B, E = embedded.shape
    H = params["whh_f"].shape[1]
    n_classes = params["wtop"].shape[0]

    # Lane-pad each fused gate block (fwd H + bwd H) up to a full 128-lane vreg.
    Gp = ((2 * H + 127) // 128) * 128

    # Pad batch to the bf16 sublane tile (16) so the flattened matmul operand
    # and the per-step (B, Gp) carries are full tiles. Padded rows dropped below.
    B_pad = max(16, ((B + 15) // 16) * 16)
    if B_pad != B:
        embedded = jnp.pad(embedded, ((0, 0), (0, B_pad - B), (0, 0)))

    # Per-step fused input [x_t | x_{S-1-t}]; flatten to (S*B_pad, 2E) HERE so
    # the kernel never reshapes (in-kernel merge of non-tile-aligned leading
    # dims would force a VMEM relayout copy).
    x_fused = jnp.concatenate([embedded, embedded[::-1]], axis=-1)   # (S, B_pad, 2E)
    x_flat = x_fused.reshape(S * B_pad, 2 * E).astype(jnp.bfloat16)

    # Block-diagonal, gate-interleaved, lane-padded weights (bf16 MXU operands).
    wih_bd = _fuse_gate_weights(params["wih_f"].T, params["wih_b"].T,
                                H, Gp).astype(jnp.bfloat16)          # (2E, 4*Gp)
    whh_bd = _fuse_gate_weights(params["whh_f"].T, params["whh_b"].T, H, Gp)
    whh_bd = jnp.pad(whh_bd, ((0, Gp - 2 * H), (0, 0))).astype(jnp.bfloat16)  # (Gp, 4*Gp)

    b_f = (params["bih_f"] + params["bhh_f"]).reshape(4, H)
    b_b = (params["bih_b"] + params["bhh_b"]).reshape(4, H)
    b_fused = jnp.concatenate(
        [b_f, b_b, jnp.zeros((4, Gp - 2 * H), jnp.float32)],
        axis=1).reshape(1, 4 * Gp).astype(jnp.float32)

    wtop_T = jnp.pad(params["wtop"].T,                               # (Gp, n_classes)
                     ((0, Gp - 2 * H), (0, 0))).astype(jnp.bfloat16)
    btop = params["btop"].reshape(1, n_classes).astype(jnp.float32)

    kernel = functools.partial(rnn_classifier_kernel,
                               seq_len=S, batch=B_pad, gate_pad=Gp)
    vmem_spec = pl.BlockSpec(memory_space=pltpu.MemorySpace.VMEM)

    out = pl.pallas_call(
        kernel,
        out_shape=jax.ShapeDtypeStruct((B_pad, n_classes), jnp.float32),
        in_specs=[vmem_spec] * 6,
        out_specs=vmem_spec,
        scratch_shapes=[pltpu.VMEM((S * B_pad, 4 * Gp), jnp.bfloat16)],
    )(x_flat, wih_bd, whh_bd, b_fused, wtop_T, btop)
    return out[:B]                                  # drop padded batch rows


def rnn_text_classifier_ref(texts, params):
    """Pure-JAX f32 reference matching PyTorch semantics."""
    x = params["embedding"][texts].astype(jnp.float32)   # (S, B, E)
    S, B, _ = x.shape
    H = params["whh_f"].shape[1]

    def cell(x_t, h, c, wih, whh, bih, bhh):
        gates = x_t @ wih.T + h @ whh.T + bih + bhh
        i = jax.nn.sigmoid(gates[:, 0 * H:1 * H])
        f = jax.nn.sigmoid(gates[:, 1 * H:2 * H])
        g = jnp.tanh(gates[:, 2 * H:3 * H])
        o = jax.nn.sigmoid(gates[:, 3 * H:4 * H])
        c = f * c + i * g
        return o * jnp.tanh(c), c

    h = jnp.zeros((B, H)); c = jnp.zeros((B, H))
    for t in range(S):
        h, c = cell(x[t], h, c, params["wih_f"], params["whh_f"],
                    params["bih_f"], params["bhh_f"])
    h_f = h
    h = jnp.zeros((B, H)); c = jnp.zeros((B, H))
    for t in range(S - 1, -1, -1):
        h, c = cell(x[t], h, c, params["wih_b"], params["whh_b"],
                    params["bih_b"], params["bhh_b"])
    h_b = h
    logits = jnp.concatenate([h_f, h_b], axis=1) @ params["wtop"].T + params["btop"]
    return jax.nn.log_softmax(logits, axis=1)


def init_params(key, voc_size, emb_dim, rnn_size, n_classes):
    ks = jax.random.split(key, 12)
    k_lstm = 1.0 / jnp.sqrt(rnn_size)
    k_lin = 1.0 / jnp.sqrt(2 * rnn_size)
    u = lambda k, shape, s: jax.random.uniform(k, shape, jnp.float32, -s, s)
    return {
        "embedding": jax.random.normal(ks[0], (voc_size, emb_dim), jnp.float32),
        # forward direction
        "wih_f": u(ks[1], (4 * rnn_size, emb_dim), k_lstm),
        "whh_f": u(ks[2], (4 * rnn_size, rnn_size), k_lstm),
        "bih_f": u(ks[3], (4 * rnn_size,), k_lstm),
        "bhh_f": u(ks[4], (4 * rnn_size,), k_lstm),
        # backward direction
        "wih_b": u(ks[5], (4 * rnn_size, emb_dim), k_lstm),
        "whh_b": u(ks[6], (4 * rnn_size, rnn_size), k_lstm),
        "bih_b": u(ks[7], (4 * rnn_size,), k_lstm),
        "bhh_b": u(ks[8], (4 * rnn_size,), k_lstm),
        # top linear layer
        "wtop": u(ks[9], (n_classes, 2 * rnn_size), k_lin),
        "btop": u(ks[10], (n_classes,), k_lin),
    }


if __name__ == "__main__":
    VOC_SIZE = 50
    EMB_DIM = 32
    RNN_SIZE = 32
    N_CLASSES = 4
    SEQ_LEN = 8
    BATCH = 2

    key = jax.random.PRNGKey(0)
    k_params, k_text = jax.random.split(key)
    params = init_params(k_params, VOC_SIZE, EMB_DIM, RNN_SIZE, N_CLASSES)
    texts = jax.random.randint(k_text, (SEQ_LEN, BATCH), 0, VOC_SIZE, dtype=jnp.int32)

    out = rnn_text_classifier(texts, params)
    jax.block_until_ready(out)

    assert out.shape == (BATCH, N_CLASSES)
    # log_softmax rows exp-sum to ~1 (computed in f32 in-kernel)
    assert jnp.allclose(jnp.sum(jnp.exp(out), axis=1), 1.0, atol=1e-4)
    # matches the f32 pure-JAX reference up to bf16 operand/carry drift
    ref = rnn_text_classifier_ref(texts, params)
    assert jnp.allclose(out, ref, atol=5e-2, rtol=5e-2)
    print("KERNEL_OK")
</pallas_src>

<mosaic_0001>
module attributes {stable_mosaic.version = 11 : i64} {
  func.func @rnn_classifier_kernel(%arg0: memref<128x64xbf16, #tpu.memory_space<vmem>>, %arg1: memref<64x512xbf16, #tpu.memory_space<vmem>>, %arg2: memref<128x512xbf16, #tpu.memory_space<vmem>>, %arg3: memref<1x512xf32, #tpu.memory_space<vmem>>, %arg4: memref<128x4xbf16, #tpu.memory_space<vmem>>, %arg5: memref<1x4xf32, #tpu.memory_space<vmem>>, %arg6: memref<16x4xf32, #tpu.memory_space<vmem>>, %arg7: memref<128x512xbf16, #tpu.memory_space<vmem>>) attributes {dimension_semantics = [], scalar_prefetch = 0 : i64, scratch_operands = 1 : i64, tpu.core_type = #tpu.core_type<tc>} {
    %c0 = arith.constant 0 : index
    %c0_0 = arith.constant 0 : index
    %0 = vector.load %arg0[%c0, %c0_0] : memref<128x64xbf16, #tpu.memory_space<vmem>>, vector<128x64xbf16>
    %c0_1 = arith.constant 0 : index
    %c0_2 = arith.constant 0 : index
    %1 = vector.load %arg1[%c0_1, %c0_2] : memref<64x512xbf16, #tpu.memory_space<vmem>>, vector<64x512xbf16>
    %cst = arith.constant dense<0.000000e+00> : vector<128x512xf32>
    %2 = tpu.matmul %0, %1, %cst {dimension_numbers = #tpu.dot_dimension_numbers<[1], [0], [0], [1], [0, 0, 1, 1], [], []>} : vector<128x64xbf16>, vector<64x512xbf16>, vector<128x512xf32> -> vector<128x512xf32>
    %c0_3 = arith.constant 0 : index
    %c0_4 = arith.constant 0 : index
    %3 = vector.load %arg3[%c0_3, %c0_4] : memref<1x512xf32, #tpu.memory_space<vmem>>, vector<1x512xf32>
    %4 = vector.broadcast %3 : vector<1x512xf32> to vector<128x512xf32>
    %5 = arith.addf %2, %4 : vector<128x512xf32>
    %6 = arith.truncf %5 : vector<128x512xf32> to vector<128x512xbf16>
    %c0_5 = arith.constant 0 : index
    %c0_6 = arith.constant 0 : index
    %7 = vector.load %arg7[%c0_5, %c0_6] : memref<128x512xbf16, #tpu.memory_space<vmem>>, vector<128x512xbf16>
    tpu.vector_store %arg7[%c0_5, %c0_6], %6 {strides = array<i32>} : memref<128x512xbf16, #tpu.memory_space<vmem>>, vector<128x512xbf16>,
    %c0_7 = arith.constant 0 : index
    %c0_8 = arith.constant 0 : index
    %8 = vector.load %arg2[%c0_7, %c0_8] : memref<128x512xbf16, #tpu.memory_space<vmem>>, vector<128x512xbf16>
    %cst_9 = arith.constant 0.000000e+00 : bf16
    %9 = vector.broadcast %cst_9 : bf16 to vector<16x128xbf16>
    %cst_10 = arith.constant 0.000000e+00 : f32
    %10 = vector.broadcast %cst_10 : f32 to vector<16x128xf32>
    %c0_i32 = arith.constant 0 : i32
    %c16_i32 = arith.constant 16 : i32
    %11 = arith.muli %c0_i32, %c16_i32 : i32
    %12 = tpu.assume_multiple %11, 16 : i32
    %13 = arith.index_cast %12 : i32 to index
    %c0_11 = arith.constant 0 : index
    %14 = vector.load %arg7[%13, %c0_11] : memref<128x512xbf16, #tpu.memory_space<vmem>>, vector<16x512xbf16>
    %15 = arith.extf %14 : vector<16x512xbf16> to vector<16x512xf32>
    %cst_12 = arith.constant dense<0.000000e+00> : vector<16x512xf32>
    %16 = tpu.matmul %9, %8, %cst_12 {dimension_numbers = #tpu.dot_dimension_numbers<[1], [0], [0], [1], [0, 0, 1, 1], [], []>} : vector<16x128xbf16>, vector<128x512xbf16>, vector<16x512xf32> -> vector<16x512xf32>
    %17 = arith.addf %15, %16 : vector<16x512xf32>
    %18 = vector.extract_strided_slice %17 {offsets = [0, 0], sizes = [16, 128], strides = [1, 1]} : vector<16x512xf32> to vector<16x128xf32>
    %19 = arith.negf %18 : vector<16x128xf32>
    %20 = math.exp %19 : vector<16x128xf32>
    %cst_13 = arith.constant 1.000000e+00 : f32
    %21 = vector.broadcast %cst_13 : f32 to vector<16x128xf32>
    %22 = arith.addf %21, %20 : vector<16x128xf32>
    %23 = arith.divf %21, %22 : vector<16x128xf32>
    %24 = vector.extract_strided_slice %17 {offsets = [0, 128], sizes = [16, 128], strides = [1, 1]} : vector<16x512xf32> to vector<16x128xf32>
    %25 = arith.negf %24 : vector<16x128xf32>
    %26 = math.exp %25 : vector<16x128xf32>
    %cst_14 = arith.constant 1.000000e+00 : f32
    %27 = vector.broadcast %cst_14 : f32 to vector<16x128xf32>
    %28 = arith.addf %27, %26 : vector<16x128xf32>
    %29 = arith.divf %27, %28 : vector<16x128xf32>
    %30 = vector.extract_strided_slice %17 {offsets = [0, 256], sizes = [16, 128], strides = [1, 1]} : vector<16x512xf32> to vector<16x128xf32>
    %31 = math.tanh %30 : vector<16x128xf32>
    %32 = vector.extract_strided_slice %17 {offsets = [0, 384], sizes = [16, 128], strides = [1, 1]} : vector<16x512xf32> to vector<16x128xf32>
    %33 = arith.negf %32 : vector<16x128xf32>
    %34 = math.exp %33 : vector<16x128xf32>
    %cst_15 = arith.constant 1.000000e+00 : f32
    %35 = vector.broadcast %cst_15 : f32 to vector<16x128xf32>
    %36 = arith.addf %35, %34 : vector<16x128xf32>
    %37 = arith.divf %35, %36 : vector<16x128xf32>
    %38 = arith.mulf %29, %10 : vector<16x128xf32>
    %39 = arith.mulf %23, %31 : vector<16x128xf32>
    %40 = arith.addf %38, %39 : vector<16x128xf32>
    %41 = math.tanh %40 : vector<16x128xf32>
    %42 = arith.mulf %37, %41 : vector<16x128xf32>
    %43 = arith.truncf %42 : vector<16x128xf32> to vector<16x128xbf16>
    %c1_i32 = arith.constant 1 : i32
    %c16_i32_16 = arith.constant 16 : i32
    %44 = arith.muli %c1_i32, %c16_i32_16 : i32
    %45 = tpu.assume_multiple %44, 16 : i32
    %46 = arith.index_cast %45 : i32 to index
    %c0_17 = arith.constant 0 : index
    %47 = vector.load %arg7[%46, %c0_17] : memref<128x512xbf16, #tpu.memory_space<vmem>>, vector<16x512xbf16>
    %48 = arith.extf %47 : vector<16x512xbf16> to vector<16x512xf32>
    %cst_18 = arith.constant dense<0.000000e+00> : vector<16x512xf32>
    %49 = tpu.matmul %43, %8, %cst_18 {dimension_numbers = #tpu.dot_dimension_numbers<[1], [0], [0], [1], [0, 0, 1, 1], [], []>} : vector<16x128xbf16>, vector<128x512xbf16>, vector<16x512xf32> -> vector<16x512xf32>
    %50 = arith.addf %48, %49 : vector<16x512xf32>
    %51 = vector.extract_strided_slice %50 {offsets = [0, 0], sizes = [16, 128], strides = [1, 1]} : vector<16x512xf32> to vector<16x128xf32>
    %52 = arith.negf %51 : vector<16x128xf32>
    %53 = math.exp %52 : vector<16x128xf32>
    %cst_19 = arith.constant 1.000000e+00 : f32
    %54 = vector.broadcast %cst_19 : f32 to vector<16x128xf32>
    %55 = arith.addf %54, %53 : vector<16x128xf32>
    %56 = arith.divf %54, %55 : vector<16x128xf32>
    %57 = vector.extract_strided_slice %50 {offsets = [0, 128], sizes = [16, 128], strides = [1, 1]} : vector<16x512xf32> to vector<16x128xf32>
    %58 = arith.negf %57 : vector<16x128xf32>
    %59 = math.exp %58 : vector<16x128xf32>
    %cst_20 = arith.constant 1.000000e+00 : f32
    %60 = vector.broadcast %cst_20 : f32 to vector<16x128xf32>
    %61 = arith.addf %60, %59 : vector<16x128xf32>
    %62 = arith.divf %60, %61 : vector<16x128xf32>
    %63 = vector.extract_strided_slice %50 {offsets = [0, 256], sizes = [16, 128], strides = [1, 1]} : vector<16x512xf32> to vector<16x128xf32>
    %64 = math.tanh %63 : vector<16x128xf32>
    %65 = vector.extract_strided_slice %50 {offsets = [0, 384], sizes = [16, 128], strides = [1, 1]} : vector<16x512xf32> to vector<16x128xf32>
    %66 = arith.negf %65 : vector<16x128xf32>
    %67 = math.exp %66 : vector<16x128xf32>
    %cst_21 = arith.constant 1.000000e+00 : f32
    %68 = vector.broadcast %cst_21 : f32 to vector<16x128xf32>
    %69 = arith.addf %68, %67 : vector<16x128xf32>
    %70 = arith.divf %68, %69 : vector<16x128xf32>
    %71 = arith.mulf %62, %40 : vector<16x128xf32>
    %72 = arith.mulf %56, %64 : vector<16x128xf32>
    %73 = arith.addf %71, %72 : vector<16x128xf32>
    %74 = math.tanh %73 : vector<16x128xf32>
    %75 = arith.mulf %70, %74 : vector<16x128xf32>
    %76 = arith.truncf %75 : vector<16x128xf32> to vector<16x128xbf16>
    %c2_i32 = arith.constant 2 : i32
    %c16_i32_22 = arith.constant 16 : i32
    %77 = arith.muli %c2_i32, %c16_i32_22 : i32
    %78 = tpu.assume_multiple %77, 16 : i32
    %79 = arith.index_cast %78 : i32 to index
    %c0_23 = arith.constant 0 : index
    %80 = vector.load %arg7[%79, %c0_23] : memref<128x512xbf16, #tpu.memory_space<vmem>>, vector<16x512xbf16>
    %81 = arith.extf %80 : vector<16x512xbf16> to vector<16x512xf32>
    %cst_24 = arith.constant dense<0.000000e+00> : vector<16x512xf32>
    %82 = tpu.matmul %76, %8, %cst_24 {dimension_numbers = #tpu.dot_dimension_numbers<[1], [0], [0], [1], [0, 0, 1, 1], [], []>} : vector<16x128xbf16>, vector<128x512xbf16>, vector<16x512xf32> -> vector<16x512xf32>
    %83 = arith.addf %81, %82 : vector<16x512xf32>
    %84 = vector.extract_strided_slice %83 {offsets = [0, 0], sizes = [16, 128], strides = [1, 1]} : vector<16x512xf32> to vector<16x128xf32>
    %85 = arith.negf %84 : vector<16x128xf32>
    %86 = math.exp %85 : vector<16x128xf32>
    %cst_25 = arith.constant 1.000000e+00 : f32
    %87 = vector.broadcast %cst_25 : f32 to vector<16x128xf32>
    %88 = arith.addf %87, %86 : vector<16x128xf32>
    %89 = arith.divf %87, %88 : vector<16x128xf32>
    %90 = vector.extract_strided_slice %83 {offsets = [0, 128], sizes = [16, 128], strides = [1, 1]} : vector<16x512xf32> to vector<16x128xf32>
    %91 = arith.negf %90 : vector<16x128xf32>
    %92 = math.exp %91 : vector<16x128xf32>
    %cst_26 = arith.constant 1.000000e+00 : f32
    %93 = vector.broadcast %cst_26 : f32 to vector<16x128xf32>
    %94 = arith.addf %93, %92 : vector<16x128xf32>
    %95 = arith.divf %93, %94 : vector<16x128xf32>
    %96 = vector.extract_strided_slice %83 {offsets = [0, 256], sizes = [16, 128], strides = [1, 1]} : vector<16x512xf32> to vector<16x128xf32>
    %97 = math.tanh %96 : vector<16x128xf32>
    %98 = vector.extract_strided_slice %83 {offsets = [0, 384], sizes = [16, 128], strides = [1, 1]} : vector<16x512xf32> to vector<16x128xf32>
    %99 = arith.negf %98 : vector<16x128xf32>
    %100 = math.exp %99 : vector<16x128xf32>
    %cst_27 = arith.constant 1.000000e+00 : f32
    %101 = vector.broadcast %cst_27 : f32 to vector<16x128xf32>
    %102 = arith.addf %101, %100 : vector<16x128xf32>
    %103 = arith.divf %101, %102 : vector<16x128xf32>
    %104 = arith.mulf %95, %73 : vector<16x128xf32>
    %105 = arith.mulf %89, %97 : vector<16x128xf32>
    %106 = arith.addf %104, %105 : vector<16x128xf32>
    %107 = math.tanh %106 : vector<16x128xf32>
    %108 = arith.mulf %103, %107 : vector<16x128xf32>
    %109 = arith.truncf %108 : vector<16x128xf32> to vector<16x128xbf16>
    %c3_i32 = arith.constant 3 : i32
    %c16_i32_28 = arith.constant 16 : i32
    %110 = arith.muli %c3_i32, %c16_i32_28 : i32
    %111 = tpu.assume_multiple %110, 16 : i32
    %112 = arith.index_cast %111 : i32 to index
    %c0_29 = arith.constant 0 : index
    %113 = vector.load %arg7[%112, %c0_29] : memref<128x512xbf16, #tpu.memory_space<vmem>>, vector<16x512xbf16>
    %114 = arith.extf %113 : vector<16x512xbf16> to vector<16x512xf32>
    %cst_30 = arith.constant dense<0.000000e+00> : vector<16x512xf32>
    %115 = tpu.matmul %109, %8, %cst_30 {dimension_numbers = #tpu.dot_dimension_numbers<[1], [0], [0], [1], [0, 0, 1, 1], [], []>} : vector<16x128xbf16>, vector<128x512xbf16>, vector<16x512xf32> -> vector<16x512xf32>
    %116 = arith.addf %114, %115 : vector<16x512xf32>
    %117 = vector.extract_strided_slice %116 {offsets = [0, 0], sizes = [16, 128], strides = [1, 1]} : vector<16x512xf32> to vector<16x128xf32>
    %118 = arith.negf %117 : vector<16x128xf32>
    %119 = math.exp %118 : vector<16x128xf32>
    %cst_31 = arith.constant 1.000000e+00 : f32
    %120 = vector.broadcast %cst_31 : f32 to vector<16x128xf32>
    %121 = arith.addf %120, %119 : vector<16x128xf32>
    %122 = arith.divf %120, %121 : vector<16x128xf32>
    %123 = vector.extract_strided_slice %116 {offsets = [0, 128], sizes = [16, 128], strides = [1, 1]} : vector<16x512xf32> to vector<16x128xf32>
    %124 = arith.negf %123 : vector<16x128xf32>
    %125 = math.exp %124 : vector<16x128xf32>
    %cst_32 = arith.constant 1.000000e+00 : f32
    %126 = vector.broadcast %cst_32 : f32 to vector<16x128xf32>
    %127 = arith.addf %126, %125 : vector<16x128xf32>
    %128 = arith.divf %126, %127 : vector<16x128xf32>
    %129 = vector.extract_strided_slice %116 {offsets = [0, 256], sizes = [16, 128], strides = [1, 1]} : vector<16x512xf32> to vector<16x128xf32>
    %130 = math.tanh %129 : vector<16x128xf32>
    %131 = vector.extract_strided_slice %116 {offsets = [0, 384], sizes = [16, 128], strides = [1, 1]} : vector<16x512xf32> to vector<16x128xf32>
    %132 = arith.negf %131 : vector<16x128xf32>
    %133 = math.exp %132 : vector<16x128xf32>
    %cst_33 = arith.constant 1.000000e+00 : f32
    %134 = vector.broadcast %cst_33 : f32 to vector<16x128xf32>
    %135 = arith.addf %134, %133 : vector<16x128xf32>
    %136 = arith.divf %134, %135 : vector<16x128xf32>
    %137 = arith.mulf %128, %106 : vector<16x128xf32>
    %138 = arith.mulf %122, %130 : vector<16x128xf32>
    %139 = arith.addf %137, %138 : vector<16x128xf32>
    %140 = math.tanh %139 : vector<16x128xf32>
    %141 = arith.mulf %136, %140 : vector<16x128xf32>
    %142 = arith.truncf %141 : vector<16x128xf32> to vector<16x128xbf16>
    %c4_i32 = arith.constant 4 : i32
    %c16_i32_34 = arith.constant 16 : i32
    %143 = arith.muli %c4_i32, %c16_i32_34 : i32
    %144 = tpu.assume_multiple %143, 16 : i32
    %145 = arith.index_cast %144 : i32 to index
    %c0_35 = arith.constant 0 : index
    %146 = vector.load %arg7[%145, %c0_35] : memref<128x512xbf16, #tpu.memory_space<vmem>>, vector<16x512xbf16>
    %147 = arith.extf %146 : vector<16x512xbf16> to vector<16x512xf32>
    %cst_36 = arith.constant dense<0.000000e+00> : vector<16x512xf32>
    %148 = tpu.matmul %142, %8, %cst_36 {dimension_numbers = #tpu.dot_dimension_numbers<[1], [0], [0], [1], [0, 0, 1, 1], [], []>} : vector<16x128xbf16>, vector<128x512xbf16>, vector<16x512xf32> -> vector<16x512xf32>
    %149 = arith.addf %147, %148 : vector<16x512xf32>
    %150 = vector.extract_strided_slice %149 {offsets = [0, 0], sizes = [16, 128], strides = [1, 1]} : vector<16x512xf32> to vector<16x128xf32>
    %151 = arith.negf %150 : vector<16x128xf32>
    %152 = math.exp %151 : vector<16x128xf32>
    %cst_37 = arith.constant 1.000000e+00 : f32
    %153 = vector.broadcast %cst_37 : f32 to vector<16x128xf32>
    %154 = arith.addf %153, %152 : vector<16x128xf32>
    %155 = arith.divf %153, %154 : vector<16x128xf32>
    %156 = vector.extract_strided_slice %149 {offsets = [0, 128], sizes = [16, 128], strides = [1, 1]} : vector<16x512xf32> to vector<16x128xf32>
    %157 = arith.negf %156 : vector<16x128xf32>
    %158 = math.exp %157 : vector<16x128xf32>
    %cst_38 = arith.constant 1.000000e+00 : f32
    %159 = vector.broadcast %cst_38 : f32 to vector<16x128xf32>
    %160 = arith.addf %159, %158 : vector<16x128xf32>
    %161 = arith.divf %159, %160 : vector<16x128xf32>
    %162 = vector.extract_strided_slice %149 {offsets = [0, 256], sizes = [16, 128], strides = [1, 1]} : vector<16x512xf32> to vector<16x128xf32>
    %163 = math.tanh %162 : vector<16x128xf32>
    %164 = vector.extract_strided_slice %149 {offsets = [0, 384], sizes = [16, 128], strides = [1, 1]} : vector<16x512xf32> to vector<16x128xf32>
    %165 = arith.negf %164 : vector<16x128xf32>
    %166 = math.exp %165 : vector<16x128xf32>
    %cst_39 = arith.constant 1.000000e+00 : f32
    %167 = vector.broadcast %cst_39 : f32 to vector<16x128xf32>
    %168 = arith.addf %167, %166 : vector<16x128xf32>
    %169 = arith.divf %167, %168 : vector<16x128xf32>
    %170 = arith.mulf %161, %139 : vector<16x128xf32>
    %171 = arith.mulf %155, %163 : vector<16x128xf32>
    %172 = arith.addf %170, %171 : vector<16x128xf32>
    %173 = math.tanh %172 : vector<16x128xf32>
    %174 = arith.mulf %169, %173 : vector<16x128xf32>
    %175 = arith.truncf %174 : vector<16x128xf32> to vector<16x128xbf16>
    %c5_i32 = arith.constant 5 : i32
    %c16_i32_40 = arith.constant 16 : i32
    %176 = arith.muli %c5_i32, %c16_i32_40 : i32
    %177 = tpu.assume_multiple %176, 16 : i32
    %178 = arith.index_cast %177 : i32 to index
    %c0_41 = arith.constant 0 : index
    %179 = vector.load %arg7[%178, %c0_41] : memref<128x512xbf16, #tpu.memory_space<vmem>>, vector<16x512xbf16>
    %180 = arith.extf %179 : vector<16x512xbf16> to vector<16x512xf32>
    %cst_42 = arith.constant dense<0.000000e+00> : vector<16x512xf32>
    %181 = tpu.matmul %175, %8, %cst_42 {dimension_numbers = #tpu.dot_dimension_numbers<[1], [0], [0], [1], [0, 0, 1, 1], [], []>} : vector<16x128xbf16>, vector<128x512xbf16>, vector<16x512xf32> -> vector<16x512xf32>
    %182 = arith.addf %180, %181 : vector<16x512xf32>
    %183 = vector.extract_strided_slice %182 {offsets = [0, 0], sizes = [16, 128], strides = [1, 1]} : vector<16x512xf32> to vector<16x128xf32>
    %184 = arith.negf %183 : vector<16x128xf32>
    %185 = math.exp %184 : vector<16x128xf32>
    %cst_43 = arith.constant 1.000000e+00 : f32
    %186 = vector.broadcast %cst_43 : f32 to vector<16x128xf32>
    %187 = arith.addf %186, %185 : vector<16x128xf32>
    %188 = arith.divf %186, %187 : vector<16x128xf32>
    %189 = vector.extract_strided_slice %182 {offsets = [0, 128], sizes = [16, 128], strides = [1, 1]} : vector<16x512xf32> to vector<16x128xf32>
    %190 = arith.negf %189 : vector<16x128xf32>
    %191 = math.exp %190 : vector<16x128xf32>
    %cst_44 = arith.constant 1.000000e+00 : f32
    %192 = vector.broadcast %cst_44 : f32 to vector<16x128xf32>
    %193 = arith.addf %192, %191 : vector<16x128xf32>
    %194 = arith.divf %192, %193 : vector<16x128xf32>
    %195 = vector.extract_strided_slice %182 {offsets = [0, 256], sizes = [16, 128], strides = [1, 1]} : vector<16x512xf32> to vector<16x128xf32>
    %196 = math.tanh %195 : vector<16x128xf32>
    %197 = vector.extract_strided_slice %182 {offsets = [0, 384], sizes = [16, 128], strides = [1, 1]} : vector<16x512xf32> to vector<16x128xf32>
    %198 = arith.negf %197 : vector<16x128xf32>
    %199 = math.exp %198 : vector<16x128xf32>
    %cst_45 = arith.constant 1.000000e+00 : f32
    %200 = vector.broadcast %cst_45 : f32 to vector<16x128xf32>
    %201 = arith.addf %200, %199 : vector<16x128xf32>
    %202 = arith.divf %200, %201 : vector<16x128xf32>
    %203 = arith.mulf %194, %172 : vector<16x128xf32>
    %204 = arith.mulf %188, %196 : vector<16x128xf32>
    %205 = arith.addf %203, %204 : vector<16x128xf32>
    %206 = math.tanh %205 : vector<16x128xf32>
    %207 = arith.mulf %202, %206 : vector<16x128xf32>
    %208 = arith.truncf %207 : vector<16x128xf32> to vector<16x128xbf16>
    %c6_i32 = arith.constant 6 : i32
    %c16_i32_46 = arith.constant 16 : i32
    %209 = arith.muli %c6_i32, %c16_i32_46 : i32
    %210 = tpu.assume_multiple %209, 16 : i32
    %211 = arith.index_cast %210 : i32 to index
    %c0_47 = arith.constant 0 : index
    %212 = vector.load %arg7[%211, %c0_47] : memref<128x512xbf16, #tpu.memory_space<vmem>>, vector<16x512xbf16>
    %213 = arith.extf %212 : vector<16x512xbf16> to vector<16x512xf32>
    %cst_48 = arith.constant dense<0.000000e+00> : vector<16x512xf32>
    %214 = tpu.matmul %208, %8, %cst_48 {dimension_numbers = #tpu.dot_dimension_numbers<[1], [0], [0], [1], [0, 0, 1, 1], [], []>} : vector<16x128xbf16>, vector<128x512xbf16>, vector<16x512xf32> -> vector<16x512xf32>
    %215 = arith.addf %213, %214 : vector<16x512xf32>
    %216 = vector.extract_strided_slice %215 {offsets = [0, 0], sizes = [16, 128], strides = [1, 1]} : vector<16x512xf32> to vector<16x128xf32>
    %217 = arith.negf %216 : vector<16x128xf32>
    %218 = math.exp %217 : vector<16x128xf32>
    %cst_49 = arith.constant 1.000000e+00 : f32
    %219 = vector.broadcast %cst_49 : f32 to vector<16x128xf32>
    %220 = arith.addf %219, %218 : vector<16x128xf32>
    %221 = arith.divf %219, %220 : vector<16x128xf32>
    %222 = vector.extract_strided_slice %215 {offsets = [0, 128], sizes = [16, 128], strides = [1, 1]} : vector<16x512xf32> to vector<16x128xf32>
    %223 = arith.negf %222 : vector<16x128xf32>
    %224 = math.exp %223 : vector<16x128xf32>
    %cst_50 = arith.constant 1.000000e+00 : f32
    %225 = vector.broadcast %cst_50 : f32 to vector<16x128xf32>
    %226 = arith.addf %225, %224 : vector<16x128xf32>
    %227 = arith.divf %225, %226 : vector<16x128xf32>
    %228 = vector.extract_strided_slice %215 {offsets = [0, 256], sizes = [16, 128], strides = [1, 1]} : vector<16x512xf32> to vector<16x128xf32>
    %229 = math.tanh %228 : vector<16x128xf32>
    %230 = vector.extract_strided_slice %215 {offsets = [0, 384], sizes = [16, 128], strides = [1, 1]} : vector<16x512xf32> to vector<16x128xf32>
    %231 = arith.negf %230 : vector<16x128xf32>
    %232 = math.exp %231 : vector<16x128xf32>
    %cst_51 = arith.constant 1.000000e+00 : f32
    %233 = vector.broadcast %cst_51 : f32 to vector<16x128xf32>
    %234 = arith.addf %233, %232 : vector<16x128xf32>
    %235 = arith.divf %233, %234 : vector<16x128xf32>
    %236 = arith.mulf %227, %205 : vector<16x128xf32>
    %237 = arith.mulf %221, %229 : vector<16x128xf32>
    %238 = arith.addf %236, %237 : vector<16x128xf32>
    %239 = math.tanh %238 : vector<16x128xf32>
    %240 = arith.mulf %235, %239 : vector<16x128xf32>
    %241 = arith.truncf %240 : vector<16x128xf32> to vector<16x128xbf16>
    %c7_i32 = arith.constant 7 : i32
    %c16_i32_52 = arith.constant 16 : i32
    %242 = arith.muli %c7_i32, %c16_i32_52 : i32
    %243 = tpu.assume_multiple %242, 16 : i32
    %244 = arith.index_cast %243 : i32 to index
    %c0_53 = arith.constant 0 : index
    %245 = vector.load %arg7[%244, %c0_53] : memref<128x512xbf16, #tpu.memory_space<vmem>>, vector<16x512xbf16>
    %246 = arith.extf %245 : vector<16x512xbf16> to vector<16x512xf32>
    %cst_54 = arith.constant dense<0.000000e+00> : vector<16x512xf32>
    %247 = tpu.matmul %241, %8, %cst_54 {dimension_numbers = #tpu.dot_dimension_numbers<[1], [0], [0], [1], [0, 0, 1, 1], [], []>} : vector<16x128xbf16>, vector<128x512xbf16>, vector<16x512xf32> -> vector<16x512xf32>
    %248 = arith.addf %246, %247 : vector<16x512xf32>
    %249 = vector.extract_strided_slice %248 {offsets = [0, 0], sizes = [16, 128], strides = [1, 1]} : vector<16x512xf32> to vector<16x128xf32>
    %250 = arith.negf %249 : vector<16x128xf32>
    %251 = math.exp %250 : vector<16x128xf32>
    %cst_55 = arith.constant 1.000000e+00 : f32
    %252 = vector.broadcast %cst_55 : f32 to vector<16x128xf32>
    %253 = arith.addf %252, %251 : vector<16x128xf32>
    %254 = arith.divf %252, %253 : vector<16x128xf32>
    %255 = vector.extract_strided_slice %248 {offsets = [0, 128], sizes = [16, 128], strides = [1, 1]} : vector<16x512xf32> to vector<16x128xf32>
    %256 = arith.negf %255 : vector<16x128xf32>
    %257 = math.exp %256 : vector<16x128xf32>
    %cst_56 = arith.constant 1.000000e+00 : f32
    %258 = vector.broadcast %cst_56 : f32 to vector<16x128xf32>
    %259 = arith.addf %258, %257 : vector<16x128xf32>
    %260 = arith.divf %258, %259 : vector<16x128xf32>
    %261 = vector.extract_strided_slice %248 {offsets = [0, 256], sizes = [16, 128], strides = [1, 1]} : vector<16x512xf32> to vector<16x128xf32>
    %262 = math.tanh %261 : vector<16x128xf32>
    %263 = vector.extract_strided_slice %248 {offsets = [0, 384], sizes = [16, 128], strides = [1, 1]} : vector<16x512xf32> to vector<16x128xf32>
    %264 = arith.negf %263 : vector<16x128xf32>
    %265 = math.exp %264 : vector<16x128xf32>
    %cst_57 = arith.constant 1.000000e+00 : f32
    %266 = vector.broadcast %cst_57 : f32 to vector<16x128xf32>
    %267 = arith.addf %266, %265 : vector<16x128xf32>
    %268 = arith.divf %266, %267 : vector<16x128xf32>
    %269 = arith.mulf %260, %238 : vector<16x128xf32>
    %270 = arith.mulf %254, %262 : vector<16x128xf32>
    %271 = arith.addf %269, %270 : vector<16x128xf32>
    %272 = math.tanh %271 : vector<16x128xf32>
    %273 = arith.mulf %268, %272 : vector<16x128xf32>
    %274 = arith.truncf %273 : vector<16x128xf32> to vector<16x128xbf16>
    %c8_i32 = arith.constant 8 : i32
    %c0_58 = arith.constant 0 : index
    %c0_59 = arith.constant 0 : index
    %275 = vector.load %arg4[%c0_58, %c0_59] : memref<128x4xbf16, #tpu.memory_space<vmem>>, vector<128x4xbf16>
    %cst_60 = arith.constant dense<0.000000e+00> : vector<16x4xf32>
    %276 = tpu.matmul %274, %275, %cst_60 {dimension_numbers = #tpu.dot_dimension_numbers<[1], [0], [0], [1], [0, 0, 1, 1], [], []>} : vector<16x128xbf16>, vector<128x4xbf16>, vector<16x4xf32> -> vector<16x4xf32>
    %c0_61 = arith.constant 0 : index
    %c0_62 = arith.constant 0 : index
    %277 = vector.load %arg5[%c0_61, %c0_62] : memref<1x4xf32, #tpu.memory_space<vmem>>, vector<1x4xf32>
    %278 = vector.broadcast %277 : vector<1x4xf32> to vector<16x4xf32>
    %279 = arith.addf %276, %278 : vector<16x4xf32>
    %cst_63 = arith.constant dense<0xFF800000> : vector<16xf32>
    %280 = vector.multi_reduction <maximumf>, %279, %cst_63 [1] : vector<16x4xf32> to vector<16xf32>
    %281 = vector.shape_cast %280 : vector<16xf32> to vector<16x1xf32>
    %282 = vector.broadcast %281 : vector<16x1xf32> to vector<16x4xf32>
    %283 = arith.subf %279, %282 : vector<16x4xf32>
    %284 = math.exp %283 : vector<16x4xf32>
    %cst_64 = arith.constant dense<0.000000e+00> : vector<16xf32>
    %285 = vector.multi_reduction <add>, %284, %cst_64 [1] : vector<16x4xf32> to vector<16xf32>
    %286 = vector.shape_cast %285 : vector<16xf32> to vector<16x1xf32>
    %287 = math.log %286 : vector<16x1xf32>
    %288 = vector.broadcast %287 : vector<16x1xf32> to vector<16x4xf32>
    %289 = arith.subf %283, %288 : vector<16x4xf32>
    %c0_65 = arith.constant 0 : index
    %c0_66 = arith.constant 0 : index
    %290 = vector.load %arg6[%c0_65, %c0_66] : memref<16x4xf32, #tpu.memory_space<vmem>>, vector<16x4xf32>
    tpu.vector_store %arg6[%c0_65, %c0_66], %289 {strides = array<i32>} : memref<16x4xf32, #tpu.memory_space<vmem>>, vector<16x4xf32>,
    return
  }
}

</mosaic_0001>

<bundles_post_ra>
// kernel: tpu_custom_call.1
= control target key start
LH: loop header
LB: loop body
LE: loop exit
PB: predicated region body
PF: predicated region fallthrough
CT: control target
= control target key end

     0   :  { %11 = vsyncpa [#allocation4], 0  ;;  %s3147_s24 = smov [#allocation3]   ;;  %s3148_s26 = smov 256   ;;  %s4252_s0 = inlined_call_operand.vmem [shape: bf16[128,64], index: 0, kind: input, shape index: {}]   ;;  %s4253_s1 = inlined_call_operand.vmem [shape: bf16[64,512], index: 1, kind: input, shape index: {}]   ;;  %s4254_s2 = inlined_call_operand.hbm [shape: bf16[128,512], index: 2, kind: input, shape index: {}]   ;;  %s4255_s3 = inlined_call_operand.vmem [shape: f32[1,512], index: 3, kind: input, shape index: {}]   ;;  %s4256_s4 = inlined_call_operand.vmem [shape: bf16[128,4], index: 4, kind: input, shape index: {}]   ;;  %s4257_s5 = inlined_call_operand.vmem [shape: f32[1,4], index: 5, kind: input, shape index: {}]   ;;  %s4258_s6 = inlined_call_operand.vmem [shape: f32[16,4], index: 6, kind: output, shape index: {}]  }
   0x1   :  { %s20_s23 = sshll.u32 %s4254_s2, 4  ;;  %s22_s25 = sshll.u32 %s3147_s24, 4  ;;  %s21_s23 = int_to_ptr.hbm [resolvable:$true] %s20_s23  ;;  %s23_s25 = int_to_ptr.vmem [resolvable:$true] %s22_s25 }
   0x2   :  { %s3149_s27 = smov 16  }
   0x3   :  { %28 = dma.hbm_to_vmem [thread:$0]  %s21_s23, 4096, %s23_s25, [#allocation4], %s3148_s26, %s3148_s26, %s3149_s27  }
   0x4   :  { %3145 = dma.done.wait [#allocation4], 4096  }
   0x5   :  { %3146 = vsyncadd [#allocation4], 4294963200  ;;  %v2530_v0 = vld [vmem:[%s4253_s1 + $0x60] sm:$0xf]  ;;  %v2806_v1 = vld [vmem:[%s4253_s1 + $0x6c] sm:$0xf0] }
   0x6   :  { %v2538_v2 = vld [vmem:[%s4253_s1 + $0x68] sm:$0xf]  ;;  %v2531_v3 = vor.u32 %v2806_v1, %v2530_v0  ;;  %v2807_v4 = vld [vmem:[%s4253_s1 + $0x74] sm:$0xf0]  ;;  %v2805_v5 = vld [vmem:[%s4253_s1 + $0x6c] sm:$0xf] }
   0x7   :  { %v2540_v6 = vld [vmem:[%s4253_s1 + $0x78] sm:$0xf0]  ;;  %v2539_v7 = vor.u32 %v2807_v4, %v2538_v2  ;;  %v2514_v9 = vld [vmem:[%s4253_s1 + $0x40] sm:$0xf]  ;;  %v2802_v10 = vld [vmem:[%s4253_s1 + $0x4c] sm:$0xf0] }
   0x8   :  { %v2543_v8 = vor.u32 %v2805_v5, %v2540_v6  ;;  %v2522_v11 = vld [vmem:[%s4253_s1 + $0x48] sm:$0xf]  ;;  %231 = vmatpush.bf16.msra.mxu0 %v2531_v3  ;;  %2848 = vmatpush.bf16.msra.mxu1 %v2531_v3  ;;  %v2515_v12 = vor.u32 %v2802_v10, %v2514_v9  ;;  %v2803_v13 = vld [vmem:[%s4253_s1 + $0x54] sm:$0xf0]  ;;  %v2801_v14 = vld [vmem:[%s4253_s1 + $0x4c] sm:$0xf] }
   0x9   :  { %v2524_v15 = vld [vmem:[%s4253_s1 + $0x58] sm:$0xf0]  ;;  %329 = vmatpush.bf16.msra.mxu2 %v2539_v7  ;;  %v2523_v16 = vor.u32 %v2803_v13, %v2522_v11  ;;  %v2498_v18 = vld [vmem:[%s4253_s1 + $0x20] sm:$0xf]  ;;  %v2798_v19 = vld [vmem:[%s4253_s1 + $0x2c] sm:$0xf0] }
   0xa   :  { %378 = vmatpush.bf16.msra.mxu3 %v2543_v8  ;;  %v2527_v17 = vor.u32 %v2801_v14, %v2524_v15  ;;  %v2506_v20 = vld [vmem:[%s4253_s1 + $0x28] sm:$0xf]  ;;  %v2799_v21 = vld [vmem:[%s4253_s1 + $0x34] sm:$0xf0]  ;;  %v2797_v22 = vld [vmem:[%s4253_s1 + $0x2c] sm:$0xf]  ;;  %v2499_v24 = vor.u32 %v2798_v19, %v2498_v18 }
   0xb   :  { %v2508_v23 = vld [vmem:[%s4253_s1 + $0x38] sm:$0xf0]  ;;  %v2507_v25 = vor.u32 %v2799_v21, %v2506_v20  ;;  %v2482_v27 = vld [vmem:[%s4253_s1] sm:$0xf]  ;;  %v2794_v28 = vld [vmem:[%s4253_s1 + $0xc] sm:$0xf0] }
   0xc   :  { %232 = vmatpush.bf16.msra.mxu0 %v2515_v12  ;;  %2849 = vmatpush.bf16.msra.mxu1 %v2515_v12  ;;  %v2511_v26 = vor.u32 %v2797_v22, %v2508_v23  ;;  %v2490_v29 = vld [vmem:[%s4253_s1 + $0x8] sm:$0xf]  ;;  %v2795_v30 = vld [vmem:[%s4253_s1 + $0x14] sm:$0xf0]  ;;  %v2793_v31 = vld [vmem:[%s4253_s1 + $0xc] sm:$0xf]  ;;  %v2483_v35 = vor.u32 %v2794_v28, %v2482_v27 }
   0xd   :  { %330 = vmatpush.bf16.msra.mxu2 %v2523_v16  ;;  %v2492_v32 = vld [vmem:[%s4253_s1 + $0x18] sm:$0xf0]  ;;  %v2804_v33 = vld [vmem:[%s4253_s1 + $0x64] sm:$0xf]  ;;  %v2532_v34 = vld [vmem:[%s4253_s1 + $0x70] sm:$0xf0]  ;;  %v2491_v36 = vor.u32 %v2795_v30, %v2490_v29 }
   0xe   :  { %379 = vmatpush.bf16.msra.mxu3 %v2527_v17  ;;  %v2495_v37 = vor.u32 %v2793_v31, %v2492_v32  ;;  %v2784_v38 = vld [vmem:[%s4252_s0] sm:$0xff]  ;;  %v2837_v39 = vld [vmem:[#allocation3 + $0xec] sm:$0xf]  ;;  %v2700_v40 = vld [vmem:[#allocation3 + $0xf8] sm:$0xf0]  ;;  %v2535_v42 = vor.u32 %v2804_v33, %v2532_v34  ;;  %vm202_vm0 = vcmask 523264  }
   0xf   :  { %v3273_v41 = vld [vmem:[%s4252_s0 + $0x38] sm:$0xff]  ;;  %v3275_v43 = vor.u32 %v2837_v39, %v2700_v40  ;;  %v2698_v44 = vld [vmem:[#allocation3 + $0xe8] sm:$0xf]  ;;  %v2800_v46 = vld [vmem:[%s4253_s1 + $0x44] sm:$0xf] }
  0x10   :  { %233 = vmatpush.bf16.msra.mxu0 %v2499_v24  ;;  %2850 = vmatpush.bf16.msra.mxu1 %v2499_v24  ;;  %v2839_v45 = vld [vmem:[#allocation3 + $0xf4] sm:$0xf0]  ;;  %v2516_v47 = vld [vmem:[%s4253_s1 + $0x50] sm:$0xf0]  ;;  %v2796_v50 = vld [vmem:[%s4253_s1 + $0x24] sm:$0xf] }
  0x11   :  { %331 = vmatpush.bf16.msra.mxu2 %v2507_v25  ;;  %v3283_v48 = vor.u32 %v2839_v45, %v2698_v44  ;;  %v2519_v49 = vor.u32 %v2800_v46, %v2516_v47  ;;  %v2500_v51 = vld [vmem:[%s4253_s1 + $0x30] sm:$0xf0]  ;;  %v2690_v52 = vld [vmem:[#allocation3 + $0xe0] sm:$0xf]  ;;  %v2838_v53 = vld [vmem:[#allocation3 + $0xec] sm:$0xf0] }
  0x12   :  { %380 = vmatpush.bf16.msra.mxu3 %v2511_v26  ;;  %v3298_v54 = vor.u32 %v2838_v53, %v2690_v52  ;;  %v2833_v55 = vld [vmem:[#allocation3 + $0xcc] sm:$0xf]  ;;  %v2684_v56 = vld [vmem:[#allocation3 + $0xd8] sm:$0xf0]  ;;  %v2503_v57 = vor.u32 %v2796_v50, %v2500_v51  ;;  %v2674_v59 = vld [vmem:[#allocation3 + $0xc0] sm:$0xf] }
  0x13   :  { %v3300_v58 = vor.u32 %v2833_v55, %v2684_v56  ;;  %v2834_v60 = vld [vmem:[#allocation3 + $0xcc] sm:$0xf0]  ;;  %v2682_v61 = vld [vmem:[#allocation3 + $0xc8] sm:$0xf]  ;;  %v2792_v62 = vld [vmem:[%s4253_s1 + $0x4] sm:$0xf] }
  0x14   :  { %234 = vmatpush.bf16.msra.mxu0 %v2483_v35  ;;  %2851 = vmatpush.bf16.msra.mxu1 %v2483_v35  ;;  %v2484_v63 = vld [vmem:[%s4253_s1 + $0x10] sm:$0xf0]  ;;  %v3309_v0 = vor.u32 %v2834_v60, %v2674_v59  ;;  %v2835_v1 = vld [vmem:[#allocation3 + $0xd4] sm:$0xf0]  ;;  %v2836_v2 = vld [vmem:[#allocation3 + $0xe4] sm:$0xf] }
  0x15   :  { %332 = vmatpush.bf16.msra.mxu2 %v2491_v36  ;;  %v2692_v3 = vld [vmem:[#allocation3 + $0xf0] sm:$0xf0]  ;;  %v3312_v4 = vor.u32 %v2835_v1, %v2682_v61  ;;  %v2487_v5 = vor.u32 %v2792_v62, %v2484_v63  ;;  %v2832_v7 = vld [vmem:[#allocation3 + $0xc4] sm:$0xf]  ;;  %v2785_v9 = vld [vmem:[%s4252_s0 + $0x8] sm:$0xff] }
  0x16   :  { %381 = vmatpush.bf16.msra.mxu3 %v2495_v37  ;;  %v3315_v6 = vor.u32 %v2836_v2, %v2692_v3  ;;  %v2676_v8 = vld [vmem:[#allocation3 + $0xd0] sm:$0xf0]  ;;  %v2828_v11 = vld [vmem:[#allocation3 + $0xa4] sm:$0xf]  ;;  %v2829_v13 = vld [vmem:[#allocation3 + $0xac] sm:$0xf] }
  0x17   :  { %2544 = vmatmul.msk.bf16.vlgmr.msra.gmra.mxu0 %vm202_vm0, %v2784_v38  ;;  %2551 = vmatmul.msk.bf16.vlgmr.msra.gmra.mxu1 %vm202_vm0, %v3273_v41  ;;  %v3322_v10 = vor.u32 %v2832_v7, %v2676_v8  ;;  %v2660_v12 = vld [vmem:[#allocation3 + $0xb0] sm:$0xf0]  ;;  %v2668_v15 = vld [vmem:[#allocation3 + $0xb8] sm:$0xf0]  ;;  %v2658_v16 = vld [vmem:[#allocation3 + $0xa0] sm:$0xf] }
  0x18   :  { %280 = vmatpush.bf16.msrb.mxu1 %v2535_v42  ;;  %2560 = vmatmul.msk.bf16.vlgmr.msra.gmra.mxu2 %vm202_vm0, %v2784_v38  ;;  %v3329_v14 = vor.u32 %v2828_v11, %v2660_v12  ;;  %v2830_v17 = vld [vmem:[#allocation3 + $0xac] sm:$0xf0]  ;;  %v3331_v18 = vor.u32 %v2829_v13, %v2668_v15  ;;  %v2666_v20 = vld [vmem:[#allocation3 + $0xa8] sm:$0xf]  ;;  %v2831_v21 = vld [vmem:[#allocation3 + $0xb4] sm:$0xf0] }
  0x19   :  { %2568 = vmatmul.msk.bf16.vlgmr.msra.gmra.mxu3 %vm202_vm0, %v2784_v38  ;;  %722 = vmatpush.bf16.msrb.mxu2 %v3283_v48  ;;  %v3333_v19 = vor.u32 %v2830_v17, %v2658_v16  ;;  %v3335_v22 = vor.u32 %v2831_v21, %v2666_v20  ;;  %v2786_v23 = vld [vmem:[%s4252_s0 + $0x10] sm:$0xff]  ;;  %v2824_v24 = vld [vmem:[#allocation3 + $0x84] sm:$0xf]  ;;  %v2825_v26 = vld [vmem:[#allocation3 + $0x8c] sm:$0xf] }
  0x1a   :  { %736 = vmatpush.bf16.msrb.mxu3 %v3275_v43  ;;  %694 = vmatpush.bf16.msrb.mxu0 %v3298_v54  ;;  %v2644_v25 = vld [vmem:[#allocation3 + $0x90] sm:$0xf0]  ;;  %v2652_v28 = vld [vmem:[#allocation3 + $0x98] sm:$0xf0]  ;;  %v2642_v29 = vld [vmem:[#allocation3 + $0x80] sm:$0xf] }
  0x1b   :  { %v3348_v27 = vor.u32 %v2824_v24, %v2644_v25  ;;  %v2826_v30 = vld [vmem:[#allocation3 + $0x8c] sm:$0xf0]  ;;  %v3350_v31 = vor.u32 %v2825_v26, %v2652_v28  ;;  %v2650_v33 = vld [vmem:[#allocation3 + $0x88] sm:$0xf]  ;;  %v2827_v34 = vld [vmem:[#allocation3 + $0x94] sm:$0xf0] }
  0x1c   :  { %281 = vmatpush.bf16.msrb.mxu1 %v2519_v49  ;;  %v3352_v32 = vor.u32 %v2826_v30, %v2642_v29  ;;  %v3355_v35 = vor.u32 %v2827_v34, %v2650_v33  ;;  %v2787_v36 = vld [vmem:[%s4252_s0 + $0x18] sm:$0xff]  ;;  %v2820_v37 = vld [vmem:[#allocation3 + $0x64] sm:$0xf]  ;;  %v2821_v39 = vld [vmem:[#allocation3 + $0x6c] sm:$0xf] }
  0x1d   :  { %723 = vmatpush.bf16.msrb.mxu2 %v3312_v4  ;;  %v2636_v42 = vld [vmem:[#allocation3 + $0x78] sm:$0xf0]  ;;  %v2626_v44 = vld [vmem:[#allocation3 + $0x60] sm:$0xf]  ;;  %v2822_v45 = vld [vmem:[#allocation3 + $0x6c] sm:$0xf0] }
  0x1e   :  { %737 = vmatpush.bf16.msrb.mxu3 %v3300_v58  ;;  %695 = vmatpush.bf16.msrb.mxu0 %v3309_v0  ;;  %v3369_v46 = vor.u32 %v2821_v39, %v2636_v42  ;;  %v3371_v47 = vor.u32 %v2822_v45, %v2626_v44  ;;  %v2634_v49 = vld [vmem:[#allocation3 + $0x68] sm:$0xf]  ;;  %v2823_v50 = vld [vmem:[#allocation3 + $0x74] sm:$0xf0]  ;;  %v2788_v52 = vld [vmem:[%s4252_s0 + $0x20] sm:$0xff]  ;;  %v3150_v44 = vmov 0  }
  0x1f   :  { %v3374_v51 = vor.u32 %v2823_v50, %v2634_v49  ;;  %v2816_v53 = vld [vmem:[#allocation3 + $0x44] sm:$0xf]  ;;  %v2612_v55 = vld [vmem:[#allocation3 + $0x50] sm:$0xf0]  ;;  %v2610_v56 = vld [vmem:[#allocation3 + $0x40] sm:$0xf] }
  0x20   :  { %282 = vmatpush.bf16.msrb.mxu1 %v2503_v57  ;;  %v3386_v57 = vor.u32 %v2816_v53, %v2612_v55  ;;  %v2818_v59 = vld [vmem:[#allocation3 + $0x4c] sm:$0xf0]  ;;  %v2817_v60 = vld [vmem:[#allocation3 + $0x4c] sm:$0xf]  ;;  %v2620_v61 = vld [vmem:[#allocation3 + $0x58] sm:$0xf0] }
  0x21   :  { %724 = vmatpush.bf16.msrb.mxu2 %v3335_v22  ;;  %v3388_v62 = vor.u32 %v2818_v59, %v2610_v56  ;;  %v3390_v63 = vor.u32 %v2817_v60, %v2620_v61  ;;  %v2594_v1 = vld [vmem:[#allocation3 + $0x20] sm:$0xf]  ;;  %v2814_v2 = vld [vmem:[#allocation3 + $0x2c] sm:$0xf0]  ;;  %v2618_v3 = vld [vmem:[#allocation3 + $0x48] sm:$0xf] }
  0x22   :  { %738 = vmatpush.bf16.msrb.mxu3 %v3331_v18  ;;  %696 = vmatpush.bf16.msrb.mxu0 %v3333_v19  ;;  %v3395_v7 = vor.u32 %v2814_v2, %v2594_v1  ;;  %v2810_v11 = vld [vmem:[#allocation3 + $0xc] sm:$0xf0]  ;;  %v2789_v13 = vld [vmem:[%s4252_s0 + $0x28] sm:$0xff]  ;;  %v2812_v15 = vld [vmem:[#allocation3 + $0x24] sm:$0xf] }
  0x23   :  { %v2596_v16 = vld [vmem:[#allocation3 + $0x30] sm:$0xf0]  ;;  %v2813_v17 = vld [vmem:[#allocation3 + $0x2c] sm:$0xf]  ;;  %v2604_v21 = vld [vmem:[#allocation3 + $0x38] sm:$0xf0] }
  0x24   :  { %283 = vmatpush.bf16.msrb.mxu1 %v2487_v5  ;;  %v2819_v5 = vld [vmem:[#allocation3 + $0x54] sm:$0xf0]  ;;  %v3412_v20 = vor.u32 %v2812_v15, %v2596_v16  ;;  %v3415_v25 = vor.u32 %v2813_v17, %v2604_v21  ;;  %v2586_v28 = vld [vmem:[#allocation3 + $0x8] sm:$0xf]  ;;  %v2809_v30 = vld [vmem:[#allocation3 + $0xc] sm:$0xf] }
  0x25   :  { %725 = vmatpush.bf16.msrb.mxu2 %v3355_v35  ;;  %v3397_v8 = vor.u32 %v2819_v5, %v2618_v3  ;;  %v2815_v24 = vld [vmem:[#allocation3 + $0x34] sm:$0xf0]  ;;  %v2790_v33 = vld [vmem:[%s4252_s0 + $0x30] sm:$0xff]  ;;  %v72_v50 = vld [vmem:[%s4255_s3] sm:$0xf] }
  0x26   :  { %739 = vmatpush.bf16.msrb.mxu3 %v3350_v31  ;;  %697 = vmatpush.bf16.msrb.mxu0 %v3352_v32  ;;  %v2811_v29 = vld [vmem:[#allocation3 + $0x14] sm:$0xf0]  ;;  %v2580_v39 = vld [vmem:[#allocation3 + $0x10] sm:$0xf0]  ;;  %v3485_v53 = vperm.slane %v72_v50, 3  ;;  %v3502_v2 = vperm.slane %v72_v50, 0 }
  0x27   :  { %2545 = vmatmul.msk.bf16.gmra.mxu0 %vm202_vm0, %v2785_v9  ;;  %2552 = vmatmul.msk.bf16.vlgmr.msrb.gmra.mxu1 %vm202_vm0, %v2784_v38  ;;  %v2628_v38 = vld [vmem:[#allocation3 + $0x70] sm:$0xf0]  ;;  %v3427_v34 = vor.u32 %v2811_v29, %v2586_v28  ;;  %v3504_v3 = vperm.slane %v72_v50, 1 }
  0x28   :  { %708 = vmatpush.bf16.msra.mxu1 %v3315_v6  ;;  %2561 = vmatmul.msk.bf16.gmra.mxu2 %vm202_vm0, %v2785_v9  ;;  %v3367_v40 = vor.u32 %v2820_v37, %v2628_v38  ;;  %v2808_v38 = vld [vmem:[#allocation3 + $0x4] sm:$0xf]  ;;  %4286 = vst [vmem:[#allocation7_spill] sm:$0xff] %v3485_v53 }
  0x29   :  { %2569 = vmatmul.msk.bf16.gmra.mxu3 %vm202_vm0, %v2785_v9  ;;  %726 = vmatpush.bf16.msrb.mxu2 %v3374_v51  ;;  %v3439_v42 = vor.u32 %v2808_v38, %v2580_v39  ;;  %4288 = vst [vmem:[#allocation9_spill] sm:$0xff] %v3502_v2 }
  0x2a   :  { %740 = vmatpush.bf16.msrb.mxu3 %v3369_v46  ;;  %698 = vmatpush.bf16.msrb.mxu0 %v3371_v47 }
  0x2c   :  { %709 = vmatpush.bf16.msra.mxu1 %v3322_v10 }
  0x2d   :  { %727 = vmatpush.bf16.msrb.mxu2 %v3397_v8 }
  0x2e   :  { %699 = vmatpush.bf16.msrb.mxu0 %v3388_v62  ;;  %741 = vmatpush.bf16.msrb.mxu3 %v3390_v63 }
  0x30   :  { %710 = vmatpush.bf16.msra.mxu1 %v3329_v14 }
  0x32   :  { %700 = vmatpush.bf16.msrb.mxu0 %v3395_v7  ;;  %742 = vmatpush.bf16.msrb.mxu3 %v3415_v25 }
  0x34   :  { %711 = vmatpush.bf16.msra.mxu1 %v3348_v27 }
  0x37   :  { %2546 = vmatmul.msk.bf16.gmra.mxu0 %vm202_vm0, %v2786_v23  ;;  %2553 = vmatmul.msk.bf16.gmra.mxu1 %vm202_vm0, %v2785_v9  ;;  %v2578_v9 = vld [vmem:[#allocation3] sm:$0xf] }
  0x38   :  { %2562 = vmatmul.msk.bf16.gmra.mxu2 %vm202_vm0, %v2786_v23  ;;  %712 = vmatpush.bf16.msra.mxu1 %v3367_v40  ;;  %v3401_v12 = vor.u32 %v2810_v11, %v2578_v9 }
  0x39   :  { %2570 = vmatmul.msk.bf16.gmra.mxu3 %vm202_vm0, %v2786_v23 }
  0x3a   :  { %701 = vmatpush.bf16.msrb.mxu0 %v3401_v12 }
  0x3c   :  { %713 = vmatpush.bf16.msra.mxu1 %v3386_v57 }
  0x3e   :  { %900 = vmatpush.bf16.msra.mxu0 %v3298_v54 }
  0x40   :  { %714 = vmatpush.bf16.msra.mxu1 %v3412_v20 }
  0x42   :  { %901 = vmatpush.bf16.msra.mxu0 %v3309_v0 }
  0x44   :  { %715 = vmatpush.bf16.msra.mxu1 %v3439_v42 }
  0x46   :  { %902 = vmatpush.bf16.msra.mxu0 %v3333_v19 }
  0x47   :  { %2547 = vmatmul.msk.bf16.gmra.mxu0 %vm202_vm0, %v2787_v36  ;;  %2554 = vmatmul.msk.bf16.gmra.mxu1 %vm202_vm0, %v2786_v23  ;;  %v2602_v23 = vld [vmem:[#allocation3 + $0x28] sm:$0xf] }
  0x48   :  { %2563 = vmatmul.msk.bf16.gmra.mxu2 %vm202_vm0, %v2787_v36  ;;  %v3417_v26 = vor.u32 %v2815_v24, %v2602_v23  ;;  %914 = vmatpush.bf16.msrb.mxu1 %v3315_v6 }
  0x49   :  { %2571 = vmatmul.msk.bf16.gmra.mxu3 %vm202_vm0, %v2787_v36 }
  0x4a   :  { %728 = vmatpush.bf16.msrb.mxu2 %v3417_v26  ;;  %903 = vmatpush.bf16.msra.mxu0 %v3352_v32 }
  0x4c   :  { %915 = vmatpush.bf16.msrb.mxu1 %v3322_v10 }
  0x4e   :  { %729 = vmatpush.bf16.msrb.mxu2 %v3427_v34  ;;  %904 = vmatpush.bf16.msra.mxu0 %v3371_v47 }
  0x50   :  { %916 = vmatpush.bf16.msrb.mxu1 %v3329_v14 }
  0x52   :  { %928 = vmatpush.bf16.msra.mxu2 %v3283_v48  ;;  %905 = vmatpush.bf16.msra.mxu0 %v3388_v62 }
  0x54   :  { %917 = vmatpush.bf16.msrb.mxu1 %v3348_v27 }
  0x56   :  { %929 = vmatpush.bf16.msra.mxu2 %v3312_v4  ;;  %906 = vmatpush.bf16.msra.mxu0 %v3395_v7 }
  0x57   :  { %2548 = vmatmul.msk.bf16.gmra.mxu0 %vm202_vm0, %v2788_v52  ;;  %2555 = vmatmul.msk.bf16.gmra.mxu1 %vm202_vm0, %v2787_v36  ;;  %v2588_v36 = vld [vmem:[#allocation3 + $0x18] sm:$0xf0] }
  0x58   :  { %2564 = vmatmul.msk.bf16.gmra.mxu2 %vm202_vm0, %v2788_v52  ;;  %v3429_v37 = vor.u32 %v2809_v30, %v2588_v36  ;;  %918 = vmatpush.bf16.msrb.mxu1 %v3367_v40 }
  0x59   :  { %2572 = vmatmul.msk.bf16.gmra.mxu3 %vm202_vm0, %v2788_v52 }
  0x5a   :  { %743 = vmatpush.bf16.msrb.mxu3 %v3429_v37  ;;  %930 = vmatpush.bf16.msra.mxu2 %v3335_v22 }
  0x5b   :  { %907 = vmatpush.bf16.msra.mxu0 %v3401_v12 }
  0x5c   :  { %919 = vmatpush.bf16.msrb.mxu1 %v3386_v57 }
  0x5e   :  { %942 = vmatpush.bf16.msra.mxu3 %v3275_v43  ;;  %931 = vmatpush.bf16.msra.mxu2 %v3355_v35 }
  0x60   :  { %920 = vmatpush.bf16.msrb.mxu1 %v3412_v20 }
  0x62   :  { %943 = vmatpush.bf16.msra.mxu3 %v3300_v58  ;;  %932 = vmatpush.bf16.msra.mxu2 %v3374_v51 }
  0x64   :  { %921 = vmatpush.bf16.msrb.mxu1 %v3439_v42 }
  0x66   :  { %944 = vmatpush.bf16.msra.mxu3 %v3331_v18  ;;  %933 = vmatpush.bf16.msra.mxu2 %v3397_v8 }
  0x67   :  { %2549 = vmatmul.msk.bf16.gmra.mxu0 %vm202_vm0, %v2789_v13  ;;  %2556 = vmatmul.msk.bf16.gmra.mxu1 %vm202_vm0, %v2788_v52  ;;  %v3483_v52 = vperm.slane %v72_v50, 2 }
  0x68   :  { %2565 = vmatmul.msk.bf16.gmra.mxu2 %vm202_vm0, %v2789_v13 }
  0x69   :  { %2573 = vmatmul.msk.bf16.gmra.mxu3 %vm202_vm0, %v2789_v13  ;;  %4285 = vst [vmem:[#allocation6_spill] sm:$0xff] %v3483_v52 }
  0x6a   :  { %945 = vmatpush.bf16.msra.mxu3 %v3350_v31  ;;  %934 = vmatpush.bf16.msra.mxu2 %v3417_v26 }
  0x6e   :  { %946 = vmatpush.bf16.msra.mxu3 %v3369_v46  ;;  %935 = vmatpush.bf16.msra.mxu2 %v3427_v34 }
  0x72   :  { %947 = vmatpush.bf16.msra.mxu3 %v3390_v63 }
  0x76   :  { %948 = vmatpush.bf16.msra.mxu3 %v3415_v25 }
  0x77   :  { %2550 = vmatmul.msk.bf16.gmra.mxu0 %vm202_vm0, %v2790_v33  ;;  %2557 = vmatmul.msk.bf16.gmra.mxu1 %vm202_vm0, %v2789_v13 }
  0x78   :  { %2566 = vmatmul.msk.bf16.gmra.mxu2 %vm202_vm0, %v2790_v33 }
  0x79   :  { %2574 = vmatmul.msk.bf16.gmra.mxu3 %vm202_vm0, %v2790_v33 }
  0x7a   :  { %949 = vmatpush.bf16.msra.mxu3 %v3429_v37 }
  0x87   :  { %2558 = vmatmul.msk.bf16.gmra.mxu1 %vm202_vm0, %v2790_v33  ;;  %702 = vmatmul.bf16.vlgmr.msrb.gmra.mxu0 %v3150_v44 }
  0x88   :  { %2567 = vmatmul.msk.bf16.gmra.mxu2 %vm202_vm0, %v3273_v41  ;;  %1106 = vmatpush.bf16.msrb.mxu0 %v3298_v54 }
  0x89   :  { %2575 = vmatmul.msk.bf16.gmra.mxu3 %vm202_vm0, %v3273_v41 }
  0x8c   :  { %1107 = vmatpush.bf16.msrb.mxu0 %v3309_v0 }
  0x90   :  { %1108 = vmatpush.bf16.msrb.mxu0 %v3333_v19 }
  0x94   :  { %v236_v45 = vpop.f32.mrf.mxu0  ;;  %v3473_v49 = vpop.f32.mrf.mxu1  ;;  %1109 = vmatpush.bf16.msrb.mxu0 %v3352_v32 }
  0x95   :  { %v237_v5 = vadd.f32 %v236_v45, %v3502_v2 }
  0x97   :  { %2559 = vmatmul.msk.bf16.gmra.mxu1 %vm202_vm0, %v3273_v41 }
  0x98   :  { %730 = vmatmul.bf16.vlgmr.msrb.gmra.mxu2 %v3150_v44  ;;  %1110 = vmatpush.bf16.msrb.mxu0 %v3371_v47 }
  0x99   :  { %744 = vmatmul.bf16.vlgmr.msrb.gmra.mxu3 %v3150_v44  ;;  %1134 = vmatpush.bf16.msrb.mxu2 %v3283_v48 }
  0x9a   :  { %1148 = vmatpush.bf16.msrb.mxu3 %v3275_v43 }
  0x9b   :  { %v334_v55 = vpop.f32.mrf.mxu2 }
  0x9c   :  { %v383_v56 = vpop.f32.mrf.mxu3  ;;  %v335_v59 = vadd.f32 %v334_v55, %v3483_v52  ;;  %v3493_v60 = vpop.f32.mrf.mxu0  ;;  %1111 = vmatpush.bf16.msrb.mxu0 %v3388_v62 }
  0x9d   :  { %v384_v41 = vadd.f32 %v383_v56, %v3485_v53  ;;  %v3495_v61 = vpop.f32.mrf.mxu1  ;;  %1135 = vmatpush.bf16.msrb.mxu2 %v3312_v4 }
  0x9e   :  { %4287 = vst [vmem:[#allocation8_spill] sm:$0xff] %v3495_v61  ;;  %1149 = vmatpush.bf16.msrb.mxu3 %v3300_v58 }
  0x9f   :  { %v3498_v1 = vpack.c.bf16 %v384_v41, %v335_v59 }
  0xa0   :  { %1112 = vmatpush.bf16.msrb.mxu0 %v3395_v7 }
  0xa1   :  { %1136 = vmatpush.bf16.msrb.mxu2 %v3335_v22 }
  0xa2   :  { %1150 = vmatpush.bf16.msrb.mxu3 %v3331_v18 }
  0xa3   :  { %v3510_v9 = vpop.f32.mrf.mxu2 }
  0xa4   :  { %v3512_v11 = vpop.f32.mrf.mxu3  ;;  %v241_v13 = vpop.f32.mrf.mxu0  ;;  %1113 = vmatpush.bf16.msrb.mxu0 %v3401_v12 }
  0xa5   :  { %v285_v15 = vpop.f32.mrf.mxu1  ;;  %1137 = vmatpush.bf16.msrb.mxu2 %v3355_v35  ;;  %v242_v36 = vadd.f32 %v241_v13, %v3502_v2 }
  0xa6   :  { %v286_v16 = vadd.f32 %v285_v15, %v3504_v3  ;;  %1151 = vmatpush.bf16.msrb.mxu3 %v3350_v31 }
  0xa7   :  { %716 = vmatmul.bf16.vlgmr.msra.gmra.mxu1 %v3150_v44 }
  0xa8   :  { %v3518_v17 = vpack.c.bf16 %v286_v16, %v237_v5  ;;  %1120 = vmatpush.bf16.msra.mxu1 %v3315_v6 }
  0xa9   :  { %1138 = vmatpush.bf16.msrb.mxu2 %v3374_v51 }
  0xaa   :  { %1152 = vmatpush.bf16.msrb.mxu3 %v3369_v46 }
  0xab   :  { %v339_v21 = vpop.f32.mrf.mxu2 }
  0xac   :  { %v388_v23 = vpop.f32.mrf.mxu3  ;;  %v340_v24 = vadd.f32 %v339_v21, %v3483_v52  ;;  %v3525_v29 = vpop.f32.mrf.mxu0  ;;  %1121 = vmatpush.bf16.msra.mxu1 %v3322_v10 }
  0xad   :  { %v389_v28 = vadd.f32 %v388_v23, %v3485_v53  ;;  %v3527_v30 = vpop.f32.mrf.mxu1  ;;  %1139 = vmatpush.bf16.msrb.mxu2 %v3397_v8 }
  0xae   :  { %1153 = vmatpush.bf16.msrb.mxu3 %v3390_v63 }
  0xaf   :  { %v3531_v33 = vpack.c.bf16 %v389_v28, %v340_v24 }
  0xb0   :  { %1122 = vmatpush.bf16.msra.mxu1 %v3329_v14 }
  0xb1   :  { %4289 = vst [vmem:[#allocation10_spill] sm:$0xff] %v3531_v33  ;;  %1140 = vmatpush.bf16.msrb.mxu2 %v3417_v26 }
  0xb2   :  { %1154 = vmatpush.bf16.msrb.mxu3 %v3415_v25 }
  0xb3   :  { %v3538_v38 = vpop.f32.mrf.mxu2 }
  0xb4   :  { %4290 = vst [vmem:[#allocation11_spill] sm:$0xff] %v3538_v38  ;;  %v3540_v39 = vpop.f32.mrf.mxu3  ;;  %v246_v44 = vpop.f32.mrf.mxu0  ;;  %1123 = vmatpush.bf16.msra.mxu1 %v3348_v27 }
  0xb5   :  { %4291 = vst [vmem:[#allocation12_spill] sm:$0xff] %v3540_v39  ;;  %v290_v45 = vpop.f32.mrf.mxu1  ;;  %1141 = vmatpush.bf16.msrb.mxu2 %v3427_v34  ;;  %v247_v21 = vadd.f32 %v246_v44, %v3502_v2 }
  0xb6   :  { %v291_v50 = vadd.f32 %v290_v45, %v3504_v3  ;;  %1155 = vmatpush.bf16.msrb.mxu3 %v3429_v37 }
  0xb8   :  { %v3546_v55 = vpack.c.bf16 %v291_v50, %v242_v36  ;;  %1124 = vmatpush.bf16.msra.mxu1 %v3367_v40 }
  0xba   :  { %4292 = vst [vmem:[#allocation13_spill] sm:$0xff] %v3546_v55 }
  0xbb   :  { %v344_v56 = vpop.f32.mrf.mxu2 }
  0xbc   :  { %v393_v59 = vpop.f32.mrf.mxu3  ;;  %v345_v41 = vadd.f32 %v344_v56, %v3483_v52  ;;  %v3551_v13 = vpop.f32.mrf.mxu0  ;;  %1125 = vmatpush.bf16.msra.mxu1 %v3386_v57 }
  0xbd   :  { %v394_v5 = vadd.f32 %v393_v59, %v3485_v53  ;;  %4293 = vst [vmem:[#allocation14_spill] sm:$0xff] %v3551_v13  ;;  %v3553_v15 = vpop.f32.mrf.mxu1 }
  0xbe   :  { %4294 = vst [vmem:[#allocation15_spill] sm:$0xff] %v3553_v15 }
  0xbf   :  { %v3556_v16 = vpack.c.bf16 %v394_v5, %v345_v41 }
  0xc0   :  { %1126 = vmatpush.bf16.msra.mxu1 %v3412_v20 }
  0xc1   :  { %4295 = vst [vmem:[#allocation16_spill] sm:$0xff] %v3556_v16 }
  0xc3   :  { %v3560_v23 = vpop.f32.mrf.mxu2 }
  0xc4   :  { %4296 = vst [vmem:[#allocation17_spill] sm:$0xff] %v3560_v23  ;;  %v3562_v24 = vpop.f32.mrf.mxu3  ;;  %v251_v28 = vpop.f32.mrf.mxu0  ;;  %1127 = vmatpush.bf16.msra.mxu1 %v3439_v42 }
  0xc5   :  { %4297 = vst [vmem:[#allocation18_spill] sm:$0xff] %v3562_v24  ;;  %v295_v36 = vpop.f32.mrf.mxu1  ;;  %v252_v24 = vadd.f32 %v251_v28, %v3502_v2 }
  0xc6   :  { %v296_v45 = vadd.f32 %v295_v36, %v3504_v3 }
  0xc8   :  { %v3566_v50 = vpack.c.bf16 %v296_v45, %v247_v21 }
  0xca   :  { %4298 = vst [vmem:[#allocation19_spill] sm:$0xff] %v3566_v50 }
  0xcb   :  { %v349_v56 = vpop.f32.mrf.mxu2 }
  0xcc   :  { %v398_v59 = vpop.f32.mrf.mxu3  ;;  %v350_v41 = vadd.f32 %v349_v56, %v3483_v52  ;;  %v3570_v61 = vpop.f32.mrf.mxu0 }
  0xcd   :  { %v399_v5 = vadd.f32 %v398_v59, %v3485_v53  ;;  %4299 = vst [vmem:[#allocation20_spill] sm:$0xff] %v3570_v61  ;;  %v3572_v44 = vpop.f32.mrf.mxu1 }
  0xce   :  { %4300 = vst [vmem:[#allocation21_spill] sm:$0xff] %v3572_v44 }
  0xcf   :  { %v3574_v23 = vpack.c.bf16 %v399_v5, %v350_v41 }
  0xd1   :  { %4301 = vst [vmem:[#allocation22_spill] sm:$0xff] %v3574_v23 }
  0xd3   :  { %v3577_v16 = vpop.f32.mrf.mxu2 }
  0xd4   :  { %4302 = vst [vmem:[#allocation23_spill] sm:$0xff] %v3577_v16  ;;  %v3579_v13 = vpop.f32.mrf.mxu3  ;;  %v256_v21 = vpop.f32.mrf.mxu0 }
  0xd5   :  { %4303 = vst [vmem:[#allocation24_spill] sm:$0xff] %v3579_v13  ;;  %v300_v36 = vpop.f32.mrf.mxu1  ;;  %v257_v16 = vadd.f32 %v256_v21, %v3502_v2 }
  0xd6   :  { %v301_v45 = vadd.f32 %v300_v36, %v3504_v3 }
  0xd8   :  { %v3582_v50 = vpack.c.bf16 %v301_v45, %v252_v24 }
  0xda   :  { %4304 = vst [vmem:[#allocation25_spill] sm:$0xff] %v3582_v50 }
  0xdb   :  { %v354_v56 = vpop.f32.mrf.mxu2 }
  0xdc   :  { %v403_v59 = vpop.f32.mrf.mxu3  ;;  %v355_v61 = vadd.f32 %v354_v56, %v3483_v52  ;;  %v258_v41 = vpop.f32.mrf.mxu0 }
  0xdd   :  { %v404_v44 = vadd.f32 %v403_v59, %v3485_v53  ;;  %v3586_v5 = vpop.f32.mrf.mxu1 }
  0xde   :  { %4305 = vst [vmem:[#allocation26_spill] sm:$0xff] %v3586_v5  ;;  %v259_v5 = vadd.f32 %v258_v41, %v3502_v2 }
  0xdf   :  { %v3588_v28 = vpack.c.bf16 %v404_v44, %v355_v61 }
  0xe1   :  { %4306 = vst [vmem:[#allocation27_spill] sm:$0xff] %v3588_v28 }
  0xe3   :  { %v356_v13 = vpop.f32.mrf.mxu2 }
  0xe4   :  { %v405_v23 = vpop.f32.mrf.mxu3  ;;  %v357_v39 = vadd.f32 %v356_v13, %v3483_v52  ;;  %v261_v36 = vpop.f32.mrf.mxu0 }
  0xe5   :  { %v406_v24 = vadd.f32 %v405_v23, %v3485_v53  ;;  %v305_v45 = vpop.f32.mrf.mxu1 }
  0xe6   :  { %v306_v50 = vadd.f32 %v305_v45, %v3504_v3 }
  0xe7   :  { %v3594_v56 = vpack.c.bf16 %v406_v24, %v357_v39  ;;  %v262_v39 = vadd.f32 %v261_v36, %v3502_v2 }
  0xe8   :  { %v3596_v59 = vpack.c.bf16 %v306_v50, %v257_v16 }
  0xe9   :  { %4307 = vst [vmem:[#allocation28_spill] sm:$0xff] %v3594_v56 }
  0xea   :  { %4308 = vst [vmem:[#allocation29_spill] sm:$0xff] %v3596_v59 }
  0xeb   :  { %v359_v61 = vpop.f32.mrf.mxu2 }
  0xec   :  { %v408_v44 = vpop.f32.mrf.mxu3  ;;  %v360_v21 = vadd.f32 %v359_v61, %v3483_v52  ;;  %v263_v38 = vpop.f32.mrf.mxu0 }
  0xed   :  { %v409_v28 = vadd.f32 %v408_v44, %v3485_v53  ;;  %v307_v13 = vpop.f32.mrf.mxu1 }
  0xee   :  { %v308_v23 = vadd.f32 %v307_v13, %v3504_v3 }
  0xef   :  { %v3602_v33 = vpack.c.bf16 %v409_v28, %v360_v21  ;;  %v264_v28 = vadd.f32 %v263_v38, %v3502_v2  ;;  %v526_v38 = vunpack.c.l.bf16 %v3518_v17 }
  0xf0   :  { %v3604_v55 = vpack.c.bf16 %v308_v23, %v259_v5 }
  0xf1   :  { %4309 = vst [vmem:[#allocation30_spill] sm:$0xff] %v3602_v33 }
  0xf2   :  { %4310 = vst [vmem:[#allocation31_spill] sm:$0xff] %v3604_v55 }
  0xf3   :  { %v361_v16 = vpop.f32.mrf.mxu2 }
  0xf4   :  { %v410_v50 = vpop.f32.mrf.mxu3  ;;  %v362_v41 = vadd.f32 %v361_v16, %v3483_v52  ;;  %v266_v45 = vpop.f32.mrf.mxu0 }
  0xf5   :  { %v411_v24 = vadd.f32 %v410_v50, %v3485_v53  ;;  %v310_v61 = vpop.f32.mrf.mxu1 }
  0xf6   :  { %v311_v44 = vadd.f32 %v310_v61, %v3504_v3 }
  0xf7   :  { %v3610_v56 = vpack.c.bf16 %v411_v24, %v362_v41  ;;  %v267_v41 = vadd.f32 %v266_v45, %v3502_v2  ;;  %v239_v45 = vadd.f32 %v3493_v60, %v3502_v2 }
  0xf8   :  { %v3612_v59 = vpack.c.bf16 %v311_v44, %v262_v39 }
  0xf9   :  { %4311 = vst [vmem:[#allocation32_spill] sm:$0xff] %v3610_v56 }
  0xfa   :  { %4312 = vst [vmem:[#allocation33_spill] sm:$0xff] %v3612_v59 }
  0xfb   :  { %v364_v5 = vpop.f32.mrf.mxu2 }
  0xfc   :  { %v413_v21 = vpop.f32.mrf.mxu3  ;;  %v365_v36 = vadd.f32 %v364_v5, %v3483_v52  ;;  %v268_v23 = vpop.f32.mrf.mxu0 }
  0xfd   :  { %v414_v13 = vadd.f32 %v413_v21, %v3485_v53  ;;  %v312_v16 = vpop.f32.mrf.mxu1 }
  0xfe   :  { %v313_v50 = vadd.f32 %v312_v16, %v3504_v3 }
  0xff   :  { %v3618_v33 = vpack.c.bf16 %v414_v13, %v365_v36  ;;  %v288_v13 = vadd.f32 %v3527_v30, %v3504_v3 }
 0x100   :  { %v3620_v55 = vpack.c.bf16 %v313_v50, %v264_v28  ;;  %v269_v50 = vadd.f32 %v268_v23, %v3502_v2 }
 0x101   :  { %4313 = vst [vmem:[#allocation34_spill] sm:$0xff] %v3618_v33 }
 0x102   :  { %4314 = vst [vmem:[#allocation35_spill] sm:$0xff] %v3620_v55 }
 0x103   :  { %v366_v39 = vpop.f32.mrf.mxu2 }
 0x104   :  { %v415_v24 = vpop.f32.mrf.mxu3  ;;  %v367_v61 = vadd.f32 %v366_v39, %v3483_v52  ;;  %v703_v21 = vpop.f32.mrf.mxu0 }
 0x105   :  { %v416_v44 = vadd.f32 %v415_v24, %v3485_v53  ;;  %v315_v5 = vpop.f32.mrf.mxu1  ;;  %v750_v59 = vadd.f32 %v703_v21, %v526_v38 }
 0x106   :  { %v316_v56 = vadd.f32 %v315_v5, %v3504_v3 }
 0x107   :  { %v3627_v16 = vpack.c.bf16 %v416_v44, %v367_v61  ;;  %v2704_v28 = vmul.f32 -1.442695, %v750_v59  ;;  %v3641_v44 = vpack.c.bf16 %v288_v13, %v239_v45 }
 0x108   :  { %v3629_v36 = vpack.c.bf16 %v316_v56, %v267_v41 }
 0x109   :  { %4315 = vst [vmem:[#allocation36_spill] sm:$0xff] %v3627_v16  ;;  %2857 = vpow2.f32 %v2704_v28  ;;  %v530_v23 = vunpack.c.l.bf16 %v3641_v44 }
 0x10a   :  { %4316 = vst [vmem:[#allocation37_spill] sm:$0xff] %v3629_v36 }
 0x10b   :  { %v369_v39 = vpop.f32.mrf.mxu2 }
 0x10c   :  { %v418_v24 = vpop.f32.mrf.mxu3  ;;  %v370_v33 = vadd.f32 %v369_v39, %v3483_v52  ;;  %v705_v30 = vpop.f32.mrf.mxu0 }
 0x10d   :  { %v419_v38 = vadd.f32 %v418_v24, %v3485_v53  ;;  %v317_v61 = vpop.f32.mrf.mxu1 }
 0x10e   :  { %v318_v56 = vadd.f32 %v317_v61, %v3504_v3 }
 0x10f   :  { %v3639_v41 = vpack.c.bf16 %v419_v38, %v370_v33  ;;  %v2858_v59 = vpop.eup %2857  ;;  %v272_v33 = vadd.f32 %v3473_v49, %v3502_v2  ;;  %v754_v38 = vadd.f32 %v705_v30, %v530_v23 }
 0x110   :  { %v3643_v60 = vpack.c.bf16 %v318_v56, %v269_v50  ;;  %v764_v5 = vadd.f32 1.0, %v2858_v59 }
 0x111   :  { %4317 = vst [vmem:[#allocation38_spill] sm:$0xff] %v3639_v41  ;;  %v2705_v59 = vmul.f32 -1.442695, %v754_v38  ;;  %v528_v41 = vunpack.c.l.bf16 %v3498_v1 }
 0x112   :  { %4318 = vst [vmem:[#allocation39_spill] sm:$0xff] %v3643_v60  ;;  %2859 = vrcp.f32 %v764_v5  ;;  %vm771_vm2 = vweird.f32 %v764_v5 }
 0x113   :  { %v371_v21 = vpop.f32.mrf.mxu2  ;;  %2861 = vpow2.f32 %v2705_v59 }
 0x114   :  { %v420_v28 = vpop.f32.mrf.mxu3  ;;  %v372_v39 = vadd.f32 %v371_v21, %v3483_v52  ;;  %v337_v21 = vadd.f32 %v3510_v9, %v3483_v52 }
 0x115   :  { %v421_v24 = vadd.f32 %v420_v28, %v3485_v53  ;;  %v320_v16 = vpop.f32.mrf.mxu1  ;;  %v386_v28 = vadd.f32 %v3512_v11, %v3485_v53 }
 0x116   :  { %v321_v45 = vadd.f32 %v320_v16, %v3504_v3  ;;  %v777_v16 = vand.u32 2147483648, %v764_v5 }
 0x117   :  { %v3651_v13 = vpack.c.bf16 %v421_v24, %v372_v39  ;;  %v426_v38 = vpack.c.bf16 %v386_v28, %v337_v21 }
 0x118   :  { %v3653_v50 = vpack.c.bf16 %v321_v45, %v272_v33  ;;  %v2860_v61 = vpop.eup %2859  ;;  %v775_v33 = vand.u32 2147483647, %v764_v5  ;;  %v778_v9 = vor.u32 1.1754944e-38, %v777_v16 }
 0x119   :  { %4319 = vst [vmem:[#allocation40_spill] sm:$0xff] %v3651_v13  ;;  %v767_v56 = vmul.f32 %v2860_v61, %v764_v5  ;;  %vm772_vm1 = vweird.f32 %v2860_v61 }
 0x11a   :  { %4320 = vst [vmem:[#allocation41_spill] sm:$0xff] %v3653_v50  ;;  %vm773_vm3 = vmor %vm771_vm2, %vm772_vm1  ;;  %vm776_vm4 = vcmp.eq.f32.partialorder %v775_v33, 8.507059e+37  ;;  %v2862_v50 = vpop.eup %2861 }
 0x11b   :  { %v768_v60 = vsub.f32 1.0, %v767_v56  ;;  %v731_v49 = vpop.f32.mrf.mxu2  ;;  %v529_v56 = vunpack.c.h.bf16 %v3498_v1  ;;  %v3666_v5 = vadd.f32 1.0, %v2862_v50  ;;  %v531_v1 = vunpack.c.h.bf16 %v3641_v44 }
 0x11c   :  { %v745_v30 = vpop.f32.mrf.mxu3  ;;  %v752_v23 = vadd.f32 %v731_v49, %v528_v41  ;;  %v533_v41 = vunpack.c.h.bf16 %v426_v38 }
 0x11d   :  { %v3660_v39 = vpop.f32.mrf.mxu1  ;;  %v769_v24 = vmul.f32 %v2860_v61, %v768_v60  ;;  %v753_v60 = vadd.f32 %v745_v30, %v529_v56  ;;  %vm786_vm7 = vweird.f32 %v3666_v5 }
 0x11e   :  { %4321 = vst [vmem:[#allocation42_spill] sm:$0xff] %v3660_v39  ;;  %2863 = vtanh.f32 %v752_v23  ;;  %v527_v39 = vunpack.c.h.bf16 %v3518_v17 }
 0x11f   :  { %v770_v45 = vadd.f32 %v2860_v61, %v769_v24 }
 0x121   :  { %v774_v13 = vsel %vm773_vm3, %v2860_v61, %v770_v45  ;;  %v2708_v61 = vmul.f32 -1.442695, %v753_v60 }
 0x122   :  { %v779_v11 = vsel %vm776_vm4, %v778_v9, %v774_v13 }
 0x123   :  { %v733_v60 = vpop.f32.mrf.mxu2 }
 0x124   :  { %v747_v49 = vpop.f32.mrf.mxu3  ;;  %v2864_v59 = vpop.eup %2863 }
 0x125   :  { %v717_v36 = vpop.f32.mrf.mxu1  ;;  %v3664_v55 = vmul.f32 %v2864_v59, %v779_v11  ;;  %v757_v21 = vadd.f32 %v747_v49, %v533_v41 }
 0x126   :  { %v751_v28 = vadd.f32 %v717_v36, %v527_v39 }
 0x127   :  { %v2709_v16 = vmul.f32 -1.442695, %v757_v21 }
 0x128   :  { %v2706_v23 = vmul.f32 -1.442695, %v751_v28  ;;  %v532_v28 = vunpack.c.l.bf16 %v426_v38 }
 0x12a   :  { %2865 = vpow2.f32 %v2706_v23 }
 0x12b   :  { %2867 = vrcp.f32 %v3666_v5 }
 0x12c   :  { %2869 = vpow2.f32 %v2708_v61 }
 0x12d   :  { %v719_v13 = vpop.f32.mrf.mxu1  ;;  %2871 = vpow2.f32 %v2709_v16 }
 0x12e   :  { %v755_v17 = vadd.f32 %v719_v13, %v531_v1 }
 0x130   :  { %v2707_v30 = vmul.f32 -1.442695, %v755_v17  ;;  %v2866_v24 = vpop.eup %2865  ;;  %v756_v17 = vadd.f32 %v733_v60, %v532_v28  ;;  %v790_v28 = vand.u32 2147483647, %v3666_v5 }
 0x131   :  { %v3670_v33 = vpop.eup %2867  ;;  %v802_v45 = vadd.f32 1.0, %v2866_v24 }
 0x132   :  { %v2870_v36 = vpop.eup %2869  ;;  %2873 = vpow2.f32 %v2707_v30  ;;  %v782_v39 = vmul.f32 %v3670_v33, %v3666_v5  ;;  %vm787_vm8 = vweird.f32 %v3670_v33  ;;  %vm791_vm13 = vcmp.eq.f32.partialorder %v790_v28, 8.507059e+37 }
 0x133   :  { %v2872_v50 = vpop.eup %2871  ;;  %2875 = vrcp.f32 %v802_v45  ;;  %v3674_v9 = vadd.f32 1.0, %v2870_v36  ;;  %v815_v61 = vand.u32 2147483648, %v802_v45  ;;  %v813_v1 = vand.u32 2147483647, %v802_v45  ;;  %vm3693_vm11 = vmor %vm786_vm7, %vm787_vm8 }
 0x134   :  { %v3676_v11 = vadd.f32 1.0, %v2872_v50  ;;  %v783_v41 = vsub.f32 1.0, %v782_v39  ;;  %vm809_vm6 = vweird.f32 %v802_v45  ;;  %v792_v39 = vand.u32 2147483648, %v3666_v5 }
 0x135   :  { %2877 = vrcp.f32 %v3674_v9  ;;  %v816_v38 = vor.u32 1.1754944e-38, %v815_v61  ;;  %vm814_vm10 = vcmp.eq.f32.partialorder %v813_v1, 8.507059e+37  ;;  %vm849_vm3 = vweird.f32 %v3674_v9 }
 0x136   :  { %2879 = vrcp.f32 %v3676_v11  ;;  %v784_v23 = vmul.f32 %v3670_v33, %v783_v41  ;;  %vm864_vm4 = vweird.f32 %v3676_v11 }
 0x138   :  { %v2874_v44 = vpop.eup %2873  ;;  %v785_v50 = vadd.f32 %v3670_v33, %v784_v23 }
 0x139   :  { %v2876_v56 = vpop.eup %2875  ;;  %v803_v49 = vadd.f32 1.0, %v2874_v44 }
 0x13a   :  { %v805_v59 = vmul.f32 %v2876_v56, %v802_v45  ;;  %vm810_vm5 = vweird.f32 %v2876_v56 }
 0x13b   :  { %2881 = vrcp.f32 %v803_v49  ;;  %v3681_v13 = vpop.eup %2877  ;;  %vm811_vm9 = vmor %vm809_vm6, %vm810_vm5  ;;  %vm824_vm14 = vweird.f32 %v803_v49 }
 0x13c   :  { %v806_v21 = vsub.f32 1.0, %v805_v59  ;;  %v3683_v30 = vpop.eup %2879  ;;  %v845_v59 = vmul.f32 %v3681_v13, %v3674_v9  ;;  %2883 = vtanh.f32 %v756_v17  ;;  %v828_v17 = vand.u32 2147483647, %v803_v49 }
 0x13d   :  { %v860_v45 = vmul.f32 %v3683_v30, %v3676_v11  ;;  %vm850_vm1 = vweird.f32 %v3681_v13  ;;  %vm865_vm2 = vweird.f32 %v3683_v30 }
 0x13e   :  { %v807_v16 = vmul.f32 %v2876_v56, %v806_v21  ;;  %vm829_vm0 = vcmp.eq.f32.partialorder %v828_v17, 8.507059e+37  ;;  %vm851_vm5 = vmor %vm849_vm3, %vm850_vm1 }
 0x13f   :  { %v861_v53 = vsub.f32 1.0, %v860_v45  ;;  %vm866_vm6 = vmor %vm864_vm4, %vm865_vm2 }
 0x140   :  { %v808_v24 = vadd.f32 %v2876_v56, %v807_v16  ;;  %v830_v16 = vand.u32 2147483648, %v803_v49 }
 0x141   :  { %v2882_v36 = vpop.eup %2881 }
 0x142   :  { %v812_v44 = vsel %vm811_vm9, %v2876_v56, %v808_v24  ;;  %v820_v41 = vmul.f32 %v2882_v36, %v803_v49  ;;  %v789_v56 = vsel %vm3693_vm11, %v3670_v33, %v785_v50  ;;  %vm825_vm12 = vweird.f32 %v2882_v36  ;;  %v2884_v5 = vpop.eup %2883 }
 0x143   :  { %v817_v60 = vsel %vm814_vm10, %v816_v38, %v812_v44  ;;  %v846_v38 = vsub.f32 1.0, %v845_v59  ;;  %v793_v44 = vor.u32 1.1754944e-38, %v792_v39  ;;  %vm826_vm15 = vmor %vm824_vm14, %vm825_vm12  ;;  %v862_v50 = vmul.f32 %v3683_v30, %v861_v53 }
 0x144   :  { %v874_v23 = vmul.f32 0.0, %v817_v60  ;;  %v821_v61 = vsub.f32 1.0, %v820_v41  ;;  %v831_v41 = vor.u32 1.1754944e-38, %v830_v16  ;;  %v870_v53 = vand.u32 2147483648, %v3676_v11 }
 0x145   :  { %v794_v60 = vsel %vm791_vm13, %v793_v44, %v789_v56  ;;  %v847_v33 = vmul.f32 %v3681_v13, %v846_v38  ;;  %v863_v59 = vadd.f32 %v3683_v30, %v862_v50 }
 0x146   :  { %v822_v1 = vmul.f32 %v2882_v36, %v821_v61  ;;  %v3702_v24 = vadd.f32 %v3664_v55, %v874_v23  ;;  %v877_v61 = vmul.f32 %v2884_v5, %v794_v60  ;;  %v871_v16 = vor.u32 1.1754944e-38, %v870_v53  ;;  %v4326_v53 = vld [vmem:[#allocation10_spill] sm:$0xff] }
 0x147   :  { %v848_v49 = vadd.f32 %v3681_v13, %v847_v33  ;;  %v867_v28 = vsel %vm866_vm6, %v3683_v30, %v863_v59  ;;  %v4325_v30 = vld [vmem:[#allocation13_spill] sm:$0xff] }
 0x148   :  { %v823_v52 = vadd.f32 %v2882_v36, %v822_v1  ;;  %2885 = vtanh.f32 %v3702_v24  ;;  %v893_v33 = vunpack.c.h.bf16 %v4325_v30 }
 0x149   :  { %v852_v45 = vsel %vm851_vm5, %v3681_v13, %v848_v49 }
 0x14a   :  { %v827_v15 = vsel %vm826_vm15, %v2882_v36, %v823_v52  ;;  %v855_v52 = vand.u32 2147483648, %v3674_v9  ;;  %v868_v36 = vand.u32 2147483647, %v3676_v11  ;;  %v4324_v11 = vld [vmem:[#allocation15_spill] sm:$0xff] }
 0x14b   :  { %v832_v21 = vsel %vm829_vm0, %v831_v41, %v827_v15  ;;  %v853_v15 = vand.u32 2147483647, %v3674_v9  ;;  %v244_v9 = vadd.f32 %v3525_v29, %v3502_v2  ;;  %v293_v13 = vadd.f32 %v4324_v11, %v3504_v3  ;;  %v4328_v29 = vld [vmem:[#allocation11_spill] sm:$0xff] }
 0x14c   :  { %v875_v55 = vmul.f32 0.0, %v832_v21  ;;  %v856_v56 = vor.u32 1.1754944e-38, %v855_v52  ;;  %vm869_vm8 = vcmp.eq.f32.partialorder %v868_v36, 8.507059e+37  ;;  %v892_v41 = vunpack.c.l.bf16 %v4325_v30  ;;  %v4327_v36 = vld [vmem:[#allocation6_spill] sm:$0xff] }
 0x14d   :  { %vm854_vm7 = vcmp.eq.f32.partialorder %v853_v15, 8.507059e+37  ;;  %v872_v38 = vsel %vm869_vm8, %v871_v16, %v867_v28  ;;  %v429_v49 = vpack.c.bf16 %v293_v13, %v244_v9  ;;  %v895_v15 = vunpack.c.h.bf16 %v4326_v53  ;;  %v4329_v28 = vld [vmem:[#allocation7_spill] sm:$0xff] }
 0x14e   :  { %v3707_v39 = vadd.f32 %v877_v61, %v875_v55  ;;  %v2886_v23 = vpop.eup %2885  ;;  %v857_v17 = vsel %vm854_vm7, %v856_v56, %v852_v45  ;;  %v342_v45 = vadd.f32 %v4328_v29, %v4327_v36 }
 0x14f   :  { %v882_v44 = vmul.f32 %v2886_v23, %v857_v17  ;;  %v4330_v23 = vld [vmem:[#allocation12_spill] sm:$0xff]  ;;  %v897_v17 = vunpack.c.h.bf16 %v429_v49 }
 0x150   :  { %2887 = vtanh.f32 %v3707_v39  ;;  %v391_v56 = vadd.f32 %v4330_v23, %v4329_v28 }
 0x152   :  { %v430_v30 = vpack.c.bf16 %v391_v56, %v342_v45 }
 0x156   :  { %v2888_v1 = vpop.eup %2887 }
 0x157   :  { %v883_v5 = vmul.f32 %v2888_v1, %v872_v38  ;;  %v896_v1 = vunpack.c.l.bf16 %v429_v49  ;;  %v894_v49 = vunpack.c.l.bf16 %v4326_v53 }
 0x159   :  { %v884_v60 = vpack.c.bf16 %v883_v5, %v882_v44 }
 0x15b   :  { %908 = vmatmul.bf16.vlgmr.msra.gmra.mxu0 %v884_v60  ;;  %922 = vmatmul.bf16.vlgmr.msrb.gmra.mxu1 %v884_v60 }
 0x15c   :  { %936 = vmatmul.bf16.vlgmr.msra.gmra.mxu2 %v884_v60  ;;  %950 = vmatmul.bf16.vlgmr.msra.gmra.mxu3 %v884_v60 }
 0x15d   :  { %1312 = vmatpush.bf16.msra.mxu0 %v3298_v54  ;;  %1326 = vmatpush.bf16.msrb.mxu1 %v3315_v6 }
 0x15e   :  { %1340 = vmatpush.bf16.msra.mxu2 %v3283_v48  ;;  %1354 = vmatpush.bf16.msra.mxu3 %v3275_v43 }
 0x161   :  { %1313 = vmatpush.bf16.msra.mxu0 %v3309_v0  ;;  %1327 = vmatpush.bf16.msrb.mxu1 %v3322_v10 }
 0x162   :  { %1341 = vmatpush.bf16.msra.mxu2 %v3312_v4  ;;  %1355 = vmatpush.bf16.msra.mxu3 %v3300_v58 }
 0x165   :  { %1314 = vmatpush.bf16.msra.mxu0 %v3333_v19  ;;  %1328 = vmatpush.bf16.msrb.mxu1 %v3329_v14 }
 0x166   :  { %1342 = vmatpush.bf16.msra.mxu2 %v3335_v22  ;;  %1356 = vmatpush.bf16.msra.mxu3 %v3331_v18 }
 0x169   :  { %1315 = vmatpush.bf16.msra.mxu0 %v3352_v32  ;;  %1329 = vmatpush.bf16.msrb.mxu1 %v3348_v27 }
 0x16a   :  { %1343 = vmatpush.bf16.msra.mxu2 %v3355_v35  ;;  %1357 = vmatpush.bf16.msra.mxu3 %v3350_v31 }
 0x16d   :  { %1316 = vmatpush.bf16.msra.mxu0 %v3371_v47  ;;  %1330 = vmatpush.bf16.msrb.mxu1 %v3367_v40 }
 0x16e   :  { %1344 = vmatpush.bf16.msra.mxu2 %v3374_v51  ;;  %1358 = vmatpush.bf16.msra.mxu3 %v3369_v46 }
 0x171   :  { %1317 = vmatpush.bf16.msra.mxu0 %v3388_v62  ;;  %1331 = vmatpush.bf16.msrb.mxu1 %v3386_v57 }
 0x172   :  { %1345 = vmatpush.bf16.msra.mxu2 %v3397_v8  ;;  %1359 = vmatpush.bf16.msra.mxu3 %v3390_v63 }
 0x175   :  { %1318 = vmatpush.bf16.msra.mxu0 %v3395_v7  ;;  %1332 = vmatpush.bf16.msrb.mxu1 %v3412_v20 }
 0x176   :  { %1346 = vmatpush.bf16.msra.mxu2 %v3417_v26  ;;  %1360 = vmatpush.bf16.msra.mxu3 %v3415_v25 }
 0x179   :  { %1319 = vmatpush.bf16.msra.mxu0 %v3401_v12  ;;  %1333 = vmatpush.bf16.msrb.mxu1 %v3439_v42 }
 0x17a   :  { %1347 = vmatpush.bf16.msra.mxu2 %v3427_v34  ;;  %1361 = vmatpush.bf16.msra.mxu3 %v3429_v37 }
 0x1d8   :  { %v909_v50 = vpop.f32.mrf.mxu0  ;;  %v923_v21 = vpop.f32.mrf.mxu1 }
 0x1d9   :  { %v956_v61 = vadd.f32 %v909_v50, %v892_v41  ;;  %v957_v55 = vadd.f32 %v923_v21, %v893_v33 }
 0x1db   :  { %v2710_v59 = vmul.f32 -1.442695, %v956_v61  ;;  %v2712_v52 = vmul.f32 -1.442695, %v957_v55 }
 0x1dd   :  { %2889 = vpow2.f32 %v2710_v59  ;;  %v899_v59 = vunpack.c.h.bf16 %v430_v30 }
 0x1de   :  { %2891 = vpow2.f32 %v2712_v52 }
 0x1df   :  { %v951_v16 = vpop.f32.mrf.mxu3  ;;  %v937_v55 = vpop.f32.mrf.mxu2 }
 0x1e0   :  { %v959_v38 = vadd.f32 %v951_v16, %v895_v15  ;;  %v911_v44 = vpop.f32.mrf.mxu0  ;;  %v925_v5 = vpop.f32.mrf.mxu1  ;;  %v958_v15 = vadd.f32 %v937_v55, %v894_v49 }
 0x1e1   :  { %v960_v60 = vadd.f32 %v911_v44, %v896_v1  ;;  %v961_v9 = vadd.f32 %v925_v5, %v897_v17 }
 0x1e2   :  { %v2714_v11 = vmul.f32 -1.442695, %v959_v38 }
 0x1e3   :  { %v2890_v13 = vpop.eup %2889  ;;  %v2711_v41 = vmul.f32 -1.442695, %v960_v60  ;;  %v2713_v21 = vmul.f32 -1.442695, %v961_v9 }
 0x1e4   :  { %v2892_v33 = vpop.eup %2891  ;;  %v970_v50 = vadd.f32 1.0, %v2890_v13  ;;  %2893 = vpow2.f32 %v2714_v11  ;;  %v898_v11 = vunpack.c.l.bf16 %v430_v30 }
 0x1e5   :  { %v1008_v61 = vadd.f32 1.0, %v2892_v33  ;;  %2895 = vpow2.f32 %v2711_v41 }
 0x1e6   :  { %2897 = vrcp.f32 %v970_v50  ;;  %v981_v33 = vand.u32 2147483647, %v970_v50  ;;  %vm977_vm11 = vweird.f32 %v970_v50 }
 0x1e7   :  { %2899 = vrcp.f32 %v1008_v61  ;;  %v953_v52 = vpop.f32.mrf.mxu3  ;;  %v939_v13 = vpop.f32.mrf.mxu2  ;;  %v1021_v55 = vand.u32 2147483648, %v1008_v61  ;;  %vm1015_vm12 = vweird.f32 %v1008_v61 }
 0x1e8   :  { %2901 = vpow2.f32 %v2713_v21  ;;  %v963_v29 = vadd.f32 %v953_v52, %v899_v59  ;;  %v983_v21 = vand.u32 2147483648, %v970_v50  ;;  %v1019_v52 = vand.u32 2147483647, %v1008_v61 }
 0x1e9   :  { %2903 = vtanh.f32 %v958_v15  ;;  %v962_v15 = vadd.f32 %v939_v13, %v898_v11  ;;  %vm982_vm15 = vcmp.eq.f32.partialorder %v981_v33, 8.507059e+37 }
 0x1ea   :  { %v2894_v23 = vpop.eup %2893  ;;  %v2715_v17 = vmul.f32 -1.442695, %v963_v29  ;;  %v984_v30 = vor.u32 1.1754944e-38, %v983_v21  ;;  %vm1020_vm0 = vcmp.eq.f32.partialorder %v1019_v52, 8.507059e+37 }
 0x1eb   :  { %v2896_v16 = vpop.eup %2895  ;;  %v3766_v45 = vadd.f32 1.0, %v2894_v23 }
 0x1ec   :  { %v2898_v56 = vpop.eup %2897  ;;  %v3768_v1 = vadd.f32 1.0, %v2896_v16 }
 0x1ed   :  { %v2900_v38 = vpop.eup %2899  ;;  %v973_v44 = vmul.f32 %v2898_v56, %v970_v50  ;;  %vm978_vm9 = vweird.f32 %v2898_v56 }
 0x1ee   :  { %v2902_v5 = vpop.eup %2901  ;;  %v1011_v60 = vmul.f32 %v2900_v38, %v1008_v61  ;;  %2905 = vrcp.f32 %v3768_v1  ;;  %vm1016_vm10 = vweird.f32 %v2900_v38  ;;  %vm979_vm13 = vmor %vm977_vm11, %vm978_vm9  ;;  %vm992_vm2 = vweird.f32 %v3768_v1 }
 0x1ef   :  { %v974_v53 = vsub.f32 1.0, %v973_v44  ;;  %2907 = vrcp.f32 %v3766_v45  ;;  %v3772_v9 = vadd.f32 1.0, %v2902_v5  ;;  %v2904_v29 = vpop.eup %2903  ;;  %vm1017_vm14 = vmor %vm1015_vm12, %vm1016_vm10  ;;  %vm1055_vm10 = vweird.f32 %v3766_v45 }
 0x1f0   :  { %v1012_v41 = vsub.f32 1.0, %v1011_v60  ;;  %2909 = vpow2.f32 %v2715_v17  ;;  %v1022_v17 = vor.u32 1.1754944e-38, %v1021_v55  ;;  %v996_v55 = vand.u32 2147483647, %v3768_v1 }
 0x1f1   :  { %v975_v49 = vmul.f32 %v2898_v56, %v974_v53  ;;  %2911 = vrcp.f32 %v3772_v9  ;;  %vm1030_vm6 = vweird.f32 %v3772_v9 }
 0x1f2   :  { %v1013_v59 = vmul.f32 %v2900_v38, %v1012_v41  ;;  %2913 = vtanh.f32 %v962_v15  ;;  %vm997_vm5 = vcmp.eq.f32.partialorder %v996_v55, 8.507059e+37  ;;  %v1061_v55 = vand.u32 2147483648, %v3766_v45 }
 0x1f3   :  { %v976_v23 = vadd.f32 %v2898_v56, %v975_v49 }
 0x1f4   :  { %v2906_v16 = vpop.eup %2905  ;;  %v1014_v44 = vadd.f32 %v2900_v38, %v1013_v59 }
 0x1f5   :  { %v3775_v5 = vpop.eup %2907  ;;  %v980_v60 = vsel %vm979_vm13, %v2898_v56, %v976_v23  ;;  %v988_v53 = vmul.f32 %v2906_v16, %v3768_v1  ;;  %v998_v56 = vand.u32 2147483648, %v3768_v1  ;;  %vm993_vm1 = vweird.f32 %v2906_v16 }
 0x1f6   :  { %v2910_v41 = vpop.eup %2909  ;;  %v985_v28 = vsel %vm982_vm15, %v984_v30, %v980_v60  ;;  %v1018_v36 = vsel %vm1017_vm14, %v2900_v38, %v1014_v44  ;;  %v1051_v33 = vmul.f32 %v3775_v5, %v3766_v45  ;;  %vm994_vm4 = vmor %vm992_vm2, %vm993_vm1  ;;  %v1034_v30 = vand.u32 2147483647, %v3772_v9 }
 0x1f7   :  { %v2912_v11 = vpop.eup %2911  ;;  %v1023_v50 = vsel %vm1020_vm0, %v1022_v17, %v1018_v36  ;;  %v1082_v13 = vmul.f32 %v2904_v29, %v985_v28  ;;  %v989_v61 = vsub.f32 1.0, %v988_v53  ;;  %v1049_v49 = vadd.f32 1.0, %v2910_v41 }
 0x1f8   :  { %v1080_v21 = vmul.f32 %v1023_v50, %v3702_v24  ;;  %v1026_v59 = vmul.f32 %v2912_v11, %v3772_v9  ;;  %v1036_v28 = vand.u32 2147483648, %v3772_v9  ;;  %v2914_v24 = vpop.eup %2913  ;;  %vm1031_vm3 = vweird.f32 %v2912_v11 }
 0x1f9   :  { %v990_v23 = vmul.f32 %v2906_v16, %v989_v61  ;;  %2915 = vrcp.f32 %v1049_v49  ;;  %v999_v29 = vor.u32 1.1754944e-38, %v998_v56  ;;  %v1052_v44 = vsub.f32 1.0, %v1051_v33  ;;  %vm1032_vm7 = vmor %vm1030_vm6, %vm1031_vm3 }
 0x1fa   :  { %v3784_v38 = vadd.f32 %v1082_v13, %v1080_v21  ;;  %v1027_v36 = vsub.f32 1.0, %v1026_v59  ;;  %v1037_v50 = vor.u32 1.1754944e-38, %v1036_v28  ;;  %vm1035_vm8 = vcmp.eq.f32.partialorder %v1034_v30, 8.507059e+37 }
 0x1fb   :  { %v991_v52 = vadd.f32 %v2906_v16, %v990_v23  ;;  %v1053_v21 = vmul.f32 %v3775_v5, %v1052_v44  ;;  %vm1056_vm9 = vweird.f32 %v3775_v5  ;;  %vm1070_vm12 = vweird.f32 %v1049_v49 }
 0x1fc   :  { %v1028_v15 = vmul.f32 %v2912_v11, %v1027_v36  ;;  %2917 = vtanh.f32 %v3784_v38  ;;  %v1076_v36 = vand.u32 2147483648, %v1049_v49  ;;  %vm1057_vm13 = vmor %vm1055_vm10, %vm1056_vm9  ;;  %v1074_v28 = vand.u32 2147483647, %v1049_v49 }
 0x1fd   :  { %v995_v17 = vsel %vm994_vm4, %v2906_v16, %v991_v52 }
 0x1fe   :  { %v1000_v60 = vsel %vm997_vm5, %v999_v29, %v995_v17  ;;  %v1029_v53 = vadd.f32 %v2912_v11, %v1028_v15  ;;  %v1062_v29 = vor.u32 1.1754944e-38, %v1061_v55  ;;  %v1077_v30 = vor.u32 1.1754944e-38, %v1076_v36  ;;  %v4334_v36 = vld [vmem:[#allocation16_spill] sm:$0xff] }
 0x1ff   :  { %v2916_v41 = vpop.eup %2915  ;;  %v1083_v1 = vmul.f32 %v2914_v24, %v1000_v60  ;;  %vm1075_vm0 = vcmp.eq.f32.partialorder %v1074_v28, 8.507059e+37  ;;  %v4335_v28 = vld [vmem:[#allocation6_spill] sm:$0xff] }
 0x200   :  { %v1033_v13 = vsel %vm1032_vm7, %v2912_v11, %v1029_v53  ;;  %v1066_v61 = vmul.f32 %v2916_v41, %v1049_v49  ;;  %v1054_v11 = vadd.f32 %v3775_v5, %v1053_v21  ;;  %vm1071_vm11 = vweird.f32 %v2916_v41  ;;  %v4332_v49 = vld [vmem:[#allocation21_spill] sm:$0xff] }
 0x201   :  { %v1038_v59 = vsel %vm1035_vm8, %v1037_v50, %v1033_v13  ;;  %vm1072_vm14 = vmor %vm1070_vm12, %vm1071_vm11 }
 0x202   :  { %v1081_v56 = vmul.f32 %v1038_v59, %v3707_v39  ;;  %v1067_v23 = vsub.f32 1.0, %v1066_v61  ;;  %v1059_v39 = vand.u32 2147483647, %v3766_v45  ;;  %v1058_v52 = vsel %vm1057_vm13, %v3775_v5, %v1054_v11  ;;  %v2918_v15 = vpop.eup %2917  ;;  %v4331_v45 = vld [vmem:[#allocation14_spill] sm:$0xff] }
 0x203   :  { %v249_v5 = vadd.f32 %v4331_v45, %v3502_v2 }
 0x204   :  { %v3793_v16 = vadd.f32 %v1083_v1, %v1081_v56  ;;  %v1068_v9 = vmul.f32 %v2916_v41, %v1067_v23  ;;  %vm1060_vm15 = vcmp.eq.f32.partialorder %v1059_v39, 8.507059e+37  ;;  %v4333_v1 = vld [vmem:[#allocation19_spill] sm:$0xff]  ;;  %v1101_v39 = vunpack.c.h.bf16 %v4334_v36 }
 0x205   :  { %v1063_v17 = vsel %vm1060_vm15, %v1062_v29, %v1058_v52  ;;  %v1098_v61 = vunpack.c.l.bf16 %v4333_v1  ;;  %v1099_v21 = vunpack.c.h.bf16 %v4333_v1  ;;  %v4336_v52 = vld [vmem:[#allocation17_spill] sm:$0xff]  ;;  %v4338_v29 = vld [vmem:[#allocation18_spill] sm:$0xff] }
 0x206   :  { %2919 = vtanh.f32 %v3793_v16  ;;  %v1069_v33 = vadd.f32 %v2916_v41, %v1068_v9  ;;  %v1088_v53 = vmul.f32 %v2918_v15, %v1063_v17  ;;  %v4337_v15 = vld [vmem:[#allocation7_spill] sm:$0xff] }
 0x208   :  { %v1073_v24 = vsel %vm1072_vm14, %v2916_v41, %v1069_v33  ;;  %v298_v41 = vadd.f32 %v4332_v49, %v3504_v3 }
 0x209   :  { %v1078_v60 = vsel %vm1075_vm0, %v1077_v30, %v1073_v24  ;;  %v347_v24 = vadd.f32 %v4336_v52, %v4335_v28  ;;  %v396_v30 = vadd.f32 %v4338_v29, %v4337_v15 }
 0x20a   :  { %v433_v11 = vpack.c.bf16 %v298_v41, %v249_v5 }
 0x20b   :  { %v434_v1 = vpack.c.bf16 %v396_v30, %v347_v24 }
 0x20c   :  { %v2920_v44 = vpop.eup %2919  ;;  %v1102_v17 = vunpack.c.l.bf16 %v433_v11 }
 0x20d   :  { %v1089_v50 = vmul.f32 %v2920_v44, %v1078_v60  ;;  %v1103_v60 = vunpack.c.h.bf16 %v433_v11  ;;  %v1100_v11 = vunpack.c.l.bf16 %v4334_v36 }
 0x20f   :  { %v1090_v13 = vpack.c.bf16 %v1089_v50, %v1088_v53 }
 0x211   :  { %1114 = vmatmul.bf16.vlgmr.msrb.gmra.mxu0 %v1090_v13  ;;  %1128 = vmatmul.bf16.vlgmr.msra.gmra.mxu1 %v1090_v13 }
 0x212   :  { %1142 = vmatmul.bf16.vlgmr.msrb.gmra.mxu2 %v1090_v13  ;;  %1156 = vmatmul.bf16.vlgmr.msrb.gmra.mxu3 %v1090_v13 }
 0x213   :  { %1518 = vmatpush.bf16.msrb.mxu0 %v3298_v54  ;;  %1532 = vmatpush.bf16.msra.mxu1 %v3315_v6 }
 0x214   :  { %1546 = vmatpush.bf16.msrb.mxu2 %v3283_v48  ;;  %1560 = vmatpush.bf16.msrb.mxu3 %v3275_v43 }
 0x217   :  { %1519 = vmatpush.bf16.msrb.mxu0 %v3309_v0  ;;  %1533 = vmatpush.bf16.msra.mxu1 %v3322_v10 }
 0x218   :  { %1547 = vmatpush.bf16.msrb.mxu2 %v3312_v4  ;;  %1561 = vmatpush.bf16.msrb.mxu3 %v3300_v58 }
 0x21b   :  { %1520 = vmatpush.bf16.msrb.mxu0 %v3333_v19  ;;  %1534 = vmatpush.bf16.msra.mxu1 %v3329_v14 }
 0x21c   :  { %1548 = vmatpush.bf16.msrb.mxu2 %v3335_v22  ;;  %1562 = vmatpush.bf16.msrb.mxu3 %v3331_v18 }
 0x21f   :  { %1521 = vmatpush.bf16.msrb.mxu0 %v3352_v32  ;;  %1535 = vmatpush.bf16.msra.mxu1 %v3348_v27 }
 0x220   :  { %1549 = vmatpush.bf16.msrb.mxu2 %v3355_v35  ;;  %1563 = vmatpush.bf16.msrb.mxu3 %v3350_v31 }
 0x223   :  { %1522 = vmatpush.bf16.msrb.mxu0 %v3371_v47  ;;  %1536 = vmatpush.bf16.msra.mxu1 %v3367_v40 }
 0x224   :  { %1550 = vmatpush.bf16.msrb.mxu2 %v3374_v51  ;;  %1564 = vmatpush.bf16.msrb.mxu3 %v3369_v46 }
 0x227   :  { %1523 = vmatpush.bf16.msrb.mxu0 %v3388_v62  ;;  %1537 = vmatpush.bf16.msra.mxu1 %v3386_v57 }
 0x228   :  { %1551 = vmatpush.bf16.msrb.mxu2 %v3397_v8  ;;  %1565 = vmatpush.bf16.msrb.mxu3 %v3390_v63 }
 0x22b   :  { %1524 = vmatpush.bf16.msrb.mxu0 %v3395_v7  ;;  %1538 = vmatpush.bf16.msra.mxu1 %v3412_v20 }
 0x22c   :  { %1552 = vmatpush.bf16.msrb.mxu2 %v3417_v26  ;;  %1566 = vmatpush.bf16.msrb.mxu3 %v3415_v25 }
 0x22f   :  { %1525 = vmatpush.bf16.msrb.mxu0 %v3401_v12  ;;  %1539 = vmatpush.bf16.msra.mxu1 %v3439_v42 }
 0x230   :  { %1553 = vmatpush.bf16.msrb.mxu2 %v3427_v34  ;;  %1567 = vmatpush.bf16.msrb.mxu3 %v3429_v37 }
 0x28e   :  { %v1115_v59 = vpop.f32.mrf.mxu0  ;;  %v1129_v56 = vpop.f32.mrf.mxu1 }
 0x28f   :  { %v1162_v23 = vadd.f32 %v1115_v59, %v1098_v61  ;;  %v1163_v9 = vadd.f32 %v1129_v56, %v1099_v21 }
 0x291   :  { %v2716_v55 = vmul.f32 -1.442695, %v1162_v23  ;;  %v2718_v33 = vmul.f32 -1.442695, %v1163_v9 }
 0x293   :  { %2921 = vpow2.f32 %v2716_v55  ;;  %v1105_v55 = vunpack.c.h.bf16 %v434_v1 }
 0x294   :  { %2923 = vpow2.f32 %v2718_v33 }
 0x295   :  { %v1157_v44 = vpop.f32.mrf.mxu3  ;;  %v1143_v9 = vpop.f32.mrf.mxu2 }
 0x296   :  { %v1165_v53 = vadd.f32 %v1157_v44, %v1101_v39  ;;  %v1117_v50 = vpop.f32.mrf.mxu0  ;;  %v1131_v13 = vpop.f32.mrf.mxu1  ;;  %v1164_v39 = vadd.f32 %v1143_v9, %v1100_v11 }
 0x297   :  { %v1166_v45 = vadd.f32 %v1117_v50, %v1102_v17  ;;  %v1167_v5 = vadd.f32 %v1131_v13, %v1103_v60 }
 0x298   :  { %v2720_v49 = vmul.f32 -1.442695, %v1165_v53 }
 0x299   :  { %v2922_v41 = vpop.eup %2921  ;;  %v2717_v61 = vmul.f32 -1.442695, %v1166_v45  ;;  %v2719_v56 = vmul.f32 -1.442695, %v1167_v5 }
 0x29a   :  { %v2924_v21 = vpop.eup %2923  ;;  %v1176_v59 = vadd.f32 1.0, %v2922_v41  ;;  %2925 = vpow2.f32 %v2720_v49  ;;  %v1104_v49 = vunpack.c.l.bf16 %v434_v1 }
 0x29b   :  { %v1214_v23 = vadd.f32 1.0, %v2924_v21  ;;  %2927 = vpow2.f32 %v2717_v61 }
 0x29c   :  { %2929 = vrcp.f32 %v1176_v59  ;;  %v1187_v21 = vand.u32 2147483647, %v1176_v59  ;;  %vm1183_vm3 = vweird.f32 %v1176_v59 }
 0x29d   :  { %2931 = vrcp.f32 %v1214_v23  ;;  %v1159_v33 = vpop.f32.mrf.mxu3  ;;  %v1145_v41 = vpop.f32.mrf.mxu2  ;;  %v1227_v9 = vand.u32 2147483648, %v1214_v23  ;;  %vm1221_vm4 = vweird.f32 %v1214_v23 }
 0x29e   :  { %2933 = vpow2.f32 %v2719_v56  ;;  %v1169_v52 = vadd.f32 %v1159_v33, %v1105_v55  ;;  %v1189_v56 = vand.u32 2147483648, %v1176_v59  ;;  %v1225_v33 = vand.u32 2147483647, %v1214_v23 }
 0x29f   :  { %2935 = vtanh.f32 %v1164_v39  ;;  %v1168_v39 = vadd.f32 %v1145_v41, %v1104_v49  ;;  %vm1188_vm7 = vcmp.eq.f32.partialorder %v1187_v21, 8.507059e+37 }
 0x2a0   :  { %v2926_v29 = vpop.eup %2925  ;;  %v2721_v60 = vmul.f32 -1.442695, %v1169_v52  ;;  %v1190_v1 = vor.u32 1.1754944e-38, %v1189_v56  ;;  %vm1226_vm8 = vcmp.eq.f32.partialorder %v1225_v33, 8.507059e+37 }
 0x2a1   :  { %v2928_v44 = vpop.eup %2927  ;;  %v3846_v24 = vadd.f32 1.0, %v2926_v29 }
 0x2a2   :  { %v2930_v30 = vpop.eup %2929  ;;  %v3848_v17 = vadd.f32 1.0, %v2928_v44 }
 0x2a3   :  { %v2932_v53 = vpop.eup %2931  ;;  %v1179_v50 = vmul.f32 %v2930_v30, %v1176_v59  ;;  %vm1184_vm1 = vweird.f32 %v2930_v30 }
 0x2a4   :  { %v2934_v13 = vpop.eup %2933  ;;  %v1217_v45 = vmul.f32 %v2932_v53, %v1214_v23  ;;  %2937 = vrcp.f32 %v3848_v17  ;;  %vm1222_vm2 = vweird.f32 %v2932_v53  ;;  %vm1185_vm5 = vmor %vm1183_vm3, %vm1184_vm1  ;;  %vm1198_vm10 = vweird.f32 %v3848_v17 }
 0x2a5   :  { %v1180_v36 = vsub.f32 1.0, %v1179_v50  ;;  %2939 = vrcp.f32 %v3846_v24  ;;  %v3852_v5 = vadd.f32 1.0, %v2934_v13  ;;  %v2936_v52 = vpop.eup %2935  ;;  %vm1223_vm6 = vmor %vm1221_vm4, %vm1222_vm2  ;;  %vm1261_vm2 = vweird.f32 %v3846_v24 }
 0x2a6   :  { %v1218_v61 = vsub.f32 1.0, %v1217_v45  ;;  %2941 = vpow2.f32 %v2721_v60  ;;  %v1228_v60 = vor.u32 1.1754944e-38, %v1227_v9  ;;  %v1202_v9 = vand.u32 2147483647, %v3848_v17 }
 0x2a7   :  { %v1181_v11 = vmul.f32 %v2930_v30, %v1180_v36  ;;  %2943 = vrcp.f32 %v3852_v5  ;;  %vm1236_vm14 = vweird.f32 %v3852_v5 }
 0x2a8   :  { %v1219_v55 = vmul.f32 %v2932_v53, %v1218_v61  ;;  %2945 = vtanh.f32 %v1168_v39  ;;  %vm1203_vm13 = vcmp.eq.f32.partialorder %v1202_v9, 8.507059e+37  ;;  %v1267_v9 = vand.u32 2147483648, %v3846_v24 }
 0x2a9   :  { %v1182_v29 = vadd.f32 %v2930_v30, %v1181_v11 }
 0x2aa   :  { %v2938_v44 = vpop.eup %2937  ;;  %v1220_v50 = vadd.f32 %v2932_v53, %v1219_v55 }
 0x2ab   :  { %v3855_v13 = vpop.eup %2939  ;;  %v1186_v45 = vsel %vm1185_vm5, %v2930_v30, %v1182_v29  ;;  %v1194_v36 = vmul.f32 %v2938_v44, %v3848_v17  ;;  %v1204_v30 = vand.u32 2147483648, %v3848_v17  ;;  %vm1199_vm9 = vweird.f32 %v2938_v44 }
 0x2ac   :  { %v2942_v61 = vpop.eup %2941  ;;  %v1191_v15 = vsel %vm1188_vm7, %v1190_v1, %v1186_v45  ;;  %v1224_v28 = vsel %vm1223_vm6, %v2932_v53, %v1220_v50  ;;  %v1257_v21 = vmul.f32 %v3855_v13, %v3846_v24  ;;  %vm1200_vm12 = vmor %vm1198_vm10, %vm1199_vm9  ;;  %v1240_v1 = vand.u32 2147483647, %v3852_v5 }
 0x2ad   :  { %v2944_v49 = vpop.eup %2943  ;;  %v1229_v59 = vsel %vm1226_vm8, %v1228_v60, %v1224_v28  ;;  %v1288_v41 = vmul.f32 %v2936_v52, %v1191_v15  ;;  %v1195_v23 = vsub.f32 1.0, %v1194_v36  ;;  %v1255_v11 = vadd.f32 1.0, %v2942_v61 }
 0x2ae   :  { %v1286_v56 = vmul.f32 %v1229_v59, %v3784_v38  ;;  %v1232_v55 = vmul.f32 %v2944_v49, %v3852_v5  ;;  %v1242_v15 = vand.u32 2147483648, %v3852_v5  ;;  %v2946_v38 = vpop.eup %2945  ;;  %vm1237_vm11 = vweird.f32 %v2944_v49 }
 0x2af   :  { %v1196_v29 = vmul.f32 %v2938_v44, %v1195_v23  ;;  %2947 = vrcp.f32 %v1255_v11  ;;  %v1205_v52 = vor.u32 1.1754944e-38, %v1204_v30  ;;  %v1258_v50 = vsub.f32 1.0, %v1257_v21  ;;  %vm1238_vm15 = vmor %vm1236_vm14, %vm1237_vm11 }
 0x2b0   :  { %v3864_v53 = vadd.f32 %v1288_v41, %v1286_v56  ;;  %v1233_v28 = vsub.f32 1.0, %v1232_v55  ;;  %v1243_v59 = vor.u32 1.1754944e-38, %v1242_v15  ;;  %vm1241_vm0 = vcmp.eq.f32.partialorder %v1240_v1, 8.507059e+37 }
 0x2b1   :  { %v1197_v33 = vadd.f32 %v2938_v44, %v1196_v29  ;;  %v1259_v56 = vmul.f32 %v3855_v13, %v1258_v50  ;;  %vm1262_vm1 = vweird.f32 %v3855_v13  ;;  %vm1276_vm4 = vweird.f32 %v1255_v11 }
 0x2b2   :  { %v1234_v39 = vmul.f32 %v2944_v49, %v1233_v28  ;;  %2949 = vtanh.f32 %v3864_v53  ;;  %v1282_v28 = vand.u32 2147483648, %v1255_v11  ;;  %vm1263_vm5 = vmor %vm1261_vm2, %vm1262_vm1  ;;  %v1280_v15 = vand.u32 2147483647, %v1255_v11 }
 0x2b3   :  { %v1201_v60 = vsel %vm1200_vm12, %v2938_v44, %v1197_v33 }
 0x2b4   :  { %v1206_v45 = vsel %vm1203_vm13, %v1205_v52, %v1201_v60  ;;  %v1235_v36 = vadd.f32 %v2944_v49, %v1234_v39  ;;  %v1268_v52 = vor.u32 1.1754944e-38, %v1267_v9  ;;  %v1283_v1 = vor.u32 1.1754944e-38, %v1282_v28  ;;  %v4342_v28 = vld [vmem:[#allocation22_spill] sm:$0xff] }
 0x2b5   :  { %v2948_v61 = vpop.eup %2947  ;;  %v1289_v17 = vmul.f32 %v2946_v38, %v1206_v45  ;;  %vm1281_vm8 = vcmp.eq.f32.partialorder %v1280_v15, 8.507059e+37  ;;  %v4343_v15 = vld [vmem:[#allocation6_spill] sm:$0xff] }
 0x2b6   :  { %v1239_v41 = vsel %vm1238_vm15, %v2944_v49, %v1235_v36  ;;  %v1272_v23 = vmul.f32 %v2948_v61, %v1255_v11  ;;  %v1260_v49 = vadd.f32 %v3855_v13, %v1259_v56  ;;  %vm1277_vm3 = vweird.f32 %v2948_v61  ;;  %v4340_v11 = vld [vmem:[#allocation26_spill] sm:$0xff] }
 0x2b7   :  { %v1244_v55 = vsel %vm1241_vm0, %v1243_v59, %v1239_v41  ;;  %vm1278_vm6 = vmor %vm1276_vm4, %vm1277_vm3 }
 0x2b8   :  { %v1287_v30 = vmul.f32 %v1244_v55, %v3793_v16  ;;  %v1273_v29 = vsub.f32 1.0, %v1272_v23  ;;  %v1265_v16 = vand.u32 2147483647, %v3846_v24  ;;  %v1264_v33 = vsel %vm1263_vm5, %v3855_v13, %v1260_v49  ;;  %v2950_v39 = vpop.eup %2949  ;;  %v4339_v24 = vld [vmem:[#allocation20_spill] sm:$0xff] }
 0x2b9   :  { %v254_v13 = vadd.f32 %v4339_v24, %v3502_v2 }
 0x2ba   :  { %v3873_v44 = vadd.f32 %v1289_v17, %v1287_v30  ;;  %v1274_v5 = vmul.f32 %v2948_v61, %v1273_v29  ;;  %vm1266_vm7 = vcmp.eq.f32.partialorder %v1265_v16, 8.507059e+37  ;;  %v4341_v17 = vld [vmem:[#allocation25_spill] sm:$0xff]  ;;  %v1307_v16 = vunpack.c.h.bf16 %v4342_v28 }
 0x2bb   :  { %v1269_v60 = vsel %vm1266_vm7, %v1268_v52, %v1264_v33  ;;  %v1304_v23 = vunpack.c.l.bf16 %v4341_v17  ;;  %v1305_v56 = vunpack.c.h.bf16 %v4341_v17  ;;  %v4344_v33 = vld [vmem:[#allocation23_spill] sm:$0xff]  ;;  %v4346_v52 = vld [vmem:[#allocation24_spill] sm:$0xff] }
 0x2bc   :  { %2951 = vtanh.f32 %v3873_v44  ;;  %v1275_v21 = vadd.f32 %v2948_v61, %v1274_v5  ;;  %v1294_v36 = vmul.f32 %v2950_v39, %v1269_v60  ;;  %v4345_v39 = vld [vmem:[#allocation7_spill] sm:$0xff] }
 0x2be   :  { %v1279_v38 = vsel %vm1278_vm6, %v2948_v61, %v1275_v21  ;;  %v303_v61 = vadd.f32 %v4340_v11, %v3504_v3 }
 0x2bf   :  { %v1284_v45 = vsel %vm1281_vm8, %v1283_v1, %v1279_v38  ;;  %v352_v38 = vadd.f32 %v4344_v33, %v4343_v15  ;;  %v401_v1 = vadd.f32 %v4346_v52, %v4345_v39 }
 0x2c0   :  { %v437_v49 = vpack.c.bf16 %v303_v61, %v254_v13 }
 0x2c1   :  { %v438_v17 = vpack.c.bf16 %v401_v1, %v352_v38 }
 0x2c2   :  { %v2952_v50 = vpop.eup %2951  ;;  %v1308_v60 = vunpack.c.l.bf16 %v437_v49 }
 0x2c3   :  { %v1295_v59 = vmul.f32 %v2952_v50, %v1284_v45  ;;  %v1309_v45 = vunpack.c.h.bf16 %v437_v49  ;;  %v1306_v49 = vunpack.c.l.bf16 %v4342_v28 }
 0x2c5   :  { %v1296_v41 = vpack.c.bf16 %v1295_v59, %v1294_v36 }
 0x2c7   :  { %1320 = vmatmul.bf16.vlgmr.msra.gmra.mxu0 %v1296_v41  ;;  %1334 = vmatmul.bf16.vlgmr.msrb.gmra.mxu1 %v1296_v41 }
 0x2c8   :  { %1348 = vmatmul.bf16.vlgmr.msra.gmra.mxu2 %v1296_v41  ;;  %1362 = vmatmul.bf16.vlgmr.msra.gmra.mxu3 %v1296_v41 }
 0x2c9   :  { %1724 = vmatpush.bf16.msra.mxu0 %v3298_v54  ;;  %1738 = vmatpush.bf16.msrb.mxu1 %v3315_v6 }
 0x2ca   :  { %1752 = vmatpush.bf16.msra.mxu2 %v3283_v48  ;;  %1766 = vmatpush.bf16.msra.mxu3 %v3275_v43 }
 0x2cd   :  { %1725 = vmatpush.bf16.msra.mxu0 %v3309_v0  ;;  %1739 = vmatpush.bf16.msrb.mxu1 %v3322_v10 }
 0x2ce   :  { %1753 = vmatpush.bf16.msra.mxu2 %v3312_v4  ;;  %1767 = vmatpush.bf16.msra.mxu3 %v3300_v58 }
 0x2d1   :  { %1726 = vmatpush.bf16.msra.mxu0 %v3333_v19  ;;  %1740 = vmatpush.bf16.msrb.mxu1 %v3329_v14 }
 0x2d2   :  { %1754 = vmatpush.bf16.msra.mxu2 %v3335_v22  ;;  %1768 = vmatpush.bf16.msra.mxu3 %v3331_v18 }
 0x2d5   :  { %1727 = vmatpush.bf16.msra.mxu0 %v3352_v32  ;;  %1741 = vmatpush.bf16.msrb.mxu1 %v3348_v27 }
 0x2d6   :  { %1755 = vmatpush.bf16.msra.mxu2 %v3355_v35  ;;  %1769 = vmatpush.bf16.msra.mxu3 %v3350_v31 }
 0x2d9   :  { %1728 = vmatpush.bf16.msra.mxu0 %v3371_v47  ;;  %1742 = vmatpush.bf16.msrb.mxu1 %v3367_v40 }
 0x2da   :  { %1756 = vmatpush.bf16.msra.mxu2 %v3374_v51  ;;  %1770 = vmatpush.bf16.msra.mxu3 %v3369_v46 }
 0x2dd   :  { %1729 = vmatpush.bf16.msra.mxu0 %v3388_v62  ;;  %1743 = vmatpush.bf16.msrb.mxu1 %v3386_v57 }
 0x2de   :  { %1757 = vmatpush.bf16.msra.mxu2 %v3397_v8  ;;  %1771 = vmatpush.bf16.msra.mxu3 %v3390_v63 }
 0x2e1   :  { %1730 = vmatpush.bf16.msra.mxu0 %v3395_v7  ;;  %1744 = vmatpush.bf16.msrb.mxu1 %v3412_v20 }
 0x2e2   :  { %1758 = vmatpush.bf16.msra.mxu2 %v3417_v26  ;;  %1772 = vmatpush.bf16.msra.mxu3 %v3415_v25 }
 0x2e5   :  { %1731 = vmatpush.bf16.msra.mxu0 %v3401_v12  ;;  %1745 = vmatpush.bf16.msrb.mxu1 %v3439_v42 }
 0x2e6   :  { %1759 = vmatpush.bf16.msra.mxu2 %v3427_v34  ;;  %1773 = vmatpush.bf16.msra.mxu3 %v3429_v37 }
 0x344   :  { %v1321_v55 = vpop.f32.mrf.mxu0  ;;  %v1335_v30 = vpop.f32.mrf.mxu1 }
 0x345   :  { %v1368_v29 = vadd.f32 %v1321_v55, %v1304_v23  ;;  %v1369_v5 = vadd.f32 %v1335_v30, %v1305_v56 }
 0x347   :  { %v2722_v9 = vmul.f32 -1.442695, %v1368_v29  ;;  %v2724_v21 = vmul.f32 -1.442695, %v1369_v5 }
 0x349   :  { %2953 = vpow2.f32 %v2722_v9  ;;  %v1311_v9 = vunpack.c.h.bf16 %v438_v17 }
 0x34a   :  { %2955 = vpow2.f32 %v2724_v21 }
 0x34b   :  { %v1363_v50 = vpop.f32.mrf.mxu3  ;;  %v1349_v5 = vpop.f32.mrf.mxu2 }
 0x34c   :  { %v1371_v36 = vadd.f32 %v1363_v50, %v1307_v16  ;;  %v1323_v59 = vpop.f32.mrf.mxu0  ;;  %v1337_v41 = vpop.f32.mrf.mxu1  ;;  %v1370_v16 = vadd.f32 %v1349_v5, %v1306_v49 }
 0x34d   :  { %v1372_v24 = vadd.f32 %v1323_v59, %v1308_v60  ;;  %v1373_v13 = vadd.f32 %v1337_v41, %v1309_v45 }
 0x34e   :  { %v2726_v11 = vmul.f32 -1.442695, %v1371_v36 }
 0x34f   :  { %v2954_v61 = vpop.eup %2953  ;;  %v2723_v23 = vmul.f32 -1.442695, %v1372_v24  ;;  %v2725_v30 = vmul.f32 -1.442695, %v1373_v13  ;;  %v1310_v24 = vunpack.c.l.bf16 %v438_v17 }
 0x350   :  { %v2956_v56 = vpop.eup %2955  ;;  %v1382_v55 = vadd.f32 1.0, %v2954_v61  ;;  %2957 = vpow2.f32 %v2726_v11 }
 0x351   :  { %v1420_v29 = vadd.f32 1.0, %v2956_v56  ;;  %2959 = vpow2.f32 %v2723_v23 }
 0x352   :  { %2961 = vrcp.f32 %v1382_v55  ;;  %v1393_v61 = vand.u32 2147483647, %v1382_v55  ;;  %v1395_v23 = vand.u32 2147483648, %v1382_v55  ;;  %vm1389_vm11 = vweird.f32 %v1382_v55 }
 0x353   :  { %2963 = vrcp.f32 %v1420_v29  ;;  %v1365_v21 = vpop.f32.mrf.mxu3  ;;  %v1351_v13 = vpop.f32.mrf.mxu2  ;;  %v1433_v56 = vand.u32 2147483648, %v1420_v29  ;;  %v1431_v49 = vand.u32 2147483647, %v1420_v29  ;;  %vm1427_vm12 = vweird.f32 %v1420_v29 }
 0x354   :  { %2965 = vpow2.f32 %v2725_v30  ;;  %v1375_v15 = vadd.f32 %v1365_v21, %v1311_v9  ;;  %v1374_v9 = vadd.f32 %v1351_v13, %v1310_v24  ;;  %v1396_v17 = vor.u32 1.1754944e-38, %v1395_v23 }
 0x355   :  { %2967 = vtanh.f32 %v1370_v16  ;;  %vm1394_vm15 = vcmp.eq.f32.partialorder %v1393_v61, 8.507059e+37  ;;  %vm1432_vm0 = vcmp.eq.f32.partialorder %v1431_v49, 8.507059e+37 }
 0x356   :  { %v2958_v33 = vpop.eup %2957  ;;  %v2727_v50 = vmul.f32 -1.442695, %v1375_v15 }
 0x357   :  { %v2960_v39 = vpop.eup %2959  ;;  %v3926_v38 = vadd.f32 1.0, %v2958_v33 }
 0x358   :  { %v2962_v52 = vpop.eup %2961  ;;  %v3928_v1 = vadd.f32 1.0, %v2960_v39 }
 0x359   :  { %v2964_v60 = vpop.eup %2963  ;;  %v1385_v45 = vmul.f32 %v2962_v52, %v1382_v55  ;;  %vm1390_vm9 = vweird.f32 %v2962_v52 }
 0x35a   :  { %v2966_v36 = vpop.eup %2965  ;;  %v1423_v59 = vmul.f32 %v2964_v60, %v1420_v29  ;;  %2969 = vrcp.f32 %v3928_v1  ;;  %vm1428_vm10 = vweird.f32 %v2964_v60  ;;  %vm1391_vm13 = vmor %vm1389_vm11, %vm1390_vm9  ;;  %vm1404_vm2 = vweird.f32 %v3928_v1 }
 0x35b   :  { %v1386_v28 = vsub.f32 1.0, %v1385_v45  ;;  %2971 = vrcp.f32 %v3926_v38  ;;  %v3932_v41 = vadd.f32 1.0, %v2966_v36  ;;  %v2968_v21 = vpop.eup %2967  ;;  %vm1429_vm14 = vmor %vm1427_vm12, %vm1428_vm10  ;;  %vm1467_vm10 = vweird.f32 %v3926_v38 }
 0x35c   :  { %v1424_v11 = vsub.f32 1.0, %v1423_v59  ;;  %2973 = vpow2.f32 %v2727_v50  ;;  %v1434_v50 = vor.u32 1.1754944e-38, %v1433_v56  ;;  %v1408_v56 = vand.u32 2147483647, %v3928_v1 }
 0x35d   :  { %v1387_v30 = vmul.f32 %v2962_v52, %v1386_v28  ;;  %2975 = vrcp.f32 %v3932_v41  ;;  %vm1442_vm6 = vweird.f32 %v3932_v41 }
 0x35e   :  { %v1425_v5 = vmul.f32 %v2964_v60, %v1424_v11  ;;  %2977 = vtanh.f32 %v1374_v9  ;;  %v1448_v9 = vand.u32 2147483648, %v3932_v41  ;;  %vm1409_vm5 = vcmp.eq.f32.partialorder %v1408_v56, 8.507059e+37 }
 0x35f   :  { %v1388_v16 = vadd.f32 %v2962_v52, %v1387_v30  ;;  %v1473_v56 = vand.u32 2147483648, %v3926_v38 }
 0x360   :  { %v2970_v15 = vpop.eup %2969  ;;  %v1426_v33 = vadd.f32 %v2964_v60, %v1425_v5 }
 0x361   :  { %v3935_v39 = vpop.eup %2971  ;;  %v1392_v45 = vsel %vm1391_vm13, %v2962_v52, %v1388_v16  ;;  %v1400_v36 = vmul.f32 %v2970_v15, %v3928_v1  ;;  %v1410_v52 = vand.u32 2147483648, %v3928_v1  ;;  %vm1405_vm1 = vweird.f32 %v2970_v15 }
 0x362   :  { %v2974_v59 = vpop.eup %2973  ;;  %v1397_v28 = vsel %vm1394_vm15, %v1396_v17, %v1392_v45  ;;  %v1430_v11 = vsel %vm1429_vm14, %v2964_v60, %v1426_v33  ;;  %v1463_v61 = vmul.f32 %v3935_v39, %v3926_v38  ;;  %vm1406_vm4 = vmor %vm1404_vm2, %vm1405_vm1  ;;  %vm1468_vm9 = vweird.f32 %v3935_v39 }
 0x363   :  { %v2976_v24 = vpop.eup %2975  ;;  %v1435_v55 = vsel %vm1432_vm0, %v1434_v50, %v1430_v11  ;;  %v1494_v13 = vmul.f32 %v2968_v21, %v1397_v28  ;;  %v1401_v29 = vsub.f32 1.0, %v1400_v36  ;;  %v1461_v30 = vadd.f32 1.0, %v2974_v59  ;;  %vm1469_vm13 = vmor %vm1467_vm10, %vm1468_vm9 }
 0x364   :  { %v1492_v23 = vmul.f32 %v1435_v55, %v3864_v53  ;;  %v1438_v5 = vmul.f32 %v2976_v24, %v3932_v41  ;;  %v2978_v53 = vpop.eup %2977  ;;  %vm1443_vm3 = vweird.f32 %v2976_v24  ;;  %v1411_v33 = vor.u32 1.1754944e-38, %v1410_v52 }
 0x365   :  { %v1402_v16 = vmul.f32 %v2970_v15, %v1401_v29  ;;  %2979 = vrcp.f32 %v1461_v30  ;;  %v1446_v50 = vand.u32 2147483647, %v3932_v41  ;;  %v1464_v45 = vsub.f32 1.0, %v1463_v61  ;;  %vm1444_vm7 = vmor %vm1442_vm6, %vm1443_vm3 }
 0x366   :  { %v3944_v60 = vadd.f32 %v1494_v13, %v1492_v23  ;;  %v1439_v49 = vsub.f32 1.0, %v1438_v5  ;;  %v1449_v55 = vor.u32 1.1754944e-38, %v1448_v9  ;;  %vm1482_vm12 = vweird.f32 %v1461_v30 }
 0x367   :  { %v1403_v21 = vadd.f32 %v2970_v15, %v1402_v16  ;;  %vm1447_vm8 = vcmp.eq.f32.partialorder %v1446_v50, 8.507059e+37  ;;  %v1465_v23 = vmul.f32 %v3935_v39, %v1464_v45  ;;  %v1486_v9 = vand.u32 2147483647, %v1461_v30 }
 0x368   :  { %v1440_v17 = vmul.f32 %v2976_v24, %v1439_v49  ;;  %2981 = vtanh.f32 %v3944_v60  ;;  %v1488_v49 = vand.u32 2147483648, %v1461_v30 }
 0x369   :  { %v1407_v36 = vsel %vm1406_vm4, %v2970_v15, %v1403_v21  ;;  %vm1487_vm0 = vcmp.eq.f32.partialorder %v1486_v9, 8.507059e+37 }
 0x36a   :  { %v1412_v59 = vsel %vm1409_vm5, %v1411_v33, %v1407_v36  ;;  %v1441_v28 = vadd.f32 %v2976_v24, %v1440_v17  ;;  %v1474_v33 = vor.u32 1.1754944e-38, %v1473_v56  ;;  %v1489_v50 = vor.u32 1.1754944e-38, %v1488_v49  ;;  %v4349_v56 = vld [vmem:[#allocation31_spill] sm:$0xff] }
 0x36b   :  { %v2980_v11 = vpop.eup %2979  ;;  %v1495_v1 = vmul.f32 %v2978_v53, %v1412_v59  ;;  %v1515_v49 = vunpack.c.h.bf16 %v4349_v56 }
 0x36c   :  { %v1445_v13 = vsel %vm1444_vm7, %v2976_v24, %v1441_v28  ;;  %v1478_v29 = vmul.f32 %v2980_v11, %v1461_v30  ;;  %v1466_v24 = vadd.f32 %v3935_v39, %v1465_v23  ;;  %vm1483_vm11 = vweird.f32 %v2980_v11 }
 0x36d   :  { %v1450_v5 = vsel %vm1447_vm8, %v1449_v55, %v1445_v13  ;;  %vm1484_vm14 = vmor %vm1482_vm12, %vm1483_vm11 }
 0x36e   :  { %v1493_v52 = vmul.f32 %v1450_v5, %v3873_v44  ;;  %v1479_v16 = vsub.f32 1.0, %v1478_v29  ;;  %v1471_v44 = vand.u32 2147483647, %v3926_v38  ;;  %v1470_v21 = vsel %vm1469_vm13, %v3935_v39, %v1466_v24  ;;  %v2982_v17 = vpop.eup %2981  ;;  %v4347_v38 = vld [vmem:[#allocation29_spill] sm:$0xff] }
 0x36f   :  { %v1510_v39 = vunpack.c.l.bf16 %v4347_v38  ;;  %v1511_v30 = vunpack.c.h.bf16 %v4347_v38 }
 0x370   :  { %v3953_v15 = vadd.f32 %v1495_v1, %v1493_v52  ;;  %v1480_v41 = vmul.f32 %v2980_v11, %v1479_v16  ;;  %vm1472_vm15 = vcmp.eq.f32.partialorder %v1471_v44, 8.507059e+37  ;;  %v4348_v16 = vld [vmem:[#allocation27_spill] sm:$0xff] }
 0x371   :  { %v1475_v36 = vsel %vm1472_vm15, %v1474_v33, %v1470_v21  ;;  %v1512_v38 = vunpack.c.l.bf16 %v4348_v16 }
 0x372   :  { %2983 = vtanh.f32 %v3953_v15  ;;  %v1481_v61 = vadd.f32 %v2980_v11, %v1480_v41  ;;  %v1500_v28 = vmul.f32 %v2982_v17, %v1475_v36  ;;  %v1513_v41 = vunpack.c.h.bf16 %v4348_v16 }
 0x374   :  { %v1485_v53 = vsel %vm1484_vm14, %v2980_v11, %v1481_v61  ;;  %v1514_v61 = vunpack.c.l.bf16 %v4349_v56 }
 0x375   :  { %v1490_v59 = vsel %vm1487_vm0, %v1489_v50, %v1485_v53 }
 0x378   :  { %v2984_v45 = vpop.eup %2983 }
 0x379   :  { %v1501_v55 = vmul.f32 %v2984_v45, %v1490_v59 }
 0x37b   :  { %v1502_v13 = vpack.c.bf16 %v1501_v55, %v1500_v28 }
 0x37d   :  { %1526 = vmatmul.bf16.vlgmr.msrb.gmra.mxu0 %v1502_v13  ;;  %1540 = vmatmul.bf16.vlgmr.msra.gmra.mxu1 %v1502_v13 }
 0x37e   :  { %1554 = vmatmul.bf16.vlgmr.msrb.gmra.mxu2 %v1502_v13  ;;  %1568 = vmatmul.bf16.vlgmr.msrb.gmra.mxu3 %v1502_v13 }
 0x37f   :  { %1930 = vmatpush.bf16.msrb.mxu0 %v3298_v54  ;;  %1944 = vmatpush.bf16.msra.mxu1 %v3315_v6 }
 0x380   :  { %1958 = vmatpush.bf16.msrb.mxu2 %v3283_v48  ;;  %1972 = vmatpush.bf16.msrb.mxu3 %v3275_v43 }
 0x383   :  { %1931 = vmatpush.bf16.msrb.mxu0 %v3309_v0  ;;  %1945 = vmatpush.bf16.msra.mxu1 %v3322_v10 }
 0x384   :  { %1959 = vmatpush.bf16.msrb.mxu2 %v3312_v4  ;;  %1973 = vmatpush.bf16.msrb.mxu3 %v3300_v58 }
 0x387   :  { %1932 = vmatpush.bf16.msrb.mxu0 %v3333_v19  ;;  %1946 = vmatpush.bf16.msra.mxu1 %v3329_v14 }
 0x388   :  { %1960 = vmatpush.bf16.msrb.mxu2 %v3335_v22  ;;  %1974 = vmatpush.bf16.msrb.mxu3 %v3331_v18 }
 0x38b   :  { %1933 = vmatpush.bf16.msrb.mxu0 %v3352_v32  ;;  %1947 = vmatpush.bf16.msra.mxu1 %v3348_v27 }
 0x38c   :  { %1961 = vmatpush.bf16.msrb.mxu2 %v3355_v35  ;;  %1975 = vmatpush.bf16.msrb.mxu3 %v3350_v31 }
 0x38f   :  { %1934 = vmatpush.bf16.msrb.mxu0 %v3371_v47  ;;  %1948 = vmatpush.bf16.msra.mxu1 %v3367_v40 }
 0x390   :  { %1962 = vmatpush.bf16.msrb.mxu2 %v3374_v51  ;;  %1976 = vmatpush.bf16.msrb.mxu3 %v3369_v46 }
 0x393   :  { %1935 = vmatpush.bf16.msrb.mxu0 %v3388_v62  ;;  %1949 = vmatpush.bf16.msra.mxu1 %v3386_v57 }
 0x394   :  { %1963 = vmatpush.bf16.msrb.mxu2 %v3397_v8  ;;  %1977 = vmatpush.bf16.msrb.mxu3 %v3390_v63 }
 0x397   :  { %1936 = vmatpush.bf16.msrb.mxu0 %v3395_v7  ;;  %1950 = vmatpush.bf16.msra.mxu1 %v3412_v20 }
 0x398   :  { %1964 = vmatpush.bf16.msrb.mxu2 %v3417_v26  ;;  %1978 = vmatpush.bf16.msrb.mxu3 %v3415_v25 }
 0x39b   :  { %1937 = vmatpush.bf16.msrb.mxu0 %v3401_v12  ;;  %1951 = vmatpush.bf16.msra.mxu1 %v3439_v42 }
 0x39c   :  { %1965 = vmatpush.bf16.msrb.mxu2 %v3427_v34  ;;  %1979 = vmatpush.bf16.msrb.mxu3 %v3429_v37 }
 0x3fa   :  { %v1527_v11 = vpop.f32.mrf.mxu0  ;;  %v1541_v1 = vpop.f32.mrf.mxu1 }
 0x3fb   :  { %v1574_v29 = vadd.f32 %v1527_v11, %v1510_v39  ;;  %v1575_v23 = vadd.f32 %v1541_v1, %v1511_v30  ;;  %v4350_v30 = vld [vmem:[#allocation28_spill] sm:$0xff] }
 0x3fc   :  { %v1517_v11 = vunpack.c.h.bf16 %v4350_v30 }
 0x3fd   :  { %v2728_v5 = vmul.f32 -1.442695, %v1574_v29  ;;  %v2730_v52 = vmul.f32 -1.442695, %v1575_v23 }
 0x3ff   :  { %2985 = vpow2.f32 %v2728_v5 }
 0x400   :  { %2987 = vpow2.f32 %v2730_v52 }
 0x401   :  { %v1569_v24 = vpop.f32.mrf.mxu3  ;;  %v1555_v13 = vpop.f32.mrf.mxu2 }
 0x402   :  { %v1577_v44 = vadd.f32 %v1569_v24, %v1513_v41  ;;  %v1529_v9 = vpop.f32.mrf.mxu0  ;;  %v1543_v21 = vpop.f32.mrf.mxu1  ;;  %v1576_v29 = vadd.f32 %v1555_v13, %v1512_v38 }
 0x403   :  { %v1578_v53 = vadd.f32 %v1529_v9, %v1514_v61  ;;  %v1579_v17 = vadd.f32 %v1543_v21, %v1515_v49 }
 0x404   :  { %v2732_v33 = vmul.f32 -1.442695, %v1577_v44 }
 0x405   :  { %v2986_v50 = vpop.eup %2985  ;;  %v2729_v45 = vmul.f32 -1.442695, %v1578_v53  ;;  %v2731_v28 = vmul.f32 -1.442695, %v1579_v17 }
 0x406   :  { %v2988_v36 = vpop.eup %2987  ;;  %v1588_v59 = vadd.f32 1.0, %v2986_v50  ;;  %2989 = vpow2.f32 %v2732_v33 }
 0x407   :  { %v1626_v55 = vadd.f32 1.0, %v2988_v36  ;;  %2991 = vpow2.f32 %v2729_v45 }
 0x408   :  { %2993 = vrcp.f32 %v1588_v59  ;;  %v1599_v17 = vand.u32 2147483647, %v1588_v59  ;;  %v1601_v33 = vand.u32 2147483648, %v1588_v59  ;;  %vm1595_vm3 = vweird.f32 %v1588_v59 }
 0x409   :  { %2995 = vrcp.f32 %v1626_v55  ;;  %v1571_v39 = vpop.f32.mrf.mxu3  ;;  %v1639_v50 = vand.u32 2147483648, %v1626_v55  ;;  %v1557_v13 = vpop.f32.mrf.mxu2  ;;  %vm1633_vm4 = vweird.f32 %v1626_v55 }
 0x40a   :  { %2997 = vpow2.f32 %v2731_v28  ;;  %v1581_v5 = vadd.f32 %v1571_v39, %v1517_v11  ;;  %v1637_v28 = vand.u32 2147483647, %v1626_v55  ;;  %v1516_v39 = vunpack.c.l.bf16 %v4350_v30 }
 0x40b   :  { %2999 = vtanh.f32 %v1576_v29  ;;  %vm1600_vm7 = vcmp.eq.f32.partialorder %v1599_v17, 8.507059e+37 }
 0x40c   :  { %v2990_v1 = vpop.eup %2989  ;;  %v2733_v21 = vmul.f32 -1.442695, %v1581_v5  ;;  %v1640_v5 = vor.u32 1.1754944e-38, %v1639_v50  ;;  %vm1638_vm8 = vcmp.eq.f32.partialorder %v1637_v28, 8.507059e+37 }
 0x40d   :  { %v2992_v23 = vpop.eup %2991  ;;  %v4001_v41 = vadd.f32 1.0, %v2990_v1  ;;  %v1602_v1 = vor.u32 1.1754944e-38, %v1601_v33 }
 0x40e   :  { %v2994_v52 = vpop.eup %2993  ;;  %v4003_v24 = vadd.f32 1.0, %v2992_v23 }
 0x40f   :  { %v2996_v56 = vpop.eup %2995  ;;  %v1591_v61 = vmul.f32 %v2994_v52, %v1588_v59  ;;  %vm1596_vm1 = vweird.f32 %v2994_v52 }
 0x410   :  { %v2998_v49 = vpop.eup %2997  ;;  %v1629_v44 = vmul.f32 %v2996_v56, %v1626_v55  ;;  %3001 = vrcp.f32 %v4003_v24  ;;  %vm1634_vm2 = vweird.f32 %v2996_v56  ;;  %vm1597_vm5 = vmor %vm1595_vm3, %vm1596_vm1  ;;  %v1614_v17 = vand.u32 2147483647, %v4003_v24 }
 0x411   :  { %v1592_v9 = vsub.f32 1.0, %v1591_v61  ;;  %v4006_v16 = vadd.f32 1.0, %v2998_v49  ;;  %3003 = vrcp.f32 %v4001_v41  ;;  %v3000_v11 = vpop.eup %2999  ;;  %vm1635_vm6 = vmor %vm1633_vm4, %vm1634_vm2  ;;  %v1580_v49 = vadd.f32 %v1557_v13, %v1516_v39 }
 0x412   :  { %v1630_v53 = vsub.f32 1.0, %v1629_v44  ;;  %v1616_v50 = vand.u32 2147483648, %v4003_v24  ;;  %vm1610_vm10 = vweird.f32 %v4003_v24  ;;  %vm1615_vm14 = vcmp.eq.f32.partialorder %v1614_v17, 8.507059e+37 }
 0x413   :  { %v1593_v45 = vmul.f32 %v2994_v52, %v1592_v9  ;;  %3005 = vrcp.f32 %v4006_v16  ;;  %vm1648_vm12 = vweird.f32 %v4006_v16  ;;  %vm1673_vm2 = vweird.f32 %v4001_v41 }
 0x414   :  { %v1631_v36 = vmul.f32 %v2996_v56, %v1630_v53  ;;  %3007 = vpow2.f32 %v2733_v21 }
 0x415   :  { %v1594_v38 = vadd.f32 %v2994_v52, %v1593_v45  ;;  %3009 = vtanh.f32 %v1580_v49 }
 0x416   :  { %v1632_v29 = vadd.f32 %v2996_v56, %v1631_v36  ;;  %v3002_v23 = vpop.eup %3001 }
 0x417   :  { %v1598_v61 = vsel %vm1597_vm5, %v2994_v52, %v1594_v38  ;;  %v4011_v44 = vpop.eup %3003  ;;  %v1606_v59 = vmul.f32 %v3002_v23, %v4003_v24  ;;  %vm1611_vm9 = vweird.f32 %v3002_v23  ;;  %v1654_v38 = vand.u32 2147483648, %v4006_v16 }
 0x418   :  { %v1603_v9 = vsel %vm1600_vm7, %v1602_v1, %v1598_v61  ;;  %v1636_v53 = vsel %vm1635_vm6, %v2996_v56, %v1632_v29  ;;  %v1669_v52 = vmul.f32 %v4011_v44, %v4001_v41  ;;  %v1652_v1 = vand.u32 2147483647, %v4006_v16  ;;  %vm1612_vm13 = vmor %vm1610_vm10, %vm1611_vm9 }
 0x419   :  { %v3006_v30 = vpop.eup %3005  ;;  %v1641_v21 = vsel %vm1638_vm8, %v1640_v5, %v1636_v53  ;;  %v1700_v45 = vmul.f32 %v3000_v11, %v1603_v9  ;;  %v1607_v33 = vsub.f32 1.0, %v1606_v59  ;;  %v1617_v29 = vor.u32 1.1754944e-38, %v1616_v50 }
 0x41a   :  { %v1698_v55 = vmul.f32 %v1641_v21, %v3944_v60  ;;  %v1644_v36 = vmul.f32 %v3006_v30, %v4006_v16  ;;  %v3008_v2 = vpop.eup %3007  ;;  %vm1649_vm11 = vweird.f32 %v3006_v30  ;;  %v1670_v5 = vsub.f32 1.0, %v1669_v52 }
 0x41b   :  { %v1608_v13 = vmul.f32 %v3002_v23, %v1607_v33  ;;  %v1667_v60 = vadd.f32 1.0, %v3008_v2  ;;  %v3010_v9 = vpop.eup %3009  ;;  %vm1650_vm15 = vmor %vm1648_vm12, %vm1649_vm11  ;;  %v1655_v53 = vor.u32 1.1754944e-38, %v1654_v38  ;;  %vm1653_vm0 = vcmp.eq.f32.partialorder %v1652_v1, 8.507059e+37 }
 0x41c   :  { %v4020_v56 = vadd.f32 %v1700_v45, %v1698_v55  ;;  %v1645_v28 = vsub.f32 1.0, %v1644_v36  ;;  %v1671_v45 = vmul.f32 %v4011_v44, %v1670_v5  ;;  %vm1674_vm1 = vweird.f32 %v4011_v44 }
 0x41d   :  { %v1609_v11 = vadd.f32 %v3002_v23, %v1608_v13  ;;  %3011 = vrcp.f32 %v1667_v60  ;;  %v1679_v52 = vand.u32 2147483648, %v4001_v41  ;;  %v1694_v17 = vand.u32 2147483648, %v1667_v60  ;;  %vm1675_vm4 = vmor %vm1673_vm2, %vm1674_vm1 }
 0x41e   :  { %v1646_v39 = vmul.f32 %v3006_v30, %v1645_v28  ;;  %3013 = vtanh.f32 %v4020_v56  ;;  %v1692_v28 = vand.u32 2147483647, %v1667_v60  ;;  %vm1688_vm5 = vweird.f32 %v1667_v60 }
 0x41f   :  { %v1613_v61 = vsel %vm1612_vm13, %v3002_v23, %v1609_v11  ;;  %v1672_v23 = vadd.f32 %v4011_v44, %v1671_v45  ;;  %v1680_v11 = vor.u32 1.1754944e-38, %v1679_v52  ;;  %v1695_v1 = vor.u32 1.1754944e-38, %v1694_v17 }
 0x420   :  { %v1647_v49 = vadd.f32 %v3006_v30, %v1646_v39  ;;  %v1618_v59 = vsel %vm1615_vm14, %v1617_v29, %v1613_v61  ;;  %vm1693_vm8 = vcmp.eq.f32.partialorder %v1692_v28, 8.507059e+37 }
 0x421   :  { %v1701_v2 = vmul.f32 %v3010_v9, %v1618_v59  ;;  %v1676_v38 = vsel %vm1675_vm4, %v4011_v44, %v1672_v23 }
 0x422   :  { %v1651_v24 = vsel %vm1650_vm15, %v3006_v30, %v1647_v49 }
 0x423   :  { %v1656_v21 = vsel %vm1653_vm0, %v1655_v53, %v1651_v24  ;;  %v3012_v16 = vpop.eup %3011 }
 0x424   :  { %v1699_v55 = vmul.f32 %v1656_v21, %v3953_v15  ;;  %v1684_v36 = vmul.f32 %v3012_v16, %v1667_v60  ;;  %v1677_v15 = vand.u32 2147483647, %v4001_v41  ;;  %vm1689_vm3 = vweird.f32 %v3012_v16  ;;  %v3014_v39 = vpop.eup %3013 }
 0x425   :  { %vm1690_vm6 = vmor %vm1688_vm5, %vm1689_vm3 }
 0x426   :  { %v4028_v33 = vadd.f32 %v1701_v2, %v1699_v55  ;;  %v1685_v30 = vsub.f32 1.0, %v1684_v36  ;;  %vm1678_vm7 = vcmp.eq.f32.partialorder %v1677_v15, 8.507059e+37 }
 0x427   :  { %v1681_v61 = vsel %vm1678_vm7, %v1680_v11, %v1676_v38 }
 0x428   :  { %3015 = vtanh.f32 %v4028_v33  ;;  %v1686_v50 = vmul.f32 %v3012_v16, %v1685_v30  ;;  %v1706_v9 = vmul.f32 %v3014_v39, %v1681_v61 }
 0x42a   :  { %v1687_v13 = vadd.f32 %v3012_v16, %v1686_v50 }
 0x42c   :  { %v1691_v5 = vsel %vm1690_vm6, %v3012_v16, %v1687_v13 }
 0x42d   :  { %v1696_v49 = vsel %vm1693_vm8, %v1695_v1, %v1691_v5 }
 0x42e   :  { %v3016_v29 = vpop.eup %3015 }
 0x42f   :  { %v1707_v41 = vmul.f32 %v3016_v29, %v1696_v49 }
 0x431   :  { %v1708_v53 = vpack.c.bf16 %v1707_v41, %v1706_v9 }
 0x433   :  { %1732 = vmatmul.bf16.vlgmr.msra.gmra.mxu0 %v1708_v53  ;;  %1746 = vmatmul.bf16.vlgmr.msrb.gmra.mxu1 %v1708_v53 }
 0x434   :  { %1760 = vmatmul.bf16.vlgmr.msra.gmra.mxu2 %v1708_v53  ;;  %1774 = vmatmul.bf16.vlgmr.msra.gmra.mxu3 %v1708_v53 }
 0x435   :  { %2136 = vmatpush.bf16.msra.mxu0 %v3298_v54  ;;  %2150 = vmatpush.bf16.msrb.mxu1 %v3315_v6 }
 0x436   :  { %2164 = vmatpush.bf16.msra.mxu2 %v3283_v48  ;;  %2178 = vmatpush.bf16.msra.mxu3 %v3275_v43  ;;  %v4351_v43 = vld [vmem:[#allocation33_spill] sm:$0xff] }
 0x437   :  { %v1716_v48 = vunpack.c.l.bf16 %v4351_v43  ;;  %v1717_v54 = vunpack.c.h.bf16 %v4351_v43 }
 0x439   :  { %2137 = vmatpush.bf16.msra.mxu0 %v3309_v0  ;;  %2151 = vmatpush.bf16.msrb.mxu1 %v3322_v10 }
 0x43a   :  { %2165 = vmatpush.bf16.msra.mxu2 %v3312_v4  ;;  %2179 = vmatpush.bf16.msra.mxu3 %v3300_v58 }
 0x43d   :  { %2138 = vmatpush.bf16.msra.mxu0 %v3333_v19  ;;  %2152 = vmatpush.bf16.msrb.mxu1 %v3329_v14 }
 0x43e   :  { %2166 = vmatpush.bf16.msra.mxu2 %v3335_v22  ;;  %2180 = vmatpush.bf16.msra.mxu3 %v3331_v18  ;;  %v4352_v18 = vld [vmem:[#allocation30_spill] sm:$0xff] }
 0x43f   :  { %v1719_v19 = vunpack.c.h.bf16 %v4352_v18 }
 0x441   :  { %2139 = vmatpush.bf16.msra.mxu0 %v3352_v32  ;;  %2153 = vmatpush.bf16.msrb.mxu1 %v3348_v27  ;;  %v4353_v27 = vld [vmem:[#allocation35_spill] sm:$0xff] }
 0x442   :  { %2167 = vmatpush.bf16.msra.mxu2 %v3355_v35  ;;  %2181 = vmatpush.bf16.msra.mxu3 %v3350_v31  ;;  %v1720_v31 = vunpack.c.l.bf16 %v4353_v27  ;;  %v1721_v32 = vunpack.c.h.bf16 %v4353_v27 }
 0x445   :  { %2140 = vmatpush.bf16.msra.mxu0 %v3371_v47  ;;  %2154 = vmatpush.bf16.msrb.mxu1 %v3367_v40 }
 0x446   :  { %2168 = vmatpush.bf16.msra.mxu2 %v3374_v51  ;;  %2182 = vmatpush.bf16.msra.mxu3 %v3369_v46 }
 0x449   :  { %2141 = vmatpush.bf16.msra.mxu0 %v3388_v62  ;;  %2155 = vmatpush.bf16.msrb.mxu1 %v3386_v57 }
 0x44a   :  { %2169 = vmatpush.bf16.msra.mxu2 %v3397_v8  ;;  %2183 = vmatpush.bf16.msra.mxu3 %v3390_v63 }
 0x44d   :  { %2142 = vmatpush.bf16.msra.mxu0 %v3395_v7  ;;  %2156 = vmatpush.bf16.msrb.mxu1 %v3412_v20 }
 0x44e   :  { %2170 = vmatpush.bf16.msra.mxu2 %v3417_v26  ;;  %2184 = vmatpush.bf16.msra.mxu3 %v3415_v25  ;;  %v1718_v26 = vunpack.c.l.bf16 %v4352_v18 }
 0x451   :  { %2143 = vmatpush.bf16.msra.mxu0 %v3401_v12  ;;  %2157 = vmatpush.bf16.msrb.mxu1 %v3439_v42 }
 0x452   :  { %2171 = vmatpush.bf16.msra.mxu2 %v3427_v34  ;;  %2185 = vmatpush.bf16.msra.mxu3 %v3429_v37  ;;  %v4354_v37 = vld [vmem:[#allocation32_spill] sm:$0xff] }
 0x453   :  { %v1723_v42 = vunpack.c.h.bf16 %v4354_v37  ;;  %v1722_v5 = vunpack.c.l.bf16 %v4354_v37 }
 0x4b0   :  { %v1733_v58 = vpop.f32.mrf.mxu0  ;;  %v1747_v0 = vpop.f32.mrf.mxu1 }
 0x4b1   :  { %v1780_v4 = vadd.f32 %v1733_v58, %v1716_v48  ;;  %v1781_v6 = vadd.f32 %v1747_v0, %v1717_v54 }
 0x4b3   :  { %v2734_v10 = vmul.f32 -1.442695, %v1780_v4  ;;  %v2736_v14 = vmul.f32 -1.442695, %v1781_v6 }
 0x4b5   :  { %3017 = vpow2.f32 %v2734_v10 }
 0x4b6   :  { %3019 = vpow2.f32 %v2736_v14 }
 0x4b7   :  { %v1775_v22 = vpop.f32.mrf.mxu3  ;;  %v1761_v25 = vpop.f32.mrf.mxu2 }
 0x4b8   :  { %v1783_v35 = vadd.f32 %v1775_v22, %v1719_v19  ;;  %v1735_v40 = vpop.f32.mrf.mxu0  ;;  %v1749_v46 = vpop.f32.mrf.mxu1  ;;  %v1782_v60 = vadd.f32 %v1761_v25, %v1718_v26 }
 0x4b9   :  { %v1784_v47 = vadd.f32 %v1735_v40, %v1720_v31  ;;  %v1785_v51 = vadd.f32 %v1749_v46, %v1721_v32 }
 0x4ba   :  { %v2738_v57 = vmul.f32 -1.442695, %v1783_v35 }
 0x4bb   :  { %v3018_v62 = vpop.eup %3017  ;;  %v2735_v63 = vmul.f32 -1.442695, %v1784_v47  ;;  %v2737_v12 = vmul.f32 -1.442695, %v1785_v51 }
 0x4bc   :  { %v3020_v7 = vpop.eup %3019  ;;  %v1794_v8 = vadd.f32 1.0, %v3018_v62  ;;  %3021 = vpow2.f32 %v2738_v57 }
 0x4bd   :  { %v1832_v20 = vadd.f32 1.0, %v3020_v7  ;;  %3023 = vpow2.f32 %v2735_v63 }
 0x4be   :  { %3025 = vrcp.f32 %v1794_v8  ;;  %v1805_v50 = vand.u32 2147483647, %v1794_v8  ;;  %v1807_v28 = vand.u32 2147483648, %v1794_v8  ;;  %vm1801_vm11 = vweird.f32 %v1794_v8 }
 0x4bf   :  { %3027 = vrcp.f32 %v1832_v20  ;;  %v1777_v34 = vpop.f32.mrf.mxu3  ;;  %v1845_v13 = vand.u32 2147483648, %v1832_v20  ;;  %v1843_v11 = vand.u32 2147483647, %v1832_v20  ;;  %v1763_v1 = vpop.f32.mrf.mxu2  ;;  %vm1839_vm12 = vweird.f32 %v1832_v20 }
 0x4c0   :  { %3029 = vpow2.f32 %v2737_v12  ;;  %v1787_v24 = vadd.f32 %v1777_v34, %v1723_v42  ;;  %v1808_v49 = vor.u32 1.1754944e-38, %v1807_v28  ;;  %vm1806_vm15 = vcmp.eq.f32.partialorder %v1805_v50, 8.507059e+37 }
 0x4c1   :  { %3031 = vtanh.f32 %v1782_v60  ;;  %v1846_v53 = vor.u32 1.1754944e-38, %v1845_v13  ;;  %v1786_v48 = vadd.f32 %v1763_v1, %v1722_v5  ;;  %vm1844_vm0 = vcmp.eq.f32.partialorder %v1843_v11, 8.507059e+37 }
 0x4c2   :  { %v3022_v44 = vpop.eup %3021  ;;  %v2739_v17 = vmul.f32 -1.442695, %v1787_v24 }
 0x4c3   :  { %v3024_v59 = vpop.eup %3023  ;;  %v4077_v21 = vadd.f32 1.0, %v3022_v44 }
 0x4c4   :  { %v3026_v2 = vpop.eup %3025  ;;  %v4079_v45 = vadd.f32 1.0, %v3024_v59 }
 0x4c5   :  { %v3028_v55 = vpop.eup %3027  ;;  %v1797_v16 = vmul.f32 %v3026_v2, %v1794_v8  ;;  %vm1802_vm9 = vweird.f32 %v3026_v2 }
 0x4c6   :  { %v3030_v36 = vpop.eup %3029  ;;  %v1835_v23 = vmul.f32 %v3028_v55, %v1832_v20  ;;  %3033 = vrcp.f32 %v4079_v45  ;;  %vm1840_vm10 = vweird.f32 %v3028_v55  ;;  %vm1803_vm13 = vmor %vm1801_vm11, %vm1802_vm9  ;;  %v1820_v32 = vand.u32 2147483647, %v4079_v45 }
 0x4c7   :  { %v1798_v30 = vsub.f32 1.0, %v1797_v16  ;;  %v4082_v52 = vadd.f32 1.0, %v3030_v36  ;;  %3035 = vrcp.f32 %v4077_v21  ;;  %v3032_v61 = vpop.eup %3031  ;;  %vm1841_vm14 = vmor %vm1839_vm12, %vm1840_vm10  ;;  %v1822_v35 = vand.u32 2147483648, %v4079_v45 }
 0x4c8   :  { %v1836_v15 = vsub.f32 1.0, %v1835_v23  ;;  %vm1816_vm2 = vweird.f32 %v4079_v45  ;;  %vm1821_vm6 = vcmp.eq.f32.partialorder %v1820_v32, 8.507059e+37  ;;  %vm1879_vm10 = vweird.f32 %v4077_v21 }
 0x4c9   :  { %v1799_v38 = vmul.f32 %v3026_v2, %v1798_v30  ;;  %3037 = vrcp.f32 %v4082_v52  ;;  %v1860_v51 = vand.u32 2147483648, %v4082_v52  ;;  %v1858_v63 = vand.u32 2147483647, %v4082_v52 }
 0x4ca   :  { %v1837_v39 = vmul.f32 %v3028_v55, %v1836_v15  ;;  %3039 = vpow2.f32 %v2739_v17  ;;  %vm1854_vm4 = vweird.f32 %v4082_v52  ;;  %v1823_v7 = vor.u32 1.1754944e-38, %v1822_v35 }
 0x4cb   :  { %v1800_v29 = vadd.f32 %v3026_v2, %v1799_v38  ;;  %3041 = vtanh.f32 %v1786_v48  ;;  %v1861_v26 = vor.u32 1.1754944e-38, %v1860_v51  ;;  %vm1859_vm8 = vcmp.eq.f32.partialorder %v1858_v63, 8.507059e+37 }
 0x4cc   :  { %v1838_v9 = vadd.f32 %v3028_v55, %v1837_v39  ;;  %v3034_v41 = vpop.eup %3033  ;;  %v1885_v36 = vand.u32 2147483648, %v4077_v21 }
 0x4cd   :  { %v1804_v43 = vsel %vm1803_vm13, %v3026_v2, %v1800_v29  ;;  %v4087_v54 = vpop.eup %3035  ;;  %v1812_v4 = vmul.f32 %v3034_v41, %v4079_v45  ;;  %vm1817_vm1 = vweird.f32 %v3034_v41 }
 0x4ce   :  { %v1809_v58 = vsel %vm1806_vm15, %v1808_v49, %v1804_v43  ;;  %v1842_v0 = vsel %vm1841_vm14, %v3028_v55, %v1838_v9  ;;  %v1875_v31 = vmul.f32 %v4087_v54, %v4077_v21  ;;  %vm1818_vm5 = vmor %vm1816_vm2, %vm1817_vm1  ;;  %vm1880_vm9 = vweird.f32 %v4087_v54 }
 0x4cf   :  { %v3038_v6 = vpop.eup %3037  ;;  %v1847_v10 = vsel %vm1844_vm0, %v1846_v53, %v1842_v0  ;;  %v1906_v14 = vmul.f32 %v3032_v61, %v1809_v58  ;;  %v1813_v19 = vsub.f32 1.0, %v1812_v4  ;;  %vm1881_vm12 = vmor %vm1879_vm10, %vm1880_vm9  ;;  %v1886_v28 = vor.u32 1.1754944e-38, %v1885_v36  ;;  %v4355_v61 = vld [vmem:[#allocation37_spill] sm:$0xff]  ;;  %v4356_v0 = vld [vmem:[#allocation34_spill] sm:$0xff] }
 0x4d0   :  { %v1904_v18 = vmul.f32 %v1847_v10, %v4020_v56  ;;  %v1850_v22 = vmul.f32 %v3038_v6, %v4082_v52  ;;  %v3040_v27 = vpop.eup %3039  ;;  %vm1855_vm3 = vweird.f32 %v3038_v6  ;;  %v1876_v8 = vsub.f32 1.0, %v1875_v31  ;;  %v4357_v10 = vld [vmem:[#allocation39_spill] sm:$0xff] }
 0x4d1   :  { %v1814_v47 = vmul.f32 %v3034_v41, %v1813_v19  ;;  %v1873_v56 = vadd.f32 1.0, %v3040_v27  ;;  %v3042_v25 = vpop.eup %3041  ;;  %vm1856_vm7 = vmor %vm1854_vm4, %vm1855_vm3  ;;  %v1922_v49 = vunpack.c.l.bf16 %v4355_v61  ;;  %v1923_v9 = vunpack.c.h.bf16 %v4355_v61 }
 0x4d2   :  { %v4096_v40 = vadd.f32 %v1906_v14, %v1904_v18  ;;  %v1851_v46 = vsub.f32 1.0, %v1850_v22  ;;  %v1877_v60 = vmul.f32 %v4087_v54, %v1876_v8  ;;  %v1925_v4 = vunpack.c.h.bf16 %v4356_v0 }
 0x4d3   :  { %v1815_v62 = vadd.f32 %v3034_v41, %v1814_v47  ;;  %3043 = vrcp.f32 %v1873_v56  ;;  %v1900_v23 = vand.u32 2147483648, %v1873_v56  ;;  %v1898_v52 = vand.u32 2147483647, %v1873_v56 }
 0x4d4   :  { %v1852_v57 = vmul.f32 %v3038_v6, %v1851_v46  ;;  %3045 = vtanh.f32 %v4096_v40  ;;  %v1878_v55 = vadd.f32 %v4087_v54, %v1877_v60  ;;  %vm1894_vm13 = vweird.f32 %v1873_v56 }
 0x4d5   :  { %v1819_v12 = vsel %vm1818_vm5, %v3034_v41, %v1815_v62  ;;  %v1901_v13 = vor.u32 1.1754944e-38, %v1900_v23  ;;  %vm1899_vm0 = vcmp.eq.f32.partialorder %v1898_v52, 8.507059e+37  ;;  %v1926_v14 = vunpack.c.l.bf16 %v4357_v10 }
 0x4d6   :  { %v1853_v20 = vadd.f32 %v3038_v6, %v1852_v57  ;;  %v1824_v34 = vsel %vm1821_vm6, %v1823_v7, %v1819_v12  ;;  %v1882_v15 = vsel %vm1881_vm12, %v4087_v54, %v1878_v55  ;;  %v1927_v18 = vunpack.c.h.bf16 %v4357_v10  ;;  %v4358_v12 = vld [vmem:[#allocation36_spill] sm:$0xff] }
 0x4d7   :  { %v1907_v42 = vmul.f32 %v3042_v25, %v1824_v34  ;;  %v1924_v7 = vunpack.c.l.bf16 %v4356_v0 }
 0x4d8   :  { %v1857_v37 = vsel %vm1856_vm7, %v3038_v6, %v1853_v20  ;;  %v1929_v20 = vunpack.c.h.bf16 %v4358_v12 }
 0x4d9   :  { %v1862_v44 = vsel %vm1859_vm8, %v1861_v26, %v1857_v37  ;;  %v3044_v24 = vpop.eup %3043 }
 0x4da   :  { %v1905_v59 = vmul.f32 %v1862_v44, %v4028_v33  ;;  %v1890_v45 = vmul.f32 %v3044_v24, %v1873_v56  ;;  %v1883_v33 = vand.u32 2147483647, %v4077_v21  ;;  %vm1895_vm11 = vweird.f32 %v3044_v24  ;;  %v3046_v50 = vpop.eup %3045 }
 0x4db   :  { %vm1896_vm14 = vmor %vm1894_vm13, %vm1895_vm11 }
 0x4dc   :  { %v4104_v2 = vadd.f32 %v1907_v42, %v1905_v59  ;;  %v1891_v16 = vsub.f32 1.0, %v1890_v45  ;;  %vm1884_vm15 = vcmp.eq.f32.partialorder %v1883_v33, 8.507059e+37 }
 0x4dd   :  { %v1887_v11 = vsel %vm1884_vm15, %v1886_v28, %v1882_v15 }
 0x4de   :  { %3047 = vtanh.f32 %v4104_v2  ;;  %v1892_v30 = vmul.f32 %v3044_v24, %v1891_v16  ;;  %v1912_v29 = vmul.f32 %v3046_v50, %v1887_v11 }
 0x4e0   :  { %v1893_v17 = vadd.f32 %v3044_v24, %v1892_v30 }
 0x4e2   :  { %v1897_v39 = vsel %vm1896_vm14, %v3044_v24, %v1893_v17 }
 0x4e3   :  { %v1902_v1 = vsel %vm1899_vm0, %v1901_v13, %v1897_v39  ;;  %v1928_v39 = vunpack.c.l.bf16 %v4358_v12 }
 0x4e4   :  { %v3048_v38 = vpop.eup %3047 }
 0x4e5   :  { %v1913_v21 = vmul.f32 %v3048_v38, %v1902_v1 }
 0x4e7   :  { %v1914_v5 = vpack.c.bf16 %v1913_v21, %v1912_v29 }
 0x4e9   :  { %1938 = vmatmul.bf16.vlgmr.msrb.gmra.mxu0 %v1914_v5  ;;  %1952 = vmatmul.bf16.vlgmr.msra.gmra.mxu1 %v1914_v5 }
 0x4ea   :  { %1966 = vmatmul.bf16.vlgmr.msrb.gmra.mxu2 %v1914_v5  ;;  %1980 = vmatmul.bf16.vlgmr.msrb.gmra.mxu3 %v1914_v5 }
 0x566   :  { %v1939_v41 = vpop.f32.mrf.mxu0  ;;  %v1953_v53 = vpop.f32.mrf.mxu1 }
 0x567   :  { %v1986_v43 = vadd.f32 %v1939_v41, %v1922_v49  ;;  %v1987_v48 = vadd.f32 %v1953_v53, %v1923_v9 }
 0x569   :  { %v2740_v54 = vmul.f32 -1.442695, %v1986_v43  ;;  %v2742_v58 = vmul.f32 -1.442695, %v1987_v48 }
 0x56b   :  { %3049 = vpow2.f32 %v2740_v54 }
 0x56c   :  { %3051 = vpow2.f32 %v2742_v58 }
 0x56d   :  { %v1981_v6 = vpop.f32.mrf.mxu3  ;;  %v1967_v63 = vpop.f32.mrf.mxu2 }
 0x56e   :  { %v1989_v19 = vadd.f32 %v1981_v6, %v1925_v4  ;;  %v1941_v22 = vpop.f32.mrf.mxu0  ;;  %v1955_v27 = vpop.f32.mrf.mxu1  ;;  %v1988_v26 = vadd.f32 %v1967_v63, %v1924_v7 }
 0x56f   :  { %v1990_v31 = vadd.f32 %v1941_v22, %v1926_v14  ;;  %v1991_v32 = vadd.f32 %v1955_v27, %v1927_v18 }
 0x570   :  { %v2744_v35 = vmul.f32 -1.442695, %v1989_v19 }
 0x571   :  { %v3050_v46 = vpop.eup %3049  ;;  %v2741_v47 = vmul.f32 -1.442695, %v1990_v31  ;;  %v2743_v57 = vmul.f32 -1.442695, %v1991_v32 }
 0x572   :  { %v3052_v51 = vpop.eup %3051  ;;  %v2000_v56 = vadd.f32 1.0, %v3050_v46  ;;  %3053 = vpow2.f32 %v2744_v35 }
 0x573   :  { %v2038_v62 = vadd.f32 1.0, %v3052_v51  ;;  %3055 = vpow2.f32 %v2741_v47 }
 0x574   :  { %3057 = vrcp.f32 %v2000_v56  ;;  %v2011_v30 = vand.u32 2147483647, %v2000_v56  ;;  %v2013_v52 = vand.u32 2147483648, %v2000_v56  ;;  %vm2007_vm3 = vweird.f32 %v2000_v56 }
 0x575   :  { %3059 = vrcp.f32 %v2038_v62  ;;  %v1983_v8 = vpop.f32.mrf.mxu3  ;;  %v2051_v17 = vand.u32 2147483648, %v2038_v62  ;;  %v2049_v28 = vand.u32 2147483647, %v2038_v62  ;;  %v1969_v13 = vpop.f32.mrf.mxu2  ;;  %vm2045_vm4 = vweird.f32 %v2038_v62 }
 0x576   :  { %3061 = vpow2.f32 %v2743_v57  ;;  %v1993_v37 = vadd.f32 %v1983_v8, %v1929_v20  ;;  %v2014_v1 = vor.u32 1.1754944e-38, %v2013_v52  ;;  %vm2012_vm7 = vcmp.eq.f32.partialorder %v2011_v30, 8.507059e+37 }
 0x577   :  { %3063 = vtanh.f32 %v1988_v26  ;;  %v2052_v5 = vor.u32 1.1754944e-38, %v2051_v17  ;;  %v1992_v49 = vadd.f32 %v1969_v13, %v1928_v39  ;;  %vm2050_vm8 = vcmp.eq.f32.partialorder %v2049_v28, 8.507059e+37 }
 0x578   :  { %v3054_v25 = vpop.eup %3053  ;;  %v2745_v23 = vmul.f32 -1.442695, %v1993_v37 }
 0x579   :  { %v3056_v34 = vpop.eup %3055  ;;  %v4121_v44 = vadd.f32 1.0, %v3054_v25 }
 0x57a   :  { %v3058_v42 = vpop.eup %3057  ;;  %v4123_v60 = vadd.f32 1.0, %v3056_v34 }
 0x57b   :  { %v3060_v59 = vpop.eup %3059  ;;  %v2003_v24 = vmul.f32 %v3058_v42, %v2000_v56  ;;  %vm2008_vm1 = vweird.f32 %v3058_v42 }
 0x57c   :  { %v3062_v45 = vpop.eup %3061  ;;  %v2041_v55 = vmul.f32 %v3060_v59, %v2038_v62  ;;  %3065 = vrcp.f32 %v4123_v60  ;;  %vm2046_vm2 = vweird.f32 %v3060_v59  ;;  %vm2009_vm5 = vmor %vm2007_vm3, %vm2008_vm1  ;;  %v2026_v18 = vand.u32 2147483647, %v4123_v60 }
 0x57d   :  { %v2004_v16 = vsub.f32 1.0, %v2003_v24  ;;  %v4126_v36 = vadd.f32 1.0, %v3062_v45  ;;  %3067 = vrcp.f32 %v4121_v44  ;;  %v3064_v11 = vpop.eup %3063  ;;  %vm2047_vm6 = vmor %vm2045_vm4, %vm2046_vm2  ;;  %v2028_v19 = vand.u32 2147483648, %v4123_v60 }
 0x57e   :  { %v2042_v33 = vsub.f32 1.0, %v2041_v55  ;;  %vm2022_vm10 = vweird.f32 %v4123_v60  ;;  %vm2027_vm14 = vcmp.eq.f32.partialorder %v2026_v18, 8.507059e+37  ;;  %vm2085_vm2 = vweird.f32 %v4121_v44 }
 0x57f   :  { %v2005_v15 = vmul.f32 %v3058_v42, %v2004_v16  ;;  %3069 = vrcp.f32 %v4126_v36  ;;  %v2066_v32 = vand.u32 2147483648, %v4126_v36  ;;  %v2064_v47 = vand.u32 2147483647, %v4126_v36 }
 0x580   :  { %v2043_v50 = vmul.f32 %v3060_v59, %v2042_v33  ;;  %3071 = vpow2.f32 %v2745_v23  ;;  %vm2060_vm12 = vweird.f32 %v4126_v36  ;;  %v2029_v51 = vor.u32 1.1754944e-38, %v2028_v19 }
 0x581   :  { %v2006_v38 = vadd.f32 %v3058_v42, %v2005_v15  ;;  %3073 = vtanh.f32 %v1992_v49  ;;  %v2067_v7 = vor.u32 1.1754944e-38, %v2066_v32  ;;  %vm2065_vm0 = vcmp.eq.f32.partialorder %v2064_v47, 8.507059e+37 }
 0x582   :  { %v2044_v29 = vadd.f32 %v3060_v59, %v2043_v50  ;;  %v3066_v21 = vpop.eup %3065  ;;  %v2091_v45 = vand.u32 2147483648, %v4121_v44 }
 0x583   :  { %v2010_v61 = vsel %vm2009_vm5, %v3058_v42, %v2006_v38  ;;  %v4131_v9 = vpop.eup %3067  ;;  %v2018_v43 = vmul.f32 %v3066_v21, %v4123_v60  ;;  %vm2023_vm9 = vweird.f32 %v3066_v21 }
 0x584   :  { %v2015_v41 = vsel %vm2012_vm7, %v2014_v1, %v2010_v61  ;;  %v2048_v53 = vsel %vm2047_vm6, %v3060_v59, %v2044_v29  ;;  %v2081_v14 = vmul.f32 %v4131_v9, %v4121_v44  ;;  %vm2024_vm13 = vmor %vm2022_vm10, %vm2023_vm9  ;;  %vm2086_vm1 = vweird.f32 %v4131_v9  ;;  %v4359_v1 = vld [vmem:[#allocation42_spill] sm:$0xff] }
 0x585   :  { %v3070_v48 = vpop.eup %3069  ;;  %v2053_v54 = vsel %vm2050_vm8, %v2052_v5, %v2048_v53  ;;  %v2112_v58 = vmul.f32 %v3064_v11, %v2015_v41  ;;  %v2019_v4 = vsub.f32 1.0, %v2018_v43  ;;  %vm2087_vm4 = vmor %vm2085_vm2, %vm2086_vm1  ;;  %v2092_v52 = vor.u32 1.1754944e-38, %v2091_v45  ;;  %v2847_v11 = vld [vmem:[%s4256_s4 + $0x38] sm:$0xff]  ;;  %v4362_v53 = vld [vmem:[#allocation8_spill] sm:$0xff] }
 0x586   :  { %v2110_v0 = vmul.f32 %v2053_v54, %v4096_v40  ;;  %v2056_v6 = vmul.f32 %v3070_v48, %v4126_v36  ;;  %v3072_v10 = vpop.eup %3071  ;;  %vm2061_vm11 = vweird.f32 %v3070_v48  ;;  %v2082_v56 = vsub.f32 1.0, %v2081_v14  ;;  %2395 = vmatpush.bf16.msrb.mxu0 %v2847_v11  ;;  %v4361_v41 = vld [vmem:[#allocation9_spill] sm:$0xff]  ;;  %v2845_v14 = vld [vmem:[%s4256_s4 + $0x28] sm:$0xff] }
 0x587   :  { %v2020_v31 = vmul.f32 %v3066_v21, %v2019_v4  ;;  %v2079_v40 = vadd.f32 1.0, %v3072_v10  ;;  %v3074_v63 = vpop.eup %3073  ;;  %vm2062_vm15 = vmor %vm2060_vm12, %vm2061_vm11  ;;  %v323_v29 = vadd.f32 %v4359_v1, %v3504_v3  ;;  %v274_v43 = vadd.f32 %v4362_v53, %v4361_v41  ;;  %v4363_v3 = vld [vmem:[#allocation38_spill] sm:$0xff] }
 0x588   :  { %v4140_v22 = vadd.f32 %v2112_v58, %v2110_v0  ;;  %v2057_v27 = vsub.f32 1.0, %v2056_v6  ;;  %v2083_v26 = vmul.f32 %v4131_v9, %v2082_v56  ;;  %v2846_v58 = vld [vmem:[%s4256_s4 + $0x30] sm:$0xff]  ;;  %v2131_v10 = vunpack.c.h.bf16 %v4363_v3 }
 0x589   :  { %v2021_v46 = vadd.f32 %v3066_v21, %v2020_v31  ;;  %3075 = vrcp.f32 %v2079_v40  ;;  %v2106_v55 = vand.u32 2147483648, %v2079_v40  ;;  %v2104_v36 = vand.u32 2147483647, %v2079_v40 }
 0x58a   :  { %v2058_v35 = vmul.f32 %v3070_v48, %v2057_v27  ;;  %3077 = vtanh.f32 %v4140_v22  ;;  %v2084_v59 = vadd.f32 %v4131_v9, %v2083_v26  ;;  %vm2100_vm5 = vweird.f32 %v2079_v40  ;;  %2396 = vmatpush.bf16.msrb.mxu0 %v2846_v58 }
 0x58b   :  { %v2025_v57 = vsel %vm2024_vm13, %v3066_v21, %v2021_v46  ;;  %v2107_v17 = vor.u32 1.1754944e-38, %v2106_v55  ;;  %vm2105_vm8 = vcmp.eq.f32.partialorder %v2104_v36, 8.507059e+37  ;;  %v4360_v21 = vld [vmem:[#allocation41_spill] sm:$0xff]  ;;  %v453_v0 = vpack.c.bf16 %v323_v29, %v274_v43  ;;  %v2840_v29 = vld [vmem:[%s4256_s4] sm:$0xff] }
 0x58c   :  { %v2059_v62 = vadd.f32 %v3070_v48, %v2058_v35  ;;  %v2030_v8 = vsel %vm2027_vm14, %v2029_v51, %v2025_v57  ;;  %v2088_v33 = vsel %vm2087_vm4, %v4131_v9, %v2084_v59  ;;  %v2128_v5 = vunpack.c.l.bf16 %v4360_v21  ;;  %v2844_v51 = vld [vmem:[%s4256_s4 + $0x20] sm:$0xff] }
 0x58d   :  { %v2113_v20 = vmul.f32 %v3074_v63, %v2030_v8  ;;  %v2129_v61 = vunpack.c.h.bf16 %v4360_v21  ;;  %v2132_v19 = vunpack.c.l.bf16 %v453_v0  ;;  %v2133_v27 = vunpack.c.h.bf16 %v453_v0 }
 0x58e   :  { %v2063_v12 = vsel %vm2062_vm15, %v3070_v48, %v2059_v62  ;;  %2397 = vmatpush.bf16.msrb.mxu0 %v2845_v14 }
 0x58f   :  { %v2068_v25 = vsel %vm2065_vm0, %v2067_v7, %v2063_v12  ;;  %v3076_v37 = vpop.eup %3075 }
 0x590   :  { %v2111_v34 = vmul.f32 %v2068_v25, %v4104_v2  ;;  %v2096_v60 = vmul.f32 %v3076_v37, %v2079_v40  ;;  %v2089_v2 = vand.u32 2147483647, %v4121_v44  ;;  %vm2101_vm3 = vweird.f32 %v3076_v37  ;;  %v3078_v30 = vpop.eup %3077 }
 0x591   :  { %vm2102_vm6 = vmor %vm2100_vm5, %vm2101_vm3  ;;  %v2130_v25 = vunpack.c.l.bf16 %v4363_v3 }
 0x592   :  { %v4148_v42 = vadd.f32 %v2113_v20, %v2111_v34  ;;  %v2097_v24 = vsub.f32 1.0, %v2096_v60  ;;  %vm2090_vm7 = vcmp.eq.f32.partialorder %v2089_v2, 8.507059e+37  ;;  %2398 = vmatpush.bf16.msrb.mxu0 %v2844_v51  ;;  %v2843_v20 = vld [vmem:[%s4256_s4 + $0x18] sm:$0xff]  ;;  %v4364_v34 = vld [vmem:[#allocation40_spill] sm:$0xff] }
 0x593   :  { %v2093_v28 = vsel %vm2090_vm7, %v2092_v52, %v2088_v33 }
 0x594   :  { %3079 = vtanh.f32 %v4148_v42  ;;  %v2098_v16 = vmul.f32 %v3076_v37, %v2097_v24  ;;  %v2118_v38 = vmul.f32 %v3078_v30, %v2093_v28  ;;  %v2842_v24 = vld [vmem:[%s4256_s4 + $0x10] sm:$0xff] }
 0x596   :  { %v2099_v23 = vadd.f32 %v3076_v37, %v2098_v16  ;;  %2399 = vmatpush.bf16.msrb.mxu0 %v2843_v20 }
 0x598   :  { %v2103_v50 = vsel %vm2102_vm6, %v3076_v37, %v2099_v23  ;;  %v2135_v37 = vunpack.c.h.bf16 %v4364_v34  ;;  %v2841_v23 = vld [vmem:[%s4256_s4 + $0x8] sm:$0xff] }
 0x599   :  { %v2108_v13 = vsel %vm2105_vm8, %v2107_v17, %v2103_v50 }
 0x59a   :  { %v3080_v15 = vpop.eup %3079  ;;  %2400 = vmatpush.bf16.msrb.mxu0 %v2842_v24 }
 0x59b   :  { %v2119_v44 = vmul.f32 %v3080_v15, %v2108_v13  ;;  %v2134_v15 = vunpack.c.l.bf16 %v4364_v34 }
 0x59d   :  { %v2120_v39 = vpack.c.bf16 %v2119_v44, %v2118_v38 }
 0x59e   :  { %2401 = vmatpush.bf16.msrb.mxu0 %v2841_v23 }
 0x59f   :  { %2144 = vmatmul.bf16.vlgmr.msra.gmra.mxu0 %v2120_v39  ;;  %2158 = vmatmul.bf16.vlgmr.msrb.gmra.mxu1 %v2120_v39 }
 0x5a0   :  { %2172 = vmatmul.bf16.vlgmr.msra.gmra.mxu2 %v2120_v39  ;;  %2186 = vmatmul.bf16.vlgmr.msra.gmra.mxu3 %v2120_v39 }
 0x5a2   :  { %2402 = vmatpush.bf16.msrb.mxu0 %v2840_v29 }
 0x61c   :  { %v2145_v49 = vpop.f32.mrf.mxu0  ;;  %v2159_v9 = vpop.f32.mrf.mxu1 }
 0x61d   :  { %v2192_v48 = vadd.f32 %v2145_v49, %v2128_v5  ;;  %v2193_v54 = vadd.f32 %v2159_v9, %v2129_v61 }
 0x61f   :  { %v2746_v4 = vmul.f32 -1.442695, %v2192_v48  ;;  %v2748_v6 = vmul.f32 -1.442695, %v2193_v54 }
 0x621   :  { %3081 = vpow2.f32 %v2746_v4 }
 0x622   :  { %3083 = vpow2.f32 %v2748_v6 }
 0x623   :  { %v2187_v18 = vpop.f32.mrf.mxu3  ;;  %v2173_v12 = vpop.f32.mrf.mxu2 }
 0x624   :  { %v2195_v31 = vadd.f32 %v2187_v18, %v2131_v10  ;;  %v2147_v32 = vpop.f32.mrf.mxu0  ;;  %v2161_v40 = vpop.f32.mrf.mxu1  ;;  %v2194_v59 = vadd.f32 %v2173_v12, %v2130_v25 }
 0x625   :  { %v2196_v35 = vadd.f32 %v2147_v32, %v2132_v19  ;;  %v2197_v46 = vadd.f32 %v2161_v40, %v2133_v27 }
 0x626   :  { %v2750_v47 = vmul.f32 -1.442695, %v2195_v31 }
 0x627   :  { %v3082_v56 = vpop.eup %3081  ;;  %v2747_v57 = vmul.f32 -1.442695, %v2196_v35  ;;  %v2749_v7 = vmul.f32 -1.442695, %v2197_v46 }
 0x628   :  { %v3084_v62 = vpop.eup %3083  ;;  %v4177_v63 = vadd.f32 1.0, %v3082_v56  ;;  %3085 = vpow2.f32 %v2750_v47 }
 0x629   :  { %v2244_v8 = vadd.f32 1.0, %v3084_v62  ;;  %3087 = vpow2.f32 %v2747_v57 }
 0x62a   :  { %3089 = vrcp.f32 %v4177_v63  ;;  %v2217_v39 = vand.u32 2147483647, %v4177_v63  ;;  %v2219_v11 = vand.u32 2147483648, %v4177_v63  ;;  %vm2213_vm11 = vweird.f32 %v4177_v63 }
 0x62b   :  { %3091 = vrcp.f32 %v2244_v8  ;;  %v2189_v26 = vpop.f32.mrf.mxu3  ;;  %v2257_v44 = vand.u32 2147483648, %v2244_v8  ;;  %v2175_v1 = vpop.f32.mrf.mxu2  ;;  %v2255_v5 = vand.u32 2147483647, %v2244_v8  ;;  %vm2251_vm12 = vweird.f32 %v2244_v8 }
 0x62c   :  { %3093 = vpow2.f32 %v2749_v7  ;;  %v2199_v2 = vadd.f32 %v2189_v26, %v2135_v37  ;;  %v2198_v41 = vadd.f32 %v2175_v1, %v2134_v15  ;;  %v2220_v43 = vor.u32 1.1754944e-38, %v2219_v11 }
 0x62d   :  { %v2258_v0 = vor.u32 1.1754944e-38, %v2257_v44  ;;  %vm2218_vm15 = vcmp.eq.f32.partialorder %v2217_v39, 8.507059e+37  ;;  %vm2256_vm0 = vcmp.eq.f32.partialorder %v2255_v5, 8.507059e+37 }
 0x62e   :  { %v3086_v60 = vpop.eup %3085  ;;  %v2751_v13 = vmul.f32 -1.442695, %v2199_v2 }
 0x62f   :  { %v3088_v45 = vpop.eup %3087  ;;  %v4188_v55 = vadd.f32 1.0, %v3086_v60 }
 0x630   :  { %v3090_v16 = vpop.eup %3089  ;;  %v4190_v36 = vadd.f32 1.0, %v3088_v45 }
 0x631   :  { %v3092_v33 = vpop.eup %3091  ;;  %v2209_v30 = vmul.f32 %v3090_v16, %v4177_v63  ;;  %3095 = vrcp.f32 %v4188_v55  ;;  %vm2214_vm9 = vweird.f32 %v3090_v16  ;;  %v2297_v31 = vand.u32 2147483648, %v4188_v55 }
 0x632   :  { %v3094_v52 = vpop.eup %3093  ;;  %v2247_v17 = vmul.f32 %v3092_v33, %v2244_v8  ;;  %3097 = vtanh.f32 %v2194_v59  ;;  %vm2252_vm10 = vweird.f32 %v3092_v33  ;;  %vm2215_vm13 = vmor %vm2213_vm11, %vm2214_vm9  ;;  %vm2228_vm1 = vweird.f32 %v4190_v36 }
 0x633   :  { %v2210_v50 = vsub.f32 1.0, %v2209_v30  ;;  %3099 = vrcp.f32 %v4190_v36  ;;  %v4199_v28 = vadd.f32 1.0, %v3094_v52  ;;  %vm2253_vm14 = vmor %vm2251_vm12, %vm2252_vm10  ;;  %v2232_v56 = vand.u32 2147483647, %v4190_v36 }
 0x634   :  { %v2248_v38 = vsub.f32 1.0, %v2247_v17  ;;  %v2234_v57 = vand.u32 2147483648, %v4190_v36  ;;  %vm2291_vm5 = vweird.f32 %v4188_v55  ;;  %v2295_v34 = vand.u32 2147483647, %v4188_v55 }
 0x635   :  { %v2211_v21 = vmul.f32 %v3090_v16, %v2210_v50  ;;  %3101 = vrcp.f32 %v4199_v28  ;;  %v2272_v51 = vand.u32 2147483648, %v4199_v28  ;;  %v2270_v8 = vand.u32 2147483647, %v4199_v28 }
 0x636   :  { %v2249_v61 = vmul.f32 %v3092_v33, %v2248_v38  ;;  %3103 = vpow2.f32 %v2751_v13  ;;  %v2235_v37 = vor.u32 1.1754944e-38, %v2234_v57  ;;  %vm2266_vm8 = vweird.f32 %v4199_v28 }
 0x637   :  { %v4207_v49 = vpop.eup %3095  ;;  %v2212_v9 = vadd.f32 %v3090_v16, %v2211_v21  ;;  %3105 = vtanh.f32 %v2198_v41  ;;  %vm2233_vm9 = vcmp.eq.f32.partialorder %v2232_v56, 8.507059e+37  ;;  %v2273_v45 = vor.u32 1.1754944e-38, %v2272_v51 }
 0x638   :  { %v3098_v53 = vpop.eup %3097  ;;  %v2250_v48 = vadd.f32 %v3092_v33, %v2249_v61  ;;  %v2287_v54 = vmul.f32 %v4207_v49, %v4188_v55  ;;  %vm2292_vm3 = vweird.f32 %v4207_v49  ;;  %vm2271_vm11 = vcmp.eq.f32.partialorder %v2270_v8, 8.507059e+37 }
 0x639   :  { %v3100_v58 = vpop.eup %3099  ;;  %v2216_v4 = vsel %vm2215_vm13, %v3090_v16, %v2212_v9  ;;  %vm4228_vm7 = vmor %vm2291_vm5, %vm2292_vm3  ;;  %v2298_v16 = vor.u32 1.1754944e-38, %v2297_v31  ;;  %vm2296_vm12 = vcmp.eq.f32.partialorder %v2295_v34, 8.507059e+37  ;;  %v2856_v9 = vld [vmem:[%s4257_s5] ss:$0 sm:$0xff] }
 0x63a   :  { %v2221_v6 = vsel %vm2218_vm15, %v2220_v43, %v2216_v4  ;;  %v2254_v3 = vsel %vm2253_vm14, %v3092_v33, %v2250_v48  ;;  %v2288_v10 = vsub.f32 1.0, %v2287_v54  ;;  %v2224_v14 = vmul.f32 %v3100_v58, %v4190_v36 }
 0x63b   :  { %v3102_v18 = vpop.eup %3101  ;;  %v2259_v19 = vsel %vm2256_vm0, %v2258_v0, %v2254_v3  ;;  %v2318_v27 = vmul.f32 %v3098_v53, %v2221_v6  ;;  %vm2229_vm2 = vweird.f32 %v3100_v58 }
 0x63c   :  { %v2316_v32 = vmul.f32 %v2259_v19, %v4140_v22  ;;  %v2289_v40 = vmul.f32 %v4207_v49, %v2288_v10  ;;  %v2225_v35 = vsub.f32 1.0, %v2224_v14  ;;  %v2262_v46 = vmul.f32 %v3102_v18, %v4199_v28  ;;  %v3104_v47 = vpop.eup %3103  ;;  %vm2230_vm6 = vmor %vm2228_vm1, %vm2229_vm2 }
 0x63d   :  { %v2285_v12 = vadd.f32 1.0, %v3104_v47  ;;  %vm2267_vm4 = vweird.f32 %v3102_v18  ;;  %v3106_v26 = vpop.eup %3105  ;;  %vm2409_vm1 = vcmask 31744  }
 0x63e   :  { %v2320_v62 = vadd.f32 %v2318_v27, %v2316_v32  ;;  %v2263_v63 = vsub.f32 1.0, %v2262_v46  ;;  %v2226_v7 = vmul.f32 %v3100_v58, %v2225_v35  ;;  %v2290_v22 = vadd.f32 %v4207_v49, %v2289_v40  ;;  %vm2268_vm10 = vmor %vm2266_vm8, %vm2267_vm4 }
 0x63f   :  { %v2312_v44 = vand.u32 2147483648, %v2285_v12  ;;  %v2310_v11 = vand.u32 2147483647, %v2285_v12  ;;  %vm2306_vm14 = vweird.f32 %v2285_v12 }
 0x640   :  { %3107 = vtanh.f32 %v2320_v62  ;;  %v2264_v20 = vmul.f32 %v3102_v18, %v2263_v63  ;;  %v2227_v25 = vadd.f32 %v3100_v58, %v2226_v7  ;;  %v2294_v55 = vsel %vm4228_vm7, %v4207_v49, %v2290_v22 }
 0x641   :  { %3109 = vrcp.f32 %v2285_v12  ;;  %v2299_v17 = vsel %vm2296_vm12, %v2298_v16, %v2294_v55  ;;  %v2313_v29 = vor.u32 1.1754944e-38, %v2312_v44  ;;  %vm2311_vm0 = vcmp.eq.f32.partialorder %v2310_v11, 8.507059e+37 }
 0x642   :  { %v2231_v59 = vsel %vm2230_vm6, %v3100_v58, %v2227_v25  ;;  %v2265_v24 = vadd.f32 %v3102_v18, %v2264_v20 }
 0x643   :  { %v2236_v2 = vsel %vm2233_vm9, %v2235_v37, %v2231_v59 }
 0x644   :  { %v2269_v36 = vsel %vm2268_vm10, %v3102_v18, %v2265_v24  ;;  %v2319_v23 = vmul.f32 %v3106_v26, %v2236_v2 }
 0x645   :  { %v2274_v33 = vsel %vm2271_vm11, %v2273_v45, %v2269_v36 }
 0x646   :  { %v3108_v30 = vpop.eup %3107  ;;  %v2317_v52 = vmul.f32 %v2274_v33, %v4148_v42 }
 0x647   :  { %v3110_v15 = vpop.eup %3109  ;;  %v2324_v50 = vmul.f32 %v3108_v30, %v2299_v17 }
 0x648   :  { %v2321_v28 = vadd.f32 %v2319_v23, %v2317_v52  ;;  %v2302_v13 = vmul.f32 %v3110_v15, %v2285_v12  ;;  %vm2307_vm13 = vweird.f32 %v3110_v15 }
 0x649   :  { %vm2308_vm15 = vmor %vm2306_vm14, %vm2307_vm13 }
 0x64a   :  { %3111 = vtanh.f32 %v2321_v28  ;;  %v2303_v38 = vsub.f32 1.0, %v2302_v13 }
 0x64c   :  { %v2304_v39 = vmul.f32 %v3110_v15, %v2303_v38 }
 0x64e   :  { %v2305_v1 = vadd.f32 %v3110_v15, %v2304_v39 }
 0x650   :  { %v3112_v21 = vpop.eup %3111  ;;  %v2309_v5 = vsel %vm2308_vm15, %v3110_v15, %v2305_v1 }
 0x651   :  { %v2314_v61 = vsel %vm2311_vm0, %v2313_v29, %v2309_v5 }
 0x652   :  { %v2325_v42 = vmul.f32 %v3112_v21, %v2314_v61 }
 0x654   :  { %v2326_v49 = vpack.c.bf16 %v2325_v42, %v2324_v50 }
 0x656   :  { %2403 = vmatmul.bf16.vlgmr.msrb.gmra.mxu0 %v2326_v49 }
 0x6d3   :  { %v2404_v41 = vpop.f32.mrf.mxu0 }
 0x6d4   :  { %v2405_v53 = vadd.f32 %v2856_v9, %v2404_v41 }
 0x6d6   :  { %v2410_v43 = vsel %vm2409_vm1, %v2405_v53, -inf }
 0x6d7   :  { %2411 = vmax.xlane.f32.xlu0 %v2410_v43 }
 0x6db   :  { %v2406_v48 = vpop.f32.mrf.mxu0 }
 0x6dc   :  { %v2407_v54 = vadd.f32 %v2856_v9, %v2406_v48 }
 0x6de   :  { %v2413_v58 = vsel %vm2409_vm1, %v2407_v54, -inf }
 0x6df   :  { %2414 = vmax.xlane.f32.xlu0 %v2413_v58 }
 0x74a   :  { %v2412_v0 = vpop.xlane.xlu0 %2411 }
 0x74b   :  { %v2416_v4 = vsub.f32 %v2405_v53, %v2412_v0 }
 0x74d   :  { %v2418_v6 = vmul.f32 1.442695, %v2416_v4 }
 0x74f   :  { %3113 = vpow2.f32 %v2418_v6 }
 0x752   :  { %v2415_v3 = vpop.xlane.xlu0 %2414 }
 0x753   :  { %v2417_v10 = vsub.f32 %v2407_v54, %v2415_v3 }
 0x755   :  { %v3114_v14 = vpop.eup %3113  ;;  %v2420_v18 = vmul.f32 1.442695, %v2417_v10 }
 0x756   :  { %v2422_v19 = vsel %vm2409_vm1, %v3114_v14, 0.0 }
 0x757   :  { %3115 = vpow2.f32 %v2420_v18  ;;  %2423 = vadd.xlane.f32.xlu1 %v2422_v19 }
 0x75d   :  { %v3116_v27 = vpop.eup %3115 }
 0x75e   :  { %v2425_v31 = vsel %vm2409_vm1, %v3116_v27, 0.0 }
 0x75f   :  { %2426 = vadd.xlane.f32.xlu1 %v2425_v31 }
 0x7ca   :  { %v2424_v32 = vpop.xlane.xlu1 %2423 }
 0x7cb   :  { %3117 = vlog2.f32 %v2424_v32 }
 0x7d1   :  { %v3118_v40 = vpop.eup %3117 }
 0x7d2   :  { %v2429_v35 = vmul.f32 0.6931472, %v3118_v40  ;;  %v2427_v46 = vpop.xlane.xlu1 %2426 }
 0x7d3   :  { %3119 = vlog2.f32 %v2427_v46 }
 0x7d4   :  { %v2432_v47 = vsub.f32 %v2416_v4, %v2429_v35 }
 0x7d6   :  { %2434 = vst.msk [vmem:[%s4258_s6] sm:$0xff] %vm2409_vm1, %v2432_v47 }
 0x7d9   :  { %v3120_v51 = vpop.eup %3119 }
 0x7da   :  { %v2431_v56 = vmul.f32 0.6931472, %v3120_v51 }
 0x7dc   :  { %v2433_v57 = vsub.f32 %v2417_v10, %v2431_v56 }
 0x7de   :  { %2435 = vst.msk [vmem:[%s4258_s6 + $0x8] sm:$0xff] %vm2409_vm1, %v2433_v57 }
 0x7df   :  { %2440 = vsyncpa [#allocation4], 1 }

</bundles_post_ra>
